<compile_context>
chip_gen: v7x
topology: tpu7x:2x2x1
jax: 0.10.0
libtpu: 0.0.40
codegen_flags: <defaults>
</compile_context>

<pallas_src>
import jax
import jax.numpy as jnp
from jax.experimental import pallas as pl
from jax.experimental.pallas import tpu as pltpu

# Layer widths straight from the PyTorch __init__.
BRANCH1_DIMS = [270, 200, 100, 256, 384, 384, 256, 250, 250, 200]
BRANCH2_DIMS = [3, 6, 12, 24, 48, 64, 72, 96, 96, 100]
OUT_IN, OUT_OUT = 300, 3            # fc_out_1: Linear(300, 3)

N1 = len(BRANCH1_DIMS) - 1          # 9 layers in branch 1
N2 = len(BRANCH2_DIMS) - 1          # 9 layers in branch 2

LANE = 128


def _rup(n, m):
    return (n + m - 1) // m * m


# ---- padded geometry (everything a multiple of 128 on the lane axis) -------
P1 = [_rup(d, LANE) for d in BRANCH1_DIMS]   # [384,256,128,256,384,384,256,256,256,256]
P2 = [_rup(d, LANE) for d in BRANCH2_DIMS]   # all 128
P_OUT = _rup(OUT_OUT, LANE)                  # 128

# Branch-1 weight slab: layers stacked along rows, width = max padded out-dim.
W1_MAXOUT = max(P1[1:])                      # 384
W1_ROW_OFF = []
_off = 0
for _l in range(N1):
    W1_ROW_OFF.append(_off)
    _off += P1[_l]
W1_ROWS = _off                               # 2560

# Branch-2 weight slab: every padded layer is 128x128.
W2_ROW_OFF = [l * 128 for l in range(N2)]
W2_ROWS = N2 * 128                           # 1152

# Head weight slab: rows [0,256) multiply latent1 (padded 256),
# rows [256,384) multiply latent2 (padded 128). Avoids the activation concat.
HEAD_ROWS = P1[-1] + P2[-1]                  # 384

# Bias slab: one row per layer, stride 8 rows so every bias starts on a
# sublane-tile boundary. Rows 0..N1-1: branch1, N1..N1+N2-1: branch2, last: head.
B_ROW_STRIDE = 8
B_NUM = N1 + N2 + 1                          # 19
B_ROWS = B_NUM * B_ROW_STRIDE                # 152
B_COLS = W1_MAXOUT                           # 384


# ----------------------------- kernel ---------------------------------------
def _fwd_kernel(x1_ref, x2_ref, w1_ref, w2_ref, wh_ref, b_ref, o_ref):
    # Branch 1: nine Linear + ReLU layers on the MXU, f32 accumulation.
    h1 = x1_ref[...]
    for l in range(N1):
        din, dout = P1[l], P1[l + 1]
        off = W1_ROW_OFF[l]
        w = w1_ref[off:off + din, 0:dout]
        b = b_ref[B_ROW_STRIDE * l:B_ROW_STRIDE * l + 1, 0:dout]
        h1 = jnp.maximum(
            jnp.dot(h1, w, preferred_element_type=jnp.float32) + b, 0.0)

    # Branch 2: nine Linear + ReLU layers (all padded to 128x128).
    h2 = x2_ref[...]
    for l in range(N2):
        off = W2_ROW_OFF[l]
        w = w2_ref[off:off + 128, 0:128]
        row = B_ROW_STRIDE * (N1 + l)
        b = b_ref[row:row + 1, 0:128]
        h2 = jnp.maximum(
            jnp.dot(h2, w, preferred_element_type=jnp.float32) + b, 0.0)

    # Head: split-weight sum replaces torch.cat((latent1, latent2), 1) + Linear.
    wa = wh_ref[0:P1[-1], 0:P_OUT]
    wb = wh_ref[P1[-1]:P1[-1] + P2[-1], 0:P_OUT]
    row = B_ROW_STRIDE * (N1 + N2)
    bo = b_ref[row:row + 1, 0:P_OUT]
    o_ref[...] = (jnp.dot(h1, wa, preferred_element_type=jnp.float32)
                  + jnp.dot(h2, wb, preferred_element_type=jnp.float32)
                  + bo)


# ----------------------------- wrapper ---------------------------------------
def pack_params(params):
    """Pack per-layer [in,out] weights / [out] biases into 4 padded f32 slabs."""
    w1, b1, w2, b2, w_out, b_out = params

    w1_slab = jnp.zeros((W1_ROWS, W1_MAXOUT), jnp.float32)
    for l in range(N1):
        r = W1_ROW_OFF[l]
        w1_slab = w1_slab.at[r:r + BRANCH1_DIMS[l], :BRANCH1_DIMS[l + 1]].set(w1[l])

    w2_slab = jnp.zeros((W2_ROWS, 128), jnp.float32)
    for l in range(N2):
        r = W2_ROW_OFF[l]
        w2_slab = w2_slab.at[r:r + BRANCH2_DIMS[l], :BRANCH2_DIMS[l + 1]].set(w2[l])

    wh_slab = jnp.zeros((HEAD_ROWS, P_OUT), jnp.float32)
    wh_slab = wh_slab.at[:BRANCH1_DIMS[-1], :OUT_OUT].set(w_out[:BRANCH1_DIMS[-1]])
    wh_slab = wh_slab.at[P1[-1]:P1[-1] + BRANCH2_DIMS[-1], :OUT_OUT].set(
        w_out[BRANCH1_DIMS[-1]:])

    b_slab = jnp.zeros((B_ROWS, B_COLS), jnp.float32)
    for l in range(N1):
        b_slab = b_slab.at[B_ROW_STRIDE * l, :BRANCH1_DIMS[l + 1]].set(b1[l])
    for l in range(N2):
        b_slab = b_slab.at[B_ROW_STRIDE * (N1 + l), :BRANCH2_DIMS[l + 1]].set(b2[l])
    b_slab = b_slab.at[B_ROW_STRIDE * (N1 + N2), :OUT_OUT].set(b_out)

    return w1_slab, w2_slab, wh_slab, b_slab


def fwd_model_free_end(x1, x2, packed, *, batch_tile=256):
    """x1: [B, 270], x2: [B, 3] -> [B, 3]."""
    w1_slab, w2_slab, wh_slab, b_slab = packed
    B = x1.shape[0]

    tb = min(batch_tile, _rup(B, 8))        # batch tile (>=8 rows, v7x-VMEM safe)
    b_pad = _rup(B, tb)

    # Zero-pad inputs to padded batch / padded feature widths (exact math).
    x1p = jnp.zeros((b_pad, P1[0]), jnp.float32).at[:B, :BRANCH1_DIMS[0]].set(x1)
    x2p = jnp.zeros((b_pad, P2[0]), jnp.float32).at[:B, :BRANCH2_DIMS[0]].set(x2)

    grid = (b_pad // tb,)
    out = pl.pallas_call(
        _fwd_kernel,
        out_shape=jax.ShapeDtypeStruct((b_pad, P_OUT), jnp.float32),
        grid_spec=pltpu.PrefetchScalarGridSpec(
            num_scalar_prefetch=0,
            grid=grid,
            in_specs=[
                pl.BlockSpec((tb, P1[0]), lambda i: (i, 0)),          # x1 tile
                pl.BlockSpec((tb, P2[0]), lambda i: (i, 0)),          # x2 tile
                pl.BlockSpec((W1_ROWS, W1_MAXOUT), lambda i: (0, 0)),  # resident
                pl.BlockSpec((W2_ROWS, 128), lambda i: (0, 0)),        # resident
                pl.BlockSpec((HEAD_ROWS, P_OUT), lambda i: (0, 0)),    # resident
                pl.BlockSpec((B_ROWS, B_COLS), lambda i: (0, 0)),      # resident
            ],
            out_specs=pl.BlockSpec((tb, P_OUT), lambda i: (i, 0)),
        ),
        compiler_params=pltpu.CompilerParams(
            dimension_semantics=("parallel",)),
    )(x1p, x2p, w1_slab, w2_slab, wh_slab, b_slab)

    return out[:B, :OUT_OUT]


# --------------------------- params & reference ------------------------------
def init_params(key):
    """Deterministic synthetic parameters (PyTorch-like uniform(-1/sqrt(in), 1/sqrt(in)))."""
    def make_layer(k, d_in, d_out):
        kw, kb = jax.random.split(k)
        bound = 1.0 / (d_in ** 0.5)
        w = jax.random.uniform(kw, (d_in, d_out), jnp.float32, -bound, bound)
        b = jax.random.uniform(kb, (d_out,), jnp.float32, -bound, bound)
        return w, b

    keys = jax.random.split(key, N1 + N2 + 1)
    w1, b1, w2, b2 = [], [], [], []
    ki = 0
    for i in range(N1):
        w, b = make_layer(keys[ki], BRANCH1_DIMS[i], BRANCH1_DIMS[i + 1]); ki += 1
        w1.append(w); b1.append(b)
    for i in range(N2):
        w, b = make_layer(keys[ki], BRANCH2_DIMS[i], BRANCH2_DIMS[i + 1]); ki += 1
        w2.append(w); b2.append(b)
    w_out, b_out = make_layer(keys[ki], OUT_IN, OUT_OUT)
    return w1, b1, w2, b2, w_out, b_out


def reference(x1, x2, params):
    """Pure-JAX reference of the PyTorch forward."""
    w1, b1, w2, b2, w_out, b_out = params
    h1 = x1
    for w, b in zip(w1, b1):
        h1 = jnp.maximum(h1 @ w + b, 0.0)
    h2 = x2
    for w, b in zip(w2, b2):
        h2 = jnp.maximum(h2 @ w + b, 0.0)
    latent = jnp.concatenate([h1, h2], axis=1)
    return latent @ w_out + b_out


if __name__ == "__main__":
    key = jax.random.PRNGKey(0)
    kp, kx1, kx2 = jax.random.split(key, 3)

    params = init_params(kp)
    packed = jax.tree_util.tree_map(jax.block_until_ready, pack_params(params))

    B = 8
    x1 = jax.random.normal(kx1, (B, BRANCH1_DIMS[0]), jnp.float32)   # [8, 270]
    x2 = jax.random.normal(kx2, (B, BRANCH2_DIMS[0]), jnp.float32)   # [8, 3]

    fwd = jax.jit(fwd_model_free_end)
    out = jax.block_until_ready(fwd(x1, x2, packed))

    ref = jax.block_until_ready(reference(x1, x2, params))
    assert out.shape == (B, OUT_OUT)
    assert jnp.allclose(out, ref, atol=1e-4, rtol=1e-4), "mismatch vs reference"

    print("KERNEL_OK")
</pallas_src>

<mosaic_0001>
module attributes {stable_mosaic.version = 11 : i64} {
  func.func @_fwd_kernel(%arg0: i32, %arg1: memref<8x384xf32, #tpu.memory_space<vmem>>, %arg2: memref<8x128xf32, #tpu.memory_space<vmem>>, %arg3: memref<2560x384xf32, #tpu.memory_space<vmem>>, %arg4: memref<1152x128xf32, #tpu.memory_space<vmem>>, %arg5: memref<384x128xf32, #tpu.memory_space<vmem>>, %arg6: memref<152x384xf32, #tpu.memory_space<vmem>>, %arg7: memref<8x128xf32, #tpu.memory_space<vmem>>) attributes {dimension_semantics = [#tpu.dimension_semantics<parallel>], iteration_bounds = array<i64: 1>, scalar_prefetch = 0 : i64, scratch_operands = 0 : i64, tpu.core_type = #tpu.core_type<tc>, window_params = [{transform_indices = @transform_0, window_bounds = array<i64: 8, 384>}, {transform_indices = @transform_1, window_bounds = array<i64: 8, 128>}, {pipeline_mode = #tpu.pipeline_mode<synchronous>, transform_indices = @transform_2, window_bounds = array<i64: 2560, 384>}, {pipeline_mode = #tpu.pipeline_mode<synchronous>, transform_indices = @transform_3, window_bounds = array<i64: 1152, 128>}, {pipeline_mode = #tpu.pipeline_mode<synchronous>, transform_indices = @transform_4, window_bounds = array<i64: 384, 128>}, {pipeline_mode = #tpu.pipeline_mode<synchronous>, transform_indices = @transform_5, window_bounds = array<i64: 152, 384>}, {transform_indices = @transform_6, window_bounds = array<i64: 8, 128>}]} {
    %c0 = arith.constant 0 : index
    %c0_0 = arith.constant 0 : index
    %0 = vector.load %arg1[%c0, %c0_0] : memref<8x384xf32, #tpu.memory_space<vmem>>, vector<8x384xf32>
    %c0_1 = arith.constant 0 : index
    %c0_2 = arith.constant 0 : index
    %1 = vector.load %arg3[%c0_1, %c0_2] : memref<2560x384xf32, #tpu.memory_space<vmem>>, vector<384x256xf32>
    %c0_3 = arith.constant 0 : index
    %c0_4 = arith.constant 0 : index
    %2 = vector.load %arg6[%c0_3, %c0_4] : memref<152x384xf32, #tpu.memory_space<vmem>>, vector<1x256xf32>
    %cst = arith.constant dense<0.000000e+00> : vector<8x256xf32>
    %3 = tpu.matmul %0, %1, %cst {dimension_numbers = #tpu.dot_dimension_numbers<[1], [0], [0], [1], [0, 0, 1, 1], [], []>} : vector<8x384xf32>, vector<384x256xf32>, vector<8x256xf32> -> vector<8x256xf32>
    %4 = vector.broadcast %2 : vector<1x256xf32> to vector<8x256xf32>
    %5 = arith.addf %3, %4 : vector<8x256xf32>
    %cst_5 = arith.constant 0.000000e+00 : f32
    %6 = vector.broadcast %cst_5 : f32 to vector<8x256xf32>
    %7 = arith.maximumf %5, %6 : vector<8x256xf32>
    %c384 = arith.constant 384 : index
    %c0_6 = arith.constant 0 : index
    %8 = vector.load %arg3[%c384, %c0_6] : memref<2560x384xf32, #tpu.memory_space<vmem>>, vector<256x128xf32>
    %c8 = arith.constant 8 : index
    %c0_7 = arith.constant 0 : index
    %9 = vector.load %arg6[%c8, %c0_7] : memref<152x384xf32, #tpu.memory_space<vmem>>, vector<1x128xf32>
    %cst_8 = arith.constant dense<0.000000e+00> : vector<8x128xf32>
    %10 = tpu.matmul %7, %8, %cst_8 {dimension_numbers = #tpu.dot_dimension_numbers<[1], [0], [0], [1], [0, 0, 1, 1], [], []>} : vector<8x256xf32>, vector<256x128xf32>, vector<8x128xf32> -> vector<8x128xf32>
    %11 = vector.broadcast %9 : vector<1x128xf32> to vector<8x128xf32>
    %12 = arith.addf %10, %11 : vector<8x128xf32>
    %cst_9 = arith.constant 0.000000e+00 : f32
    %13 = vector.broadcast %cst_9 : f32 to vector<8x128xf32>
    %14 = arith.maximumf %12, %13 : vector<8x128xf32>
    %c640 = arith.constant 640 : index
    %c0_10 = arith.constant 0 : index
    %15 = vector.load %arg3[%c640, %c0_10] : memref<2560x384xf32, #tpu.memory_space<vmem>>, vector<128x256xf32>
    %c16 = arith.constant 16 : index
    %c0_11 = arith.constant 0 : index
    %16 = vector.load %arg6[%c16, %c0_11] : memref<152x384xf32, #tpu.memory_space<vmem>>, vector<1x256xf32>
    %cst_12 = arith.constant dense<0.000000e+00> : vector<8x256xf32>
    %17 = tpu.matmul %14, %15, %cst_12 {dimension_numbers = #tpu.dot_dimension_numbers<[1], [0], [0], [1], [0, 0, 1, 1], [], []>} : vector<8x128xf32>, vector<128x256xf32>, vector<8x256xf32> -> vector<8x256xf32>
    %18 = vector.broadcast %16 : vector<1x256xf32> to vector<8x256xf32>
    %19 = arith.addf %17, %18 : vector<8x256xf32>
    %cst_13 = arith.constant 0.000000e+00 : f32
    %20 = vector.broadcast %cst_13 : f32 to vector<8x256xf32>
    %21 = arith.maximumf %19, %20 : vector<8x256xf32>
    %c768 = arith.constant 768 : index
    %c0_14 = arith.constant 0 : index
    %22 = vector.load %arg3[%c768, %c0_14] : memref<2560x384xf32, #tpu.memory_space<vmem>>, vector<256x384xf32>
    %c24 = arith.constant 24 : index
    %c0_15 = arith.constant 0 : index
    %23 = vector.load %arg6[%c24, %c0_15] : memref<152x384xf32, #tpu.memory_space<vmem>>, vector<1x384xf32>
    %cst_16 = arith.constant dense<0.000000e+00> : vector<8x384xf32>
    %24 = tpu.matmul %21, %22, %cst_16 {dimension_numbers = #tpu.dot_dimension_numbers<[1], [0], [0], [1], [0, 0, 1, 1], [], []>} : vector<8x256xf32>, vector<256x384xf32>, vector<8x384xf32> -> vector<8x384xf32>
    %25 = vector.broadcast %23 : vector<1x384xf32> to vector<8x384xf32>
    %26 = arith.addf %24, %25 : vector<8x384xf32>
    %cst_17 = arith.constant 0.000000e+00 : f32
    %27 = vector.broadcast %cst_17 : f32 to vector<8x384xf32>
    %28 = arith.maximumf %26, %27 : vector<8x384xf32>
    %c1024 = arith.constant 1024 : index
    %c0_18 = arith.constant 0 : index
    %29 = vector.load %arg3[%c1024, %c0_18] : memref<2560x384xf32, #tpu.memory_space<vmem>>, vector<384x384xf32>
    %c32 = arith.constant 32 : index
    %c0_19 = arith.constant 0 : index
    %30 = vector.load %arg6[%c32, %c0_19] : memref<152x384xf32, #tpu.memory_space<vmem>>, vector<1x384xf32>
    %cst_20 = arith.constant dense<0.000000e+00> : vector<8x384xf32>
    %31 = tpu.matmul %28, %29, %cst_20 {dimension_numbers = #tpu.dot_dimension_numbers<[1], [0], [0], [1], [0, 0, 1, 1], [], []>} : vector<8x384xf32>, vector<384x384xf32>, vector<8x384xf32> -> vector<8x384xf32>
    %32 = vector.broadcast %30 : vector<1x384xf32> to vector<8x384xf32>
    %33 = arith.addf %31, %32 : vector<8x384xf32>
    %cst_21 = arith.constant 0.000000e+00 : f32
    %34 = vector.broadcast %cst_21 : f32 to vector<8x384xf32>
    %35 = arith.maximumf %33, %34 : vector<8x384xf32>
    %c1408 = arith.constant 1408 : index
    %c0_22 = arith.constant 0 : index
    %36 = vector.load %arg3[%c1408, %c0_22] : memref<2560x384xf32, #tpu.memory_space<vmem>>, vector<384x256xf32>
    %c40 = arith.constant 40 : index
    %c0_23 = arith.constant 0 : index
    %37 = vector.load %arg6[%c40, %c0_23] : memref<152x384xf32, #tpu.memory_space<vmem>>, vector<1x256xf32>
    %cst_24 = arith.constant dense<0.000000e+00> : vector<8x256xf32>
    %38 = tpu.matmul %35, %36, %cst_24 {dimension_numbers = #tpu.dot_dimension_numbers<[1], [0], [0], [1], [0, 0, 1, 1], [], []>} : vector<8x384xf32>, vector<384x256xf32>, vector<8x256xf32> -> vector<8x256xf32>
    %39 = vector.broadcast %37 : vector<1x256xf32> to vector<8x256xf32>
    %40 = arith.addf %38, %39 : vector<8x256xf32>
    %cst_25 = arith.constant 0.000000e+00 : f32
    %41 = vector.broadcast %cst_25 : f32 to vector<8x256xf32>
    %42 = arith.maximumf %40, %41 : vector<8x256xf32>
    %c1792 = arith.constant 1792 : index
    %c0_26 = arith.constant 0 : index
    %43 = vector.load %arg3[%c1792, %c0_26] : memref<2560x384xf32, #tpu.memory_space<vmem>>, vector<256x256xf32>
    %c48 = arith.constant 48 : index
    %c0_27 = arith.constant 0 : index
    %44 = vector.load %arg6[%c48, %c0_27] : memref<152x384xf32, #tpu.memory_space<vmem>>, vector<1x256xf32>
    %cst_28 = arith.constant dense<0.000000e+00> : vector<8x256xf32>
    %45 = tpu.matmul %42, %43, %cst_28 {dimension_numbers = #tpu.dot_dimension_numbers<[1], [0], [0], [1], [0, 0, 1, 1], [], []>} : vector<8x256xf32>, vector<256x256xf32>, vector<8x256xf32> -> vector<8x256xf32>
    %46 = vector.broadcast %44 : vector<1x256xf32> to vector<8x256xf32>
    %47 = arith.addf %45, %46 : vector<8x256xf32>
    %cst_29 = arith.constant 0.000000e+00 : f32
    %48 = vector.broadcast %cst_29 : f32 to vector<8x256xf32>
    %49 = arith.maximumf %47, %48 : vector<8x256xf32>
    %c2048 = arith.constant 2048 : index
    %c0_30 = arith.constant 0 : index
    %50 = vector.load %arg3[%c2048, %c0_30] : memref<2560x384xf32, #tpu.memory_space<vmem>>, vector<256x256xf32>
    %c56 = arith.constant 56 : index
    %c0_31 = arith.constant 0 : index
    %51 = vector.load %arg6[%c56, %c0_31] : memref<152x384xf32, #tpu.memory_space<vmem>>, vector<1x256xf32>
    %cst_32 = arith.constant dense<0.000000e+00> : vector<8x256xf32>
    %52 = tpu.matmul %49, %50, %cst_32 {dimension_numbers = #tpu.dot_dimension_numbers<[1], [0], [0], [1], [0, 0, 1, 1], [], []>} : vector<8x256xf32>, vector<256x256xf32>, vector<8x256xf32> -> vector<8x256xf32>
    %53 = vector.broadcast %51 : vector<1x256xf32> to vector<8x256xf32>
    %54 = arith.addf %52, %53 : vector<8x256xf32>
    %cst_33 = arith.constant 0.000000e+00 : f32
    %55 = vector.broadcast %cst_33 : f32 to vector<8x256xf32>
    %56 = arith.maximumf %54, %55 : vector<8x256xf32>
    %c2304 = arith.constant 2304 : index
    %c0_34 = arith.constant 0 : index
    %57 = vector.load %arg3[%c2304, %c0_34] : memref<2560x384xf32, #tpu.memory_space<vmem>>, vector<256x256xf32>
    %c64 = arith.constant 64 : index
    %c0_35 = arith.constant 0 : index
    %58 = vector.load %arg6[%c64, %c0_35] : memref<152x384xf32, #tpu.memory_space<vmem>>, vector<1x256xf32>
    %cst_36 = arith.constant dense<0.000000e+00> : vector<8x256xf32>
    %59 = tpu.matmul %56, %57, %cst_36 {dimension_numbers = #tpu.dot_dimension_numbers<[1], [0], [0], [1], [0, 0, 1, 1], [], []>} : vector<8x256xf32>, vector<256x256xf32>, vector<8x256xf32> -> vector<8x256xf32>
    %60 = vector.broadcast %58 : vector<1x256xf32> to vector<8x256xf32>
    %61 = arith.addf %59, %60 : vector<8x256xf32>
    %cst_37 = arith.constant 0.000000e+00 : f32
    %62 = vector.broadcast %cst_37 : f32 to vector<8x256xf32>
    %63 = arith.maximumf %61, %62 : vector<8x256xf32>
    %c0_38 = arith.constant 0 : index
    %c0_39 = arith.constant 0 : index
    %64 = vector.load %arg2[%c0_38, %c0_39] : memref<8x128xf32, #tpu.memory_space<vmem>>, vector<8x128xf32>
    %c0_40 = arith.constant 0 : index
    %c0_41 = arith.constant 0 : index
    %65 = vector.load %arg4[%c0_40, %c0_41] : memref<1152x128xf32, #tpu.memory_space<vmem>>, vector<128x128xf32>
    %c72 = arith.constant 72 : index
    %c0_42 = arith.constant 0 : index
    %66 = vector.load %arg6[%c72, %c0_42] : memref<152x384xf32, #tpu.memory_space<vmem>>, vector<1x128xf32>
    %cst_43 = arith.constant dense<0.000000e+00> : vector<8x128xf32>
    %67 = tpu.matmul %64, %65, %cst_43 {dimension_numbers = #tpu.dot_dimension_numbers<[1], [0], [0], [1], [0, 0, 1, 1], [], []>} : vector<8x128xf32>, vector<128x128xf32>, vector<8x128xf32> -> vector<8x128xf32>
    %68 = vector.broadcast %66 : vector<1x128xf32> to vector<8x128xf32>
    %69 = arith.addf %67, %68 : vector<8x128xf32>
    %cst_44 = arith.constant 0.000000e+00 : f32
    %70 = vector.broadcast %cst_44 : f32 to vector<8x128xf32>
    %71 = arith.maximumf %69, %70 : vector<8x128xf32>
    %c128 = arith.constant 128 : index
    %c0_45 = arith.constant 0 : index
    %72 = vector.load %arg4[%c128, %c0_45] : memref<1152x128xf32, #tpu.memory_space<vmem>>, vector<128x128xf32>
    %c80 = arith.constant 80 : index
    %c0_46 = arith.constant 0 : index
    %73 = vector.load %arg6[%c80, %c0_46] : memref<152x384xf32, #tpu.memory_space<vmem>>, vector<1x128xf32>
    %cst_47 = arith.constant dense<0.000000e+00> : vector<8x128xf32>
    %74 = tpu.matmul %71, %72, %cst_47 {dimension_numbers = #tpu.dot_dimension_numbers<[1], [0], [0], [1], [0, 0, 1, 1], [], []>} : vector<8x128xf32>, vector<128x128xf32>, vector<8x128xf32> -> vector<8x128xf32>
    %75 = vector.broadcast %73 : vector<1x128xf32> to vector<8x128xf32>
    %76 = arith.addf %74, %75 : vector<8x128xf32>
    %cst_48 = arith.constant 0.000000e+00 : f32
    %77 = vector.broadcast %cst_48 : f32 to vector<8x128xf32>
    %78 = arith.maximumf %76, %77 : vector<8x128xf32>
    %c256 = arith.constant 256 : index
    %c0_49 = arith.constant 0 : index
    %79 = vector.load %arg4[%c256, %c0_49] : memref<1152x128xf32, #tpu.memory_space<vmem>>, vector<128x128xf32>
    %c88 = arith.constant 88 : index
    %c0_50 = arith.constant 0 : index
    %80 = vector.load %arg6[%c88, %c0_50] : memref<152x384xf32, #tpu.memory_space<vmem>>, vector<1x128xf32>
    %cst_51 = arith.constant dense<0.000000e+00> : vector<8x128xf32>
    %81 = tpu.matmul %78, %79, %cst_51 {dimension_numbers = #tpu.dot_dimension_numbers<[1], [0], [0], [1], [0, 0, 1, 1], [], []>} : vector<8x128xf32>, vector<128x128xf32>, vector<8x128xf32> -> vector<8x128xf32>
    %82 = vector.broadcast %80 : vector<1x128xf32> to vector<8x128xf32>
    %83 = arith.addf %81, %82 : vector<8x128xf32>
    %cst_52 = arith.constant 0.000000e+00 : f32
    %84 = vector.broadcast %cst_52 : f32 to vector<8x128xf32>
    %85 = arith.maximumf %83, %84 : vector<8x128xf32>
    %c384_53 = arith.constant 384 : index
    %c0_54 = arith.constant 0 : index
    %86 = vector.load %arg4[%c384_53, %c0_54] : memref<1152x128xf32, #tpu.memory_space<vmem>>, vector<128x128xf32>
    %c96 = arith.constant 96 : index
    %c0_55 = arith.constant 0 : index
    %87 = vector.load %arg6[%c96, %c0_55] : memref<152x384xf32, #tpu.memory_space<vmem>>, vector<1x128xf32>
    %cst_56 = arith.constant dense<0.000000e+00> : vector<8x128xf32>
    %88 = tpu.matmul %85, %86, %cst_56 {dimension_numbers = #tpu.dot_dimension_numbers<[1], [0], [0], [1], [0, 0, 1, 1], [], []>} : vector<8x128xf32>, vector<128x128xf32>, vector<8x128xf32> -> vector<8x128xf32>
    %89 = vector.broadcast %87 : vector<1x128xf32> to vector<8x128xf32>
    %90 = arith.addf %88, %89 : vector<8x128xf32>
    %cst_57 = arith.constant 0.000000e+00 : f32
    %91 = vector.broadcast %cst_57 : f32 to vector<8x128xf32>
    %92 = arith.maximumf %90, %91 : vector<8x128xf32>
    %c512 = arith.constant 512 : index
    %c0_58 = arith.constant 0 : index
    %93 = vector.load %arg4[%c512, %c0_58] : memref<1152x128xf32, #tpu.memory_space<vmem>>, vector<128x128xf32>
    %c104 = arith.constant 104 : index
    %c0_59 = arith.constant 0 : index
    %94 = vector.load %arg6[%c104, %c0_59] : memref<152x384xf32, #tpu.memory_space<vmem>>, vector<1x128xf32>
    %cst_60 = arith.constant dense<0.000000e+00> : vector<8x128xf32>
    %95 = tpu.matmul %92, %93, %cst_60 {dimension_numbers = #tpu.dot_dimension_numbers<[1], [0], [0], [1], [0, 0, 1, 1], [], []>} : vector<8x128xf32>, vector<128x128xf32>, vector<8x128xf32> -> vector<8x128xf32>
    %96 = vector.broadcast %94 : vector<1x128xf32> to vector<8x128xf32>
    %97 = arith.addf %95, %96 : vector<8x128xf32>
    %cst_61 = arith.constant 0.000000e+00 : f32
    %98 = vector.broadcast %cst_61 : f32 to vector<8x128xf32>
    %99 = arith.maximumf %97, %98 : vector<8x128xf32>
    %c640_62 = arith.constant 640 : index
    %c0_63 = arith.constant 0 : index
    %100 = vector.load %arg4[%c640_62, %c0_63] : memref<1152x128xf32, #tpu.memory_space<vmem>>, vector<128x128xf32>
    %c112 = arith.constant 112 : index
    %c0_64 = arith.constant 0 : index
    %101 = vector.load %arg6[%c112, %c0_64] : memref<152x384xf32, #tpu.memory_space<vmem>>, vector<1x128xf32>
    %cst_65 = arith.constant dense<0.000000e+00> : vector<8x128xf32>
    %102 = tpu.matmul %99, %100, %cst_65 {dimension_numbers = #tpu.dot_dimension_numbers<[1], [0], [0], [1], [0, 0, 1, 1], [], []>} : vector<8x128xf32>, vector<128x128xf32>, vector<8x128xf32> -> vector<8x128xf32>
    %103 = vector.broadcast %101 : vector<1x128xf32> to vector<8x128xf32>
    %104 = arith.addf %102, %103 : vector<8x128xf32>
    %cst_66 = arith.constant 0.000000e+00 : f32
    %105 = vector.broadcast %cst_66 : f32 to vector<8x128xf32>
    %106 = arith.maximumf %104, %105 : vector<8x128xf32>
    %c768_67 = arith.constant 768 : index
    %c0_68 = arith.constant 0 : index
    %107 = vector.load %arg4[%c768_67, %c0_68] : memref<1152x128xf32, #tpu.memory_space<vmem>>, vector<128x128xf32>
    %c120 = arith.constant 120 : index
    %c0_69 = arith.constant 0 : index
    %108 = vector.load %arg6[%c120, %c0_69] : memref<152x384xf32, #tpu.memory_space<vmem>>, vector<1x128xf32>
    %cst_70 = arith.constant dense<0.000000e+00> : vector<8x128xf32>
    %109 = tpu.matmul %106, %107, %cst_70 {dimension_numbers = #tpu.dot_dimension_numbers<[1], [0], [0], [1], [0, 0, 1, 1], [], []>} : vector<8x128xf32>, vector<128x128xf32>, vector<8x128xf32> -> vector<8x128xf32>
    %110 = vector.broadcast %108 : vector<1x128xf32> to vector<8x128xf32>
    %111 = arith.addf %109, %110 : vector<8x128xf32>
    %cst_71 = arith.constant 0.000000e+00 : f32
    %112 = vector.broadcast %cst_71 : f32 to vector<8x128xf32>
    %113 = arith.maximumf %111, %112 : vector<8x128xf32>
    %c896 = arith.constant 896 : index
    %c0_72 = arith.constant 0 : index
    %114 = vector.load %arg4[%c896, %c0_72] : memref<1152x128xf32, #tpu.memory_space<vmem>>, vector<128x128xf32>
    %c128_73 = arith.constant 128 : index
    %c0_74 = arith.constant 0 : index
    %115 = vector.load %arg6[%c128_73, %c0_74] : memref<152x384xf32, #tpu.memory_space<vmem>>, vector<1x128xf32>
    %cst_75 = arith.constant dense<0.000000e+00> : vector<8x128xf32>
    %116 = tpu.matmul %113, %114, %cst_75 {dimension_numbers = #tpu.dot_dimension_numbers<[1], [0], [0], [1], [0, 0, 1, 1], [], []>} : vector<8x128xf32>, vector<128x128xf32>, vector<8x128xf32> -> vector<8x128xf32>
    %117 = vector.broadcast %115 : vector<1x128xf32> to vector<8x128xf32>
    %118 = arith.addf %116, %117 : vector<8x128xf32>
    %cst_76 = arith.constant 0.000000e+00 : f32
    %119 = vector.broadcast %cst_76 : f32 to vector<8x128xf32>
    %120 = arith.maximumf %118, %119 : vector<8x128xf32>
    %c1024_77 = arith.constant 1024 : index
    %c0_78 = arith.constant 0 : index
    %121 = vector.load %arg4[%c1024_77, %c0_78] : memref<1152x128xf32, #tpu.memory_space<vmem>>, vector<128x128xf32>
    %c136 = arith.constant 136 : index
    %c0_79 = arith.constant 0 : index
    %122 = vector.load %arg6[%c136, %c0_79] : memref<152x384xf32, #tpu.memory_space<vmem>>, vector<1x128xf32>
    %cst_80 = arith.constant dense<0.000000e+00> : vector<8x128xf32>
    %123 = tpu.matmul %120, %121, %cst_80 {dimension_numbers = #tpu.dot_dimension_numbers<[1], [0], [0], [1], [0, 0, 1, 1], [], []>} : vector<8x128xf32>, vector<128x128xf32>, vector<8x128xf32> -> vector<8x128xf32>
    %124 = vector.broadcast %122 : vector<1x128xf32> to vector<8x128xf32>
    %125 = arith.addf %123, %124 : vector<8x128xf32>
    %cst_81 = arith.constant 0.000000e+00 : f32
    %126 = vector.broadcast %cst_81 : f32 to vector<8x128xf32>
    %127 = arith.maximumf %125, %126 : vector<8x128xf32>
    %c0_82 = arith.constant 0 : index
    %c0_83 = arith.constant 0 : index
    %128 = vector.load %arg5[%c0_82, %c0_83] : memref<384x128xf32, #tpu.memory_space<vmem>>, vector<256x128xf32>
    %c256_84 = arith.constant 256 : index
    %c0_85 = arith.constant 0 : index
    %129 = vector.load %arg5[%c256_84, %c0_85] : memref<384x128xf32, #tpu.memory_space<vmem>>, vector<128x128xf32>
    %c144 = arith.constant 144 : index
    %c0_86 = arith.constant 0 : index
    %130 = vector.load %arg6[%c144, %c0_86] : memref<152x384xf32, #tpu.memory_space<vmem>>, vector<1x128xf32>
    %cst_87 = arith.constant dense<0.000000e+00> : vector<8x128xf32>
    %131 = tpu.matmul %63, %128, %cst_87 {dimension_numbers = #tpu.dot_dimension_numbers<[1], [0], [0], [1], [0, 0, 1, 1], [], []>} : vector<8x256xf32>, vector<256x128xf32>, vector<8x128xf32> -> vector<8x128xf32>
    %cst_88 = arith.constant dense<0.000000e+00> : vector<8x128xf32>
    %132 = tpu.matmul %127, %129, %cst_88 {dimension_numbers = #tpu.dot_dimension_numbers<[1], [0], [0], [1], [0, 0, 1, 1], [], []>} : vector<8x128xf32>, vector<128x128xf32>, vector<8x128xf32> -> vector<8x128xf32>
    %133 = arith.addf %131, %132 : vector<8x128xf32>
    %134 = vector.broadcast %130 : vector<1x128xf32> to vector<8x128xf32>
    %135 = arith.addf %133, %134 : vector<8x128xf32>
    %c0_89 = arith.constant 0 : index
    %c0_90 = arith.constant 0 : index
    %136 = vector.load %arg7[%c0_89, %c0_90] : memref<8x128xf32, #tpu.memory_space<vmem>>, vector<8x128xf32>
    tpu.vector_store %arg7[%c0_89, %c0_90], %135 {strides = array<i32>} : memref<8x128xf32, #tpu.memory_space<vmem>>, vector<8x128xf32>,
    return
  }
  func.func @transform_0(%arg0: i32) -> (i32, i32) {
    %c0_i32 = arith.constant 0 : i32
    %c0_i32_0 = arith.constant 0 : i32
    return %arg0, %c0_i32 : i32, i32
  }
  func.func @transform_1(%arg0: i32) -> (i32, i32) {
    %c0_i32 = arith.constant 0 : i32
    %c0_i32_0 = arith.constant 0 : i32
    return %arg0, %c0_i32 : i32, i32
  }
  func.func @transform_2(%arg0: i32) -> (i32, i32) {
    %c0_i32 = arith.constant 0 : i32
    %c0_i32_0 = arith.constant 0 : i32
    %c0_i32_1 = arith.constant 0 : i32
    return %c0_i32, %c0_i32_0 : i32, i32
  }
  func.func @transform_3(%arg0: i32) -> (i32, i32) {
    %c0_i32 = arith.constant 0 : i32
    %c0_i32_0 = arith.constant 0 : i32
    %c0_i32_1 = arith.constant 0 : i32
    return %c0_i32, %c0_i32_0 : i32, i32
  }
  func.func @transform_4(%arg0: i32) -> (i32, i32) {
    %c0_i32 = arith.constant 0 : i32
    %c0_i32_0 = arith.constant 0 : i32
    %c0_i32_1 = arith.constant 0 : i32
    return %c0_i32, %c0_i32_0 : i32, i32
  }
  func.func @transform_5(%arg0: i32) -> (i32, i32) {
    %c0_i32 = arith.constant 0 : i32
    %c0_i32_0 = arith.constant 0 : i32
    %c0_i32_1 = arith.constant 0 : i32
    return %c0_i32, %c0_i32_0 : i32, i32
  }
  func.func @transform_6(%arg0: i32) -> (i32, i32) {
    %c0_i32 = arith.constant 0 : i32
    %c0_i32_0 = arith.constant 0 : i32
    return %arg0, %c0_i32 : i32, i32
  }
}

</mosaic_0001>

<bundles_post_ra>
// kernel: fwd_model_free_end.1
= control target key start
LH: loop header
LB: loop body
LE: loop exit
PB: predicated region body
PF: predicated region fallthrough
CT: control target
= control target key end

     0   :  { %11 = vsyncpa [#allocation3], 0  ;;  %s5043_s0 = inlined_call_operand.vmem [shape: f32[8,384], index: 0, kind: input, shape index: {}]   ;;  %s5044_s1 = inlined_call_operand.vmem [shape: f32[8,128], index: 1, kind: input, shape index: {}]   ;;  %s5045_s2 = inlined_call_operand.hbm [shape: f32[2560,384], index: 2, kind: input, shape index: {}]   ;;  %s5046_s3 = inlined_call_operand.hbm [shape: f32[1152,128], index: 3, kind: input, shape index: {}]   ;;  %s5047_s4 = inlined_call_operand.hbm [shape: f32[384,128], index: 4, kind: input, shape index: {}]   ;;  %s5048_s5 = inlined_call_operand.hbm [shape: f32[152,384], index: 5, kind: input, shape index: {}]   ;;  %s5049_s6 = inlined_call_operand.vmem [shape: f32[8,128], index: 6, kind: output, shape index: {}]  }
   0x1   :  { %12 = vsyncpa [#allocation5], 0 }
   0x2   :  { %13 = vsyncpa [#allocation8], 0  ;;  %s4751_s21 = smov [#allocation4]   ;;  %s4657_s25 = scalar_lea.hbm %s5046_s3, 18432 }
   0x3   :  { %s35_s22 = sshll.u32 %s4751_s21, 4  ;;  %p4658_p0 = scmp.ne.s32.totalorder %s5046_s3, %s4657_s25  ;;  %s36_s22 = int_to_ptr.vmem [resolvable:$true] %s35_s22 }
   0x4   :  { %p4661_p1 = scmp.lt.u32.totalorder %s4657_s25, %s5046_s3 }
   0x6   :  { %p4663_p2 = pnand %p4661_p1, %p4658_p0 }
   0x8   :  { %4666 = shalt.err (!%p4663_p2)
}
   0x9   :  { %s4667_s30 = scalar_lea.vmem %s36_s22, 18432  ;;  %p4672_p4 = scmp.lt.s32.totalorder %s36_s22, %s36_s22 }
   0xa   :  { %p4668_p3 = scmp.ne.s32.totalorder %s36_s22, %s4667_s30  ;;  %p4673_p5 = scmp.lt.s32.totalorder %s4667_s30, %s4667_s30 }
   0xc   :  { %p4674_p6 = por %p4673_p5, %p4672_p4 }
   0xe   :  { %p4675_p7 = pnand %p4674_p6, %p4668_p3 }
  0x10   :  { %4678 = shalt.err (!%p4675_p7)
}
  0x11   :  { %s4752_s7 = smov 128   ;;  %s4753_s8 = smov 8  }
  0x12   :  { %41 = dma.hbm_to_vmem [thread:$0]  %s5046_s3, 18432, %s36_s22, [#allocation5], %s4752_s7, %s4752_s7, %s4753_s8  }
  0x13   :  { %s4754_s11 = smov [#allocation2]   ;;  %s4679_s15 = scalar_lea.hbm %s5045_s2, 122880 }
  0x14   :  { %s23_s12 = sshll.u32 %s4754_s11, 4  ;;  %p4680_p8 = scmp.ne.s32.totalorder %s5045_s2, %s4679_s15  ;;  %s24_s12 = int_to_ptr.vmem [resolvable:$true] %s23_s12 }
  0x15   :  { %p4683_p9 = scmp.lt.u32.totalorder %s4679_s15, %s5045_s2 }
  0x17   :  { %p4685_p10 = pnand %p4683_p9, %p4680_p8 }
  0x19   :  { %4688 = shalt.err (!%p4685_p10)
}
  0x1a   :  { %s4689_s20 = scalar_lea.vmem %s24_s12, 122880  ;;  %p4694_p12 = scmp.lt.s32.totalorder %s24_s12, %s24_s12 }
  0x1b   :  { %p4690_p11 = scmp.ne.s32.totalorder %s24_s12, %s4689_s20  ;;  %p4695_p13 = scmp.lt.s32.totalorder %s4689_s20, %s4689_s20 }
  0x1d   :  { %p4696_p0 = por %p4695_p13, %p4694_p12 }
  0x1f   :  { %p4697_p1 = pnand %p4696_p0, %p4690_p11 }
  0x21   :  { %4700 = shalt.err (!%p4697_p1)
}
  0x22   :  { %s4755_s3 = smov 384   ;;  %s4756_s21 = smov 24  }
  0x23   :  { %29 = dma.hbm_to_vmem [thread:$0]  %s5045_s2, 122880, %s24_s12, [#allocation3], %s4755_s3, %s4755_s3, %s4756_s21  }
  0x24   :  { %s4757_s24 = smov [#allocation6]   ;;  %s4758_s26 = smov [#allocation7]  }
  0x25   :  { %s47_s25 = sshll.u32 %s4757_s24, 4  ;;  %s59_s27 = sshll.u32 %s4758_s26, 4  ;;  %s48_s25 = int_to_ptr.vmem [resolvable:$true] %s47_s25  ;;  %s4827_s27 = int_to_ptr.vmem [resolvable:$true] %s59_s27 }
  0x26   :  { %s4701_s30 = scalar_lea.hbm %s5047_s4, 6144 }
  0x27   :  { %p4702_p2 = scmp.ne.s32.totalorder %s5047_s4, %s4701_s30  ;;  %p4705_p3 = scmp.lt.u32.totalorder %s4701_s30, %s5047_s4 }
  0x29   :  { %p4707_p4 = pnand %p4705_p3, %p4702_p2 }
  0x2b   :  { %4710 = shalt.err (!%p4707_p4)
}
  0x2c   :  { %s4711_s2 = scalar_lea.vmem %s48_s25, 6144  ;;  %p4716_p6 = scmp.lt.s32.totalorder %s48_s25, %s48_s25 }
  0x2d   :  { %p4712_p5 = scmp.ne.s32.totalorder %s48_s25, %s4711_s2  ;;  %p4717_p7 = scmp.lt.s32.totalorder %s4711_s2, %s4711_s2 }
  0x2f   :  { %p4718_p8 = por %p4717_p7, %p4716_p6 }
  0x31   :  { %p4719_p9 = pnand %p4718_p8, %p4712_p5 }
  0x33   :  { %4722 = shalt.err (!%p4719_p9)
}
  0x34   :  { %53 = dma.hbm_to_vmem [thread:$0]  %s5047_s4, 6144, %s48_s25, [#allocation5], %s4752_s7, %s4752_s7, %s4753_s8  }
  0x35   :  { %s4723_s17 = scalar_lea.hbm %s5048_s5, 7296 }
  0x36   :  { %p4724_p10 = scmp.ne.s32.totalorder %s5048_s5, %s4723_s17  ;;  %p4727_p11 = scmp.lt.u32.totalorder %s4723_s17, %s5048_s5 }
  0x38   :  { %p4729_p12 = pnand %p4727_p11, %p4724_p10 }
  0x3a   :  { %4732 = shalt.err (!%p4729_p12)
}
  0x3b   :  { %s4733_s23 = scalar_lea.vmem %s4827_s27, 7296  ;;  %p4738_p0 = scmp.lt.s32.totalorder %s4827_s27, %s4827_s27 }
  0x3c   :  { %p4734_p13 = scmp.ne.s32.totalorder %s4827_s27, %s4733_s23  ;;  %p4739_p1 = scmp.lt.s32.totalorder %s4733_s23, %s4733_s23 }
  0x3e   :  { %p4740_p2 = por %p4739_p1, %p4738_p0 }
  0x40   :  { %p4741_p3 = pnand %p4740_p2, %p4734_p13 }
  0x42   :  { %4744 = shalt.err (!%p4741_p3)
}
  0x43   :  { %65 = dma.hbm_to_vmem [thread:$0]  %s5048_s5, 7296, %s4827_s27, [#allocation8], %s4755_s3, %s4755_s3, %s4756_s21  }
  0x44   :  { %4745 = dma.done.wait [#allocation3], 122880  }
  0x45   :  { %4746 = vsyncadd [#allocation3], 4294844416 }
  0x46   :  { %4747 = dma.done.wait [#allocation5], 24576  }
  0x47   :  { %4748 = vsyncadd [#allocation5], 4294942720 }
  0x48   :  { %4749 = dma.done.wait [#allocation8], 7296  }
  0x49   :  { %4750 = vsyncadd [#allocation8], 4294960000  ;;  %v82_v0 = vld [vmem:[#allocation2 + $0x8] sm:$0xff]  ;;  %v84_v1 = vld [vmem:[#allocation2 + $0x20] sm:$0xff]  ;;  %vm4761_vm0 = vmmov 0  }
  0x4a   :  { %v81_v2 = vld [vmem:[#allocation2] sm:$0xff]  ;;  %v3666_v3 = vpack.c.bf16 %v84_v1, %v82_v0  ;;  %v83_v4 = vld [vmem:[#allocation2 + $0x18] sm:$0xff]  ;;  %v88_v6 = vld [vmem:[#allocation2 + $0x50] sm:$0xff] }
  0x4b   :  { %v86_v5 = vld [vmem:[#allocation2 + $0x38] sm:$0xff]  ;;  %v3668_v7 = vpack.c.bf16 %v83_v4, %v81_v2  ;;  %v85_v9 = vld [vmem:[#allocation2 + $0x30] sm:$0xff]  ;;  %v87_v10 = vld [vmem:[#allocation2 + $0x48] sm:$0xff] }
  0x4c   :  { %v3670_v8 = vpack.c.bf16 %v88_v6, %v86_v5  ;;  %v90_v11 = vld [vmem:[#allocation2 + $0x68] sm:$0xff]  ;;  %3667 = vmatprep.subr.bf16.mxu0 %v3666_v3  ;;  %v92_v12 = vld [vmem:[#allocation2 + $0x80] sm:$0xff]  ;;  %v3672_v13 = vpack.c.bf16 %v87_v10, %v85_v9  ;;  %v91_v16 = vld [vmem:[#allocation2 + $0x78] sm:$0xff] }
  0x4d   :  { %3669 = vmatpush1.bf16.msra.mxu0 %v3668_v7  ;;  %v3674_v14 = vpack.c.bf16 %v92_v12, %v90_v11  ;;  %v89_v15 = vld [vmem:[#allocation2 + $0x60] sm:$0xff]  ;;  %v94_v17 = vld [vmem:[#allocation2 + $0x98] sm:$0xff]  ;;  %v96_v18 = vld [vmem:[#allocation2 + $0xb0] sm:$0xff] }
  0x4e   :  { %3671 = vmatprep.subr.bf16.mxu0 %v3670_v8  ;;  %v3676_v19 = vpack.c.bf16 %v91_v16, %v89_v15  ;;  %v3678_v20 = vpack.c.bf16 %v96_v18, %v94_v17  ;;  %v93_v21 = vld [vmem:[#allocation2 + $0x90] sm:$0xff]  ;;  %v95_v22 = vld [vmem:[#allocation2 + $0xa8] sm:$0xff]  ;;  %v100_v24 = vld [vmem:[#allocation2 + $0xe0] sm:$0xff] }
  0x4f   :  { %v98_v23 = vld [vmem:[#allocation2 + $0xc8] sm:$0xff]  ;;  %v3680_v25 = vpack.c.bf16 %v95_v22, %v93_v21  ;;  %v97_v27 = vld [vmem:[#allocation2 + $0xc0] sm:$0xff]  ;;  %v99_v28 = vld [vmem:[#allocation2 + $0xd8] sm:$0xff] }
  0x50   :  { %v3682_v26 = vpack.c.bf16 %v100_v24, %v98_v23  ;;  %v102_v29 = vld [vmem:[#allocation2 + $0xf8] sm:$0xff]  ;;  %v104_v30 = vld [vmem:[#allocation2 + $0x110] sm:$0xff]  ;;  %v3684_v31 = vpack.c.bf16 %v99_v28, %v97_v27  ;;  %v103_v34 = vld [vmem:[#allocation2 + $0x108] sm:$0xff] }
  0x51   :  { %3673 = vmatpush1.bf16.msra.mxu0 %v3672_v13  ;;  %v3686_v32 = vpack.c.bf16 %v104_v30, %v102_v29  ;;  %v101_v33 = vld [vmem:[#allocation2 + $0xf0] sm:$0xff]  ;;  %v106_v35 = vld [vmem:[#allocation2 + $0x128] sm:$0xff]  ;;  %v108_v36 = vld [vmem:[#allocation2 + $0x140] sm:$0xff] }
  0x52   :  { %3675 = vmatprep.subr.bf16.mxu0 %v3674_v14  ;;  %v3688_v37 = vpack.c.bf16 %v103_v34, %v101_v33  ;;  %v3690_v38 = vpack.c.bf16 %v108_v36, %v106_v35  ;;  %v105_v39 = vld [vmem:[#allocation2 + $0x120] sm:$0xff]  ;;  %v107_v40 = vld [vmem:[#allocation2 + $0x138] sm:$0xff]  ;;  %v79_v41 = vld [vmem:[%s5043_s0 + $0x8] sm:$0xff] }
  0x53   :  { %v110_v42 = vld [vmem:[#allocation2 + $0x158] sm:$0xff]  ;;  %v112_v43 = vld [vmem:[#allocation2 + $0x170] sm:$0xff]  ;;  %253 = vmatprep.mubr.f32.mxu0 %v79_v41  ;;  %v3692_v44 = vpack.c.bf16 %v107_v40, %v105_v39  ;;  %v111_v47 = vld [vmem:[#allocation2 + $0x168] sm:$0xff] }
  0x54   :  { %v3694_v45 = vpack.c.bf16 %v112_v43, %v110_v42  ;;  %v109_v46 = vld [vmem:[#allocation2 + $0x150] sm:$0xff]  ;;  %v114_v48 = vld [vmem:[#allocation2 + $0x188] sm:$0xff]  ;;  %v116_v49 = vld [vmem:[#allocation2 + $0x1a0] sm:$0xff] }
  0x55   :  { %3677 = vmatpush1.bf16.msra.mxu0 %v3676_v19  ;;  %v3696_v50 = vpack.c.bf16 %v111_v47, %v109_v46  ;;  %v3698_v51 = vpack.c.bf16 %v116_v49, %v114_v48  ;;  %v113_v52 = vld [vmem:[#allocation2 + $0x180] sm:$0xff]  ;;  %v115_v53 = vld [vmem:[#allocation2 + $0x198] sm:$0xff]  ;;  %v120_v55 = vld [vmem:[#allocation2 + $0x1d0] sm:$0xff] }
  0x56   :  { %3679 = vmatprep.subr.bf16.mxu0 %v3678_v20  ;;  %v118_v54 = vld [vmem:[#allocation2 + $0x1b8] sm:$0xff]  ;;  %v117_v56 = vld [vmem:[#allocation2 + $0x1b0] sm:$0xff]  ;;  %v3700_v57 = vpack.c.bf16 %v115_v53, %v113_v52  ;;  %v119_v58 = vld [vmem:[#allocation2 + $0x1c8] sm:$0xff] }
  0x57   :  { %v122_v59 = vld [vmem:[#allocation2 + $0x1e8] sm:$0xff]  ;;  %v124_v60 = vld [vmem:[#allocation2 + $0x200] sm:$0xff]  ;;  %v3702_v61 = vpack.c.bf16 %v120_v55, %v118_v54  ;;  %v350_v63 = vld [vmem:[#allocation2 + $0x618] sm:$0xff]  ;;  %v3704_v10 = vpack.c.bf16 %v119_v58, %v117_v56 }
  0x58   :  { %v349_v62 = vld [vmem:[#allocation2 + $0x600] sm:$0xff]  ;;  %v334_v2 = vld [vmem:[#allocation2 + $0x498] sm:$0xff]  ;;  %v351_v3 = vld [vmem:[#allocation2 + $0x630] sm:$0xff]  ;;  %v3706_v12 = vpack.c.bf16 %v124_v60, %v122_v59 }
  0x59   :  { %3681 = vmatpush1.bf16.msra.mxu0 %v3680_v25  ;;  %v333_v0 = vld [vmem:[#allocation2 + $0x480] sm:$0xff]  ;;  %v3762_v1 = vpack.c.bf16 %v350_v63, %v349_v62  ;;  %v352_v4 = vld [vmem:[#allocation2 + $0x648] sm:$0xff]  ;;  %v335_v7 = vld [vmem:[#allocation2 + $0x4b0] sm:$0xff] }
  0x5a   :  { %3683 = vmatprep.subr.bf16.mxu0 %v3682_v26  ;;  %v3764_v5 = vpack.c.bf16 %v334_v2, %v333_v0  ;;  %v3766_v6 = vpack.c.bf16 %v352_v4, %v351_v3  ;;  %v336_v8 = vld [vmem:[#allocation2 + $0x4c8] sm:$0xff]  ;;  %v353_v9 = vld [vmem:[#allocation2 + $0x660] sm:$0xff]  ;;  %v354_v11 = vld [vmem:[#allocation2 + $0x678] sm:$0xff] }
  0x5b   :  { %3763 = vmatprep.subr.bf16.mxu1 %v3762_v1  ;;  %v121_v13 = vld [vmem:[#allocation2 + $0x1e0] sm:$0xff]  ;;  %v123_v14 = vld [vmem:[#allocation2 + $0x1f8] sm:$0xff]  ;;  %v3768_v16 = vpack.c.bf16 %v336_v8, %v335_v7  ;;  %v128_v17 = vld [vmem:[#allocation2 + $0x230] sm:$0xff]  ;;  %v3770_v18 = vpack.c.bf16 %v354_v11, %v353_v9 }
  0x5c   :  { %v126_v15 = vld [vmem:[#allocation2 + $0x218] sm:$0xff]  ;;  %3765 = vmatpush3.bf16.msra.mxu1 %v3764_v5  ;;  %v337_v19 = vld [vmem:[#allocation2 + $0x4e0] sm:$0xff]  ;;  %v355_v21 = vld [vmem:[#allocation2 + $0x690] sm:$0xff]  ;;  %v3708_v23 = vpack.c.bf16 %v123_v14, %v121_v13 }
  0x5d   :  { %3685 = vmatpush1.bf16.msra.mxu0 %v3684_v31  ;;  %3767 = vmatprep.subr.bf16.mxu1 %v3766_v6  ;;  %v338_v20 = vld [vmem:[#allocation2 + $0x4f8] sm:$0xff]  ;;  %v356_v22 = vld [vmem:[#allocation2 + $0x6a8] sm:$0xff]  ;;  %v3710_v24 = vpack.c.bf16 %v128_v17, %v126_v15  ;;  %v125_v25 = vld [vmem:[#allocation2 + $0x210] sm:$0xff] }
  0x5e   :  { %3687 = vmatprep.subr.bf16.mxu0 %v3686_v32  ;;  %v127_v26 = vld [vmem:[#allocation2 + $0x228] sm:$0xff]  ;;  %v3772_v28 = vpack.c.bf16 %v338_v20, %v337_v19  ;;  %v132_v29 = vld [vmem:[#allocation2 + $0x260] sm:$0xff]  ;;  %v3774_v30 = vpack.c.bf16 %v356_v22, %v355_v21  ;;  %v339_v31 = vld [vmem:[#allocation2 + $0x510] sm:$0xff] }
  0x5f   :  { %v130_v27 = vld [vmem:[#allocation2 + $0x248] sm:$0xff]  ;;  %v357_v33 = vld [vmem:[#allocation2 + $0x6c0] sm:$0xff]  ;;  %v358_v34 = vld [vmem:[#allocation2 + $0x6d8] sm:$0xff]  ;;  %v3712_v35 = vpack.c.bf16 %v127_v26, %v125_v25 }
  0x60   :  { %3769 = vmatpush3.bf16.msra.mxu1 %v3768_v16  ;;  %v340_v32 = vld [vmem:[#allocation2 + $0x528] sm:$0xff]  ;;  %v3714_v36 = vpack.c.bf16 %v132_v29, %v130_v27  ;;  %v134_v39 = vld [vmem:[#allocation2 + $0x278] sm:$0xff]  ;;  %v136_v41 = vld [vmem:[#allocation2 + $0x290] sm:$0xff]  ;;  %v3778_v42 = vpack.c.bf16 %v358_v34, %v357_v33 }
  0x61   :  { %3689 = vmatpush1.bf16.msra.mxu0 %v3688_v37  ;;  %3771 = vmatprep.subr.bf16.mxu1 %v3770_v18  ;;  %v129_v37 = vld [vmem:[#allocation2 + $0x240] sm:$0xff]  ;;  %v3776_v40 = vpack.c.bf16 %v340_v32, %v339_v31  ;;  %v360_v46 = vld [vmem:[#allocation2 + $0x708] sm:$0xff]  ;;  %v3718_v48 = vpack.c.bf16 %v136_v41, %v134_v39  ;;  %v133_v49 = vld [vmem:[#allocation2 + $0x270] sm:$0xff] }
  0x62   :  { %3691 = vmatprep.subr.bf16.mxu0 %v3690_v38  ;;  %v131_v38 = vld [vmem:[#allocation2 + $0x258] sm:$0xff]  ;;  %v341_v43 = vld [vmem:[#allocation2 + $0x540] sm:$0xff]  ;;  %v343_v55 = vld [vmem:[#allocation2 + $0x570] sm:$0xff] }
  0x63   :  { %v3716_v47 = vpack.c.bf16 %v131_v38, %v129_v37  ;;  %v140_v53 = vld [vmem:[#allocation2 + $0x2c0] sm:$0xff]  ;;  %v344_v56 = vld [vmem:[#allocation2 + $0x588] sm:$0xff]  ;;  %v362_v58 = vld [vmem:[#allocation2 + $0x738] sm:$0xff] }
  0x64   :  { %3773 = vmatpush3.bf16.msra.mxu1 %v3772_v28  ;;  %v139_v62 = vld [vmem:[#allocation2 + $0x2b8] sm:$0xff]  ;;  %v3784_v63 = vpack.c.bf16 %v344_v56, %v343_v55  ;;  %v144_v1 = vld [vmem:[#allocation2 + $0x2f0] sm:$0xff]  ;;  %v143_v6 = vld [vmem:[#allocation2 + $0x2e8] sm:$0xff] }
  0x65   :  { %3693 = vmatpush1.bf16.msra.mxu0 %v3692_v44  ;;  %3775 = vmatprep.subr.bf16.mxu1 %v3774_v30  ;;  %v342_v44 = vld [vmem:[#allocation2 + $0x558] sm:$0xff]  ;;  %v141_v5 = vld [vmem:[#allocation2 + $0x2d0] sm:$0xff]  ;;  %v146_v7 = vld [vmem:[#allocation2 + $0x308] sm:$0xff] }
  0x66   :  { %3695 = vmatprep.subr.bf16.mxu0 %v3694_v45  ;;  %v359_v45 = vld [vmem:[#allocation2 + $0x6f0] sm:$0xff]  ;;  %v3780_v52 = vpack.c.bf16 %v342_v44, %v341_v43  ;;  %v142_v0 = vld [vmem:[#allocation2 + $0x2d8] sm:$0xff]  ;;  %v148_v8 = vld [vmem:[#allocation2 + $0x320] sm:$0xff]  ;;  %v3728_v9 = vpack.c.bf16 %v143_v6, %v141_v5 }
  0x67   :  { %v3782_v54 = vpack.c.bf16 %v360_v46, %v359_v45  ;;  %v3726_v4 = vpack.c.bf16 %v144_v1, %v142_v0  ;;  %v145_v11 = vld [vmem:[#allocation2 + $0x300] sm:$0xff]  ;;  %v150_v13 = vld [vmem:[#allocation2 + $0x338] sm:$0xff]  ;;  %v152_v14 = vld [vmem:[#allocation2 + $0x350] sm:$0xff] }
  0x68   :  { %3777 = vmatpush3.bf16.msra.mxu1 %v3776_v40  ;;  %v78_v15 = vld [vmem:[%s5043_s0] sm:$0xff]  ;;  %v3734_v17 = vpack.c.bf16 %v152_v14, %v150_v13  ;;  %v149_v18 = vld [vmem:[#allocation2 + $0x330] sm:$0xff]  ;;  %v151_v19 = vld [vmem:[#allocation2 + $0x348] sm:$0xff] }
  0x69   :  { %3697 = vmatpush1.bf16.msra.mxu0 %v3696_v50  ;;  %v135_v50 = vld [vmem:[#allocation2 + $0x288] sm:$0xff]  ;;  %3779 = vmatprep.subr.bf16.mxu1 %v3778_v42  ;;  %v156_v21 = vld [vmem:[#allocation2 + $0x380] sm:$0xff]  ;;  %v3736_v22 = vpack.c.bf16 %v151_v19, %v149_v18  ;;  %v155_v26 = vld [vmem:[#allocation2 + $0x378] sm:$0xff] }
  0x6a   :  { %3699 = vmatprep.subr.bf16.mxu0 %v3698_v51  ;;  %v138_v51 = vld [vmem:[#allocation2 + $0x2a8] sm:$0xff]  ;;  %v3720_v59 = vpack.c.bf16 %v135_v50, %v133_v49  ;;  %v153_v25 = vld [vmem:[#allocation2 + $0x360] sm:$0xff]  ;;  %v158_v27 = vld [vmem:[#allocation2 + $0x398] sm:$0xff] }
  0x6b   :  { %v3722_v60 = vpack.c.bf16 %v140_v53, %v138_v51  ;;  %v154_v20 = vld [vmem:[#allocation2 + $0x368] sm:$0xff]  ;;  %v160_v28 = vld [vmem:[#allocation2 + $0x3b0] sm:$0xff]  ;;  %v3740_v29 = vpack.c.bf16 %v155_v26, %v153_v25  ;;  %v164_v34 = vld [vmem:[#allocation2 + $0x3e0] sm:$0xff] }
  0x6c   :  { %3781 = vmatpush3.bf16.msra.mxu1 %v3780_v52  ;;  %v3742_v30 = vpack.c.bf16 %v160_v28, %v158_v27  ;;  %v157_v31 = vld [vmem:[#allocation2 + $0x390] sm:$0xff]  ;;  %v159_v32 = vld [vmem:[#allocation2 + $0x3a8] sm:$0xff]  ;;  %v161_v37 = vld [vmem:[#allocation2 + $0x3c0] sm:$0xff] }
  0x6d   :  { %3701 = vmatpush1.bf16.msra.mxu0 %v3700_v57  ;;  %v361_v57 = vld [vmem:[#allocation2 + $0x720] sm:$0xff]  ;;  %3783 = vmatprep.subr.bf16.mxu1 %v3782_v54  ;;  %v162_v33 = vld [vmem:[#allocation2 + $0x3c8] sm:$0xff]  ;;  %v163_v38 = vld [vmem:[#allocation2 + $0x3d8] sm:$0xff] }
  0x6e   :  { %3703 = vmatprep.subr.bf16.mxu0 %v3702_v61  ;;  %v137_v61 = vld [vmem:[#allocation2 + $0x2a0] sm:$0xff]  ;;  %v3786_v2 = vpack.c.bf16 %v362_v58, %v361_v57  ;;  %v166_v39 = vld [vmem:[#allocation2 + $0x3f8] sm:$0xff]  ;;  %v168_v40 = vld [vmem:[#allocation2 + $0x410] sm:$0xff]  ;;  %v3748_v41 = vpack.c.bf16 %v163_v38, %v161_v37 }
  0x6f   :  { %v3724_v3 = vpack.c.bf16 %v139_v62, %v137_v61  ;;  %v3750_v42 = vpack.c.bf16 %v168_v40, %v166_v39  ;;  %v165_v43 = vld [vmem:[#allocation2 + $0x3f0] sm:$0xff]  ;;  %v167_v44 = vld [vmem:[#allocation2 + $0x408] sm:$0xff]  ;;  %v172_v46 = vld [vmem:[#allocation2 + $0x440] sm:$0xff] }
  0x70   :  { %3785 = vmatpush3.bf16.msra.mxu1 %v3784_v63  ;;  %v170_v45 = vld [vmem:[#allocation2 + $0x428] sm:$0xff]  ;;  %v169_v49 = vld [vmem:[#allocation2 + $0x420] sm:$0xff]  ;;  %v171_v50 = vld [vmem:[#allocation2 + $0x438] sm:$0xff] }
  0x71   :  { %3705 = vmatpush1.bf16.msra.mxu0 %v3704_v10  ;;  %3787 = vmatprep.subr.bf16.mxu1 %v3786_v2  ;;  %v3730_v10 = vpack.c.bf16 %v148_v8, %v146_v7  ;;  %v174_v51 = vld [vmem:[#allocation2 + $0x458] sm:$0xff]  ;;  %v176_v52 = vld [vmem:[#allocation2 + $0x470] sm:$0xff]  ;;  %v3756_v53 = vpack.c.bf16 %v171_v50, %v169_v49  ;;  %v175_v56 = vld [vmem:[#allocation2 + $0x468] sm:$0xff]  ;;  %v179_v7 = vlaneseq }
  0x72   :  { %3707 = vmatprep.subr.bf16.mxu0 %v3706_v12  ;;  %v147_v12 = vld [vmem:[#allocation2 + $0x318] sm:$0xff]  ;;  %v3758_v54 = vpack.c.bf16 %v176_v52, %v174_v51  ;;  %v173_v55 = vld [vmem:[#allocation2 + $0x450] sm:$0xff]  ;;  %v364_v63 = vld [vmem:[#allocation2 + $0x768] sm:$0xff] }
  0x73   :  { %v3732_v16 = vpack.c.bf16 %v147_v12, %v145_v11  ;;  %v3760_v57 = vpack.c.bf16 %v175_v56, %v173_v55  ;;  %v80_v58 = vld [vmem:[%s5043_s0 + $0x10] sm:$0xff]  ;;  %v348_v2 = vld [vmem:[#allocation2 + $0x5e8] sm:$0xff]  ;;  %v440_v5 = vld [vmem:[#allocation2 + $0x7a0] sm:$0xff]  ;;  %v4874_v8 = vshrl.u32 %v179_v7, 7 }
  0x74   :  { %v363_v62 = vld [vmem:[#allocation2 + $0x750] sm:$0xff]  ;;  %v439_v18 = vld [vmem:[#allocation2 + $0x798] sm:$0xff]  ;;  %v443_v28 = vld [vmem:[#allocation2 + $0x7c8] sm:$0xff] }
  0x75   :  { %3709 = vmatpush1.bf16.msra.mxu0 %v3708_v23  ;;  %v4759_v23 = vmov 0.0   ;;  %v3790_v0 = vpack.c.bf16 %v364_v63, %v363_v62  ;;  %v347_v1 = vld [vmem:[#allocation2 + $0x5d0] sm:$0xff]  ;;  %v4880_v11 = vsub.s32 1, %v4874_v8  ;;  %v451_v40 = vld [vmem:[#allocation2 + $0x828] sm:$0xff]  ;;  %v464_v55 = vld [vmem:[#allocation2 + $0x8c0] sm:$0xff] }
  0x76   :  { %3711 = vmatprep.subr.bf16.mxu0 %v3710_v24  ;;  %v3738_v24 = vpack.c.bf16 %v156_v21, %v154_v20  ;;  %v442_v20 = vld [vmem:[#allocation2 + $0x7b8] sm:$0xff]  ;;  %v444_v21 = vld [vmem:[#allocation2 + $0x7d0] sm:$0xff]  ;;  %v459_v52 = vld [vmem:[#allocation2 + $0x888] sm:$0xff] }
  0x77   :  { %v3798_v26 = vpack.c.bf16 %v444_v21, %v442_v20  ;;  %v441_v27 = vld [vmem:[#allocation2 + $0x7b0] sm:$0xff]  ;;  %v620_v21 = vld [vmem:[#allocation2 + $0xb08] sm:$0xff] }
  0x78   :  { %v449_v39 = vld [vmem:[#allocation2 + $0x810] sm:$0xff] }
  0x79   :  { %3713 = vmatpush1.bf16.msra.mxu0 %v3712_v35  ;;  %v3744_v35 = vpack.c.bf16 %v159_v32, %v157_v31  ;;  %v3800_v31 = vpack.c.bf16 %v443_v28, %v441_v27  ;;  %v457_v51 = vld [vmem:[#allocation2 + $0x870] sm:$0xff]  ;;  %v623_v27 = vld [vmem:[#allocation2 + $0xb20] sm:$0xff]  ;;  %v626_v28 = vld [vmem:[#allocation2 + $0xb38] sm:$0xff] }
  0x7a   :  { %3715 = vmatprep.subr.bf16.mxu0 %v3714_v36  ;;  %v3746_v36 = vpack.c.bf16 %v164_v34, %v162_v33  ;;  %v445_v33 = vld [vmem:[#allocation2 + $0x7e0] sm:$0xff]  ;;  %v447_v34 = vld [vmem:[#allocation2 + $0x7f8] sm:$0xff]  ;;  %v465_v63 = vld [vmem:[#allocation2 + $0x8d0] sm:$0xff] }
  0x7b   :  { %v3804_v37 = vpack.c.bf16 %v447_v34, %v445_v33  ;;  %v617_v20 = vld [vmem:[#allocation2 + $0xaf0] sm:$0xff]  ;;  %v632_v34 = vld [vmem:[#allocation2 + $0xb68] sm:$0xff] }
  0x7c   :  { %v629_v33 = vld [vmem:[#allocation2 + $0xb50] sm:$0xff] }
  0x7d   :  { %3717 = vmatpush1.bf16.msra.mxu0 %v3716_v47  ;;  %v3752_v47 = vpack.c.bf16 %v167_v44, %v165_v43  ;;  %v3808_v43 = vpack.c.bf16 %v451_v40, %v449_v39  ;;  %v635_v39 = vld [vmem:[#allocation2 + $0xb80] sm:$0xff]  ;;  %v638_v40 = vld [vmem:[#allocation2 + $0xb98] sm:$0xff] }
  0x7e   :  { %3719 = vmatprep.subr.bf16.mxu0 %v3718_v48  ;;  %v3754_v48 = vpack.c.bf16 %v172_v46, %v170_v45  ;;  %v453_v45 = vld [vmem:[#allocation2 + $0x840] sm:$0xff]  ;;  %v455_v46 = vld [vmem:[#allocation2 + $0x858] sm:$0xff] }
  0x7f   :  { %v3812_v49 = vpack.c.bf16 %v455_v46, %v453_v45  ;;  %v641_v45 = vld [vmem:[#allocation2 + $0xbb0] sm:$0xff]  ;;  %v644_v46 = vld [vmem:[#allocation2 + $0xbc8] sm:$0xff] }
  0x81   :  { %3721 = vmatpush1.bf16.msra.mxu0 %v3720_v59  ;;  %v345_v59 = vld [vmem:[#allocation2 + $0x5a0] sm:$0xff] }
  0x82   :  { %3723 = vmatprep.subr.bf16.mxu0 %v3722_v60  ;;  %v346_v60 = vld [vmem:[#allocation2 + $0x5b8] sm:$0xff] }
  0x83   :  { %v3788_v61 = vpack.c.bf16 %v346_v60, %v345_v59  ;;  %v466_v60 = vld [vmem:[#allocation2 + $0x8d8] sm:$0xff] }
  0x85   :  { %3725 = vmatpush1.bf16.msra.mxu0 %v3724_v3  ;;  %3789 = vmatpush3.bf16.msra.mxu1 %v3788_v61  ;;  %v3792_v3 = vpack.c.bf16 %v348_v2, %v347_v1  ;;  %v468_v61 = vld [vmem:[#allocation2 + $0x8f0] sm:$0xff]  ;;  %v556_v2 = vld [vmem:[#allocation2 + $0x908] sm:$0xff] }
  0x86   :  { %3727 = vmatprep.subr.bf16.mxu0 %v3726_v4  ;;  %3791 = vmatprep.subr.bf16.mxu1 %v3790_v0  ;;  %v438_v4 = vld [vmem:[#allocation2 + $0x788] sm:$0xff]  ;;  %v3822_v62 = vpack.c.bf16 %v468_v61, %v466_v60  ;;  %v561_v60 = vld [vmem:[#allocation2 + $0x930] sm:$0xff] }
  0x87   :  { %v3794_v6 = vpack.c.bf16 %v440_v5, %v438_v4  ;;  %v467_v0 = vld [vmem:[#allocation2 + $0x8e8] sm:$0xff]  ;;  %v605_v5 = vld [vmem:[#allocation2 + $0xa90] sm:$0xff] }
  0x88   :  { %v3824_v1 = vpack.c.bf16 %v467_v0, %v465_v63  ;;  %v564_v61 = vld [vmem:[#allocation2 + $0x948] sm:$0xff]  ;;  %v571_v63 = vld [vmem:[#allocation2 + $0x980] sm:$0xff] }
  0x89   :  { %3729 = vmatpush1.bf16.msra.mxu0 %v3728_v9  ;;  %3793 = vmatpush3.bf16.msra.mxu1 %v3792_v3  ;;  %v4877_v9 = vsub.s32 0, %v4874_v8  ;;  %v559_v3 = vld [vmem:[#allocation2 + $0x920] sm:$0xff]  ;;  %v3832_v0 = vpack.c.bf16 %v564_v61, %v561_v60  ;;  %v621_v60 = vld [vmem:[#allocation2 + $0xb10] sm:$0xff]  ;;  %v624_v61 = vld [vmem:[#allocation2 + $0xb28] sm:$0xff] }
  0x8a   :  { %3731 = vmatprep.subr.bf16.mxu0 %v3730_v10  ;;  %3795 = vmatprep.subr.bf16.mxu1 %v3794_v6  ;;  %v177_v10 = vld [vmem:[#allocation7] ss:$8 sm:$0x3]  ;;  %v3826_v4 = vpack.c.bf16 %v559_v3, %v556_v2  ;;  %v570_v3 = vld [vmem:[#allocation2 + $0x978] sm:$0xff] }
  0x8b   :  { %v182_v12 = vrot.slane %v177_v10, %v4877_v9  ;;  %v186_v13 = vrot.slane %v177_v10, %v4880_v11  ;;  %v608_v6 = vld [vmem:[#allocation2 + $0xaa8] sm:$0xff]  ;;  %v557_v10 = vld [vmem:[#allocation2 + $0x910] sm:$0xff]  ;;  %v567_v2 = vld [vmem:[#allocation2 + $0x960] sm:$0xff] }
  0x8c   :  { %254 = vmatmul.mubr.f32.vlgmr.msra.gmra.mrb[0].mxu0 %v78_v15  ;;  %v3890_v7 = vpack.c.bf16 %v608_v6, %v605_v5  ;;  %v577_v5 = vld [vmem:[#allocation2 + $0x9b0] sm:$0xff]  ;;  %v3836_v6 = vpack.c.bf16 %v570_v3, %v567_v2  ;;  %v627_v2 = vld [vmem:[#allocation2 + $0xb40] sm:$0xff]  ;;  %v630_v3 = vld [vmem:[#allocation2 + $0xb58] sm:$0xff] }
  0x8d   :  { %3733 = vmatpush1.bf16.msra.mxu0 %v3732_v16  ;;  %324 = vmatprep.mubr.f32.mxu0 %v4759_v23 }
  0x8e   :  { %3735 = vmatprep.subr.bf16.mxu0 %v3734_v17  ;;  %v437_v17 = vld [vmem:[#allocation2 + $0x780] sm:$0xff] }
  0x91   :  { %3737 = vmatpush1.bf16.msra.mxu0 %v3736_v22 }
  0x92   :  { %3739 = vmatprep.subr.bf16.mxu0 %v3738_v24  ;;  %v3796_v24 = vpack.c.bf16 %v439_v18, %v437_v17  ;;  %v563_v17 = vld [vmem:[#allocation2 + $0x940] sm:$0xff]  ;;  %v566_v18 = vld [vmem:[#allocation2 + $0x958] sm:$0xff] }
  0x95   :  { %3741 = vmatpush1.bf16.msra.mxu0 %v3740_v29  ;;  %v446_v29 = vld [vmem:[#allocation2 + $0x7e8] sm:$0xff] }
  0x96   :  { %3743 = vmatprep.subr.bf16.mxu0 %v3742_v30  ;;  %v448_v30 = vld [vmem:[#allocation2 + $0x800] sm:$0xff] }
  0x97   :  { %v3802_v32 = vpack.c.bf16 %v448_v30, %v446_v29  ;;  %v3902_v29 = vpack.c.bf16 %v626_v28, %v623_v27  ;;  %v575_v30 = vld [vmem:[#allocation2 + $0x9a0] sm:$0xff] }
  0x98   :  { %v595_v27 = vld [vmem:[#allocation2 + $0xa40] sm:$0xff] }
  0x99   :  { %3745 = vmatpush1.bf16.msra.mxu0 %v3744_v35  ;;  %v450_v35 = vld [vmem:[#allocation2 + $0x818] sm:$0xff] }
  0x9a   :  { %3747 = vmatprep.subr.bf16.mxu0 %v3746_v36  ;;  %v452_v36 = vld [vmem:[#allocation2 + $0x830] sm:$0xff] }
  0x9b   :  { %v3806_v38 = vpack.c.bf16 %v452_v36, %v450_v35  ;;  %v3906_v35 = vpack.c.bf16 %v632_v34, %v629_v33  ;;  %v581_v36 = vld [vmem:[#allocation2 + $0x9d0] sm:$0xff] }
  0x9c   :  { %v601_v33 = vld [vmem:[#allocation2 + $0xa70] sm:$0xff] }
  0x9d   :  { %3749 = vmatpush1.bf16.msra.mxu0 %v3748_v41  ;;  %v454_v41 = vld [vmem:[#allocation2 + $0x848] sm:$0xff] }
  0x9e   :  { %3751 = vmatprep.subr.bf16.mxu0 %v3750_v42  ;;  %v456_v42 = vld [vmem:[#allocation2 + $0x860] sm:$0xff] }
  0x9f   :  { %v3810_v44 = vpack.c.bf16 %v456_v42, %v454_v41  ;;  %v3910_v41 = vpack.c.bf16 %v638_v40, %v635_v39  ;;  %v587_v42 = vld [vmem:[#allocation2 + $0xa00] sm:$0xff] }
  0xa0   :  { %v607_v39 = vld [vmem:[#allocation2 + $0xaa0] sm:$0xff] }
  0xa1   :  { %3753 = vmatpush1.bf16.msra.mxu0 %v3752_v47  ;;  %v458_v47 = vld [vmem:[#allocation2 + $0x878] sm:$0xff] }
  0xa2   :  { %3755 = vmatprep.subr.bf16.mxu0 %v3754_v48  ;;  %v460_v48 = vld [vmem:[#allocation2 + $0x890] sm:$0xff] }
  0xa3   :  { %v3814_v50 = vpack.c.bf16 %v460_v48, %v458_v47  ;;  %v3914_v47 = vpack.c.bf16 %v644_v46, %v641_v45  ;;  %v613_v45 = vld [vmem:[#allocation2 + $0xad0] sm:$0xff] }
  0xa5   :  { %3757 = vmatpush1.bf16.msra.mxu0 %v3756_v53  ;;  %v3816_v53 = vpack.c.bf16 %v459_v52, %v457_v51  ;;  %v555_v52 = vld [vmem:[#allocation2 + $0x900] sm:$0xff] }
  0xa6   :  { %3759 = vmatprep.subr.bf16.mxu0 %v3758_v54  ;;  %v462_v54 = vld [vmem:[#allocation2 + $0x8a8] sm:$0xff] }
  0xa7   :  { %v3818_v56 = vpack.c.bf16 %v464_v55, %v462_v54  ;;  %v562_v54 = vld [vmem:[#allocation2 + $0x938] sm:$0xff]  ;;  %v565_v55 = vld [vmem:[#allocation2 + $0x950] sm:$0xff] }
  0xa9   :  { %3761 = vmatpush1.bf16.msra.mxu0 %v3760_v57  ;;  %v461_v57 = vld [vmem:[#allocation2 + $0x8a0] sm:$0xff] }
  0xaa   :  { %3891 = vmatprep.subr.bf16.mxu0 %v3890_v7 }
  0xac   :  { %325 = vmatmul.mubr.f32.vlgmr.msra.gmra.mrb[0].mxu0 %v80_v58  ;;  %v463_v58 = vld [vmem:[#allocation2 + $0x8b8] sm:$0xff] }
  0xad   :  { %v3820_v59 = vpack.c.bf16 %v463_v58, %v461_v57 }
 0x17f   :  { %v326_v14 = vpop.f32.mrb[0].mxu0 }
 0x180   :  { %v4634_v15 = vadd.f32 %v326_v14, %v182_v12  ;;  %v328_v16 = vpop.f32.mrb[1].mxu0  ;;  %v560_v12 = vld [vmem:[#allocation2 + $0x928] sm:$0xff]  ;;  %v611_v14 = vld [vmem:[#allocation2 + $0xac0] sm:$0xff] }
 0x181   :  { %v4635_v19 = vadd.f32 %v328_v16, %v186_v13  ;;  %v3892_v13 = vpack.c.bf16 %v560_v12, %v557_v10  ;;  %v573_v10 = vld [vmem:[#allocation2 + $0x990] sm:$0xff]  ;;  %v576_v12 = vld [vmem:[#allocation2 + $0x9a8] sm:$0xff] }
 0x182   :  { %v331_v25 = vmax.f32 %v4634_v15, 0.0  ;;  %v614_v15 = vld [vmem:[#allocation2 + $0xad8] sm:$0xff] }
 0x183   :  { %v332_v22 = vmax.f32 %v4635_v19, 0.0  ;;  %v3894_v16 = vpack.c.bf16 %v614_v15, %v611_v14  ;;  %3893 = vmatpush3.bf16.msra.mxu0 %v3892_v13  ;;  %v3896_v19 = vpack.c.bf16 %v566_v18, %v563_v17  ;;  %v580_v13 = vld [vmem:[#allocation2 + $0x9c8] sm:$0xff]  ;;  %v583_v14 = vld [vmem:[#allocation2 + $0x9e0] sm:$0xff]  ;;  %v3840_v15 = vpack.c.bf16 %v576_v12, %v573_v10  ;;  %v582_v18 = vld [vmem:[#allocation2 + $0x9d8] sm:$0xff] }
 0x184   :  { %v579_v17 = vld [vmem:[#allocation2 + $0x9c0] sm:$0xff]  ;;  %v633_v10 = vld [vmem:[#allocation2 + $0xb70] sm:$0xff]  ;;  %v636_v12 = vld [vmem:[#allocation2 + $0xb88] sm:$0xff] }
 0x185   :  { %430 = vmatprep.mubr.f32.mxu1 %v332_v22  ;;  %3895 = vmatprep.subr.bf16.mxu0 %v3894_v16  ;;  %v3898_v22 = vpack.c.bf16 %v620_v21, %v617_v20  ;;  %v3842_v16 = vpack.c.bf16 %v583_v14, %v580_v13  ;;  %v589_v20 = vld [vmem:[#allocation2 + $0xa10] sm:$0xff]  ;;  %v3844_v21 = vpack.c.bf16 %v582_v18, %v579_v17  ;;  %v640_v13 = vld [vmem:[#allocation2 + $0xba8] sm:$0xff]  ;;  %v643_v14 = vld [vmem:[#allocation2 + $0xbc0] sm:$0xff] }
 0x186   :  { %431 = vmatmul.mubr.f32.vlgmr.msra.gmra.mrb[0].mxu1 %v331_v25  ;;  %v572_v25 = vld [vmem:[#allocation2 + $0x988] sm:$0xff]  ;;  %v639_v17 = vld [vmem:[#allocation2 + $0xba0] sm:$0xff]  ;;  %v642_v18 = vld [vmem:[#allocation2 + $0xbb8] sm:$0xff] }
 0x187   :  { %3797 = vmatpush1.bf16.msra.mxu1 %v3796_v24  ;;  %546 = vmatprep.mubr.f32.mxu1 %v4759_v23  ;;  %v569_v24 = vld [vmem:[#allocation2 + $0x970] sm:$0xff] }
 0x188   :  { %3799 = vmatprep.subr.bf16.mxu1 %v3798_v26  ;;  %3897 = vmatpush3.bf16.msra.mxu0 %v3896_v19  ;;  %v3900_v26 = vpack.c.bf16 %v572_v25, %v569_v24  ;;  %v586_v19 = vld [vmem:[#allocation2 + $0x9f8] sm:$0xff]  ;;  %v585_v24 = vld [vmem:[#allocation2 + $0x9f0] sm:$0xff]  ;;  %v588_v25 = vld [vmem:[#allocation2 + $0xa08] sm:$0xff] }
 0x189   :  { %3899 = vmatprep.subr.bf16.mxu0 %v3898_v22  ;;  %v3846_v22 = vpack.c.bf16 %v589_v20, %v586_v19  ;;  %v3848_v28 = vpack.c.bf16 %v588_v25, %v585_v24  ;;  %v593_v19 = vld [vmem:[#allocation2 + $0xa30] sm:$0xff]  ;;  %v3884_v20 = vpack.c.bf16 %v642_v18, %v639_v17  ;;  %v646_v24 = vld [vmem:[#allocation2 + $0xbd8] sm:$0xff]  ;;  %v830_v18 = vld [vmem:[#allocation2 + $0xc88] sm:$0xff] }
 0x18a   :  { %v649_v25 = vld [vmem:[#allocation2 + $0xbf0] sm:$0xff] }
 0x18b   :  { %3801 = vmatpush1.bf16.msra.mxu1 %v3800_v31  ;;  %v578_v31 = vld [vmem:[#allocation2 + $0x9b8] sm:$0xff]  ;;  %v827_v17 = vld [vmem:[#allocation2 + $0xc70] sm:$0xff] }
 0x18c   :  { %3803 = vmatprep.subr.bf16.mxu1 %v3802_v32  ;;  %3901 = vmatpush3.bf16.msra.mxu0 %v3900_v26  ;;  %v3904_v32 = vpack.c.bf16 %v578_v31, %v575_v30  ;;  %v592_v26 = vld [vmem:[#allocation2 + $0xa28] sm:$0xff]  ;;  %v591_v30 = vld [vmem:[#allocation2 + $0xa20] sm:$0xff]  ;;  %v594_v31 = vld [vmem:[#allocation2 + $0xa38] sm:$0xff] }
 0x18d   :  { %3903 = vmatprep.subr.bf16.mxu0 %v3902_v29  ;;  %v3850_v29 = vpack.c.bf16 %v595_v27, %v592_v26  ;;  %v3852_v34 = vpack.c.bf16 %v594_v31, %v591_v30  ;;  %v647_v26 = vld [vmem:[#allocation2 + $0xbe0] sm:$0xff]  ;;  %v3886_v27 = vpack.c.bf16 %v649_v25, %v646_v24  ;;  %v648_v30 = vld [vmem:[#allocation2 + $0xbe8] sm:$0xff]  ;;  %v831_v24 = vld [vmem:[#allocation2 + $0xc90] sm:$0xff] }
 0x18e   :  { %v834_v25 = vld [vmem:[#allocation2 + $0xca8] sm:$0xff] }
 0x18f   :  { %3805 = vmatpush1.bf16.msra.mxu1 %v3804_v37  ;;  %v584_v37 = vld [vmem:[#allocation2 + $0x9e8] sm:$0xff] }
 0x190   :  { %3807 = vmatprep.subr.bf16.mxu1 %v3806_v38  ;;  %3905 = vmatpush3.bf16.msra.mxu0 %v3904_v32  ;;  %v3908_v38 = vpack.c.bf16 %v584_v37, %v581_v36  ;;  %v598_v32 = vld [vmem:[#allocation2 + $0xa58] sm:$0xff]  ;;  %v597_v36 = vld [vmem:[#allocation2 + $0xa50] sm:$0xff]  ;;  %v600_v37 = vld [vmem:[#allocation2 + $0xa68] sm:$0xff] }
 0x191   :  { %3907 = vmatprep.subr.bf16.mxu0 %v3906_v35  ;;  %v3854_v35 = vpack.c.bf16 %v601_v33, %v598_v32  ;;  %v3856_v40 = vpack.c.bf16 %v600_v37, %v597_v36  ;;  %v599_v33 = vld [vmem:[#allocation2 + $0xa60] sm:$0xff]  ;;  %v814_v36 = vld [vmem:[#allocation2 + $0xc08] sm:$0xff] }
 0x192   :  { %v817_v37 = vld [vmem:[#allocation2 + $0xc20] sm:$0xff] }
 0x193   :  { %3809 = vmatpush1.bf16.msra.mxu1 %v3808_v43  ;;  %v590_v43 = vld [vmem:[#allocation2 + $0xa18] sm:$0xff] }
 0x194   :  { %3811 = vmatprep.subr.bf16.mxu1 %v3810_v44  ;;  %3909 = vmatpush3.bf16.msra.mxu0 %v3908_v38  ;;  %v3912_v44 = vpack.c.bf16 %v590_v43, %v587_v42  ;;  %v604_v38 = vld [vmem:[#allocation2 + $0xa88] sm:$0xff]  ;;  %v603_v42 = vld [vmem:[#allocation2 + $0xa80] sm:$0xff]  ;;  %v606_v43 = vld [vmem:[#allocation2 + $0xa98] sm:$0xff] }
 0x195   :  { %3911 = vmatprep.subr.bf16.mxu0 %v3910_v41  ;;  %v3858_v41 = vpack.c.bf16 %v607_v39, %v604_v38  ;;  %v3860_v46 = vpack.c.bf16 %v606_v43, %v603_v42  ;;  %v3922_v38 = vpack.c.bf16 %v817_v37, %v814_v36  ;;  %v863_v39 = vld [vmem:[#allocation2 + $0xd90] sm:$0xff]  ;;  %v837_v36 = vld [vmem:[#allocation2 + $0xcc0] sm:$0xff]  ;;  %v840_v37 = vld [vmem:[#allocation2 + $0xcd8] sm:$0xff] }
 0x196   :  { %v470_v42 = vld [vmem:[#allocation7 + $0x30] ss:$8 sm:$0x3] }
 0x197   :  { %3813 = vmatpush1.bf16.msra.mxu1 %v3812_v49  ;;  %v365_v49 = vld [vmem:[#allocation7 + $0x18] ss:$0 sm:$0xff]  ;;  %v475_v43 = vrot.slane %v470_v42, %v4877_v9 }
 0x198   :  { %3815 = vmatprep.subr.bf16.mxu1 %v3814_v50  ;;  %3913 = vmatpush3.bf16.msra.mxu0 %v3912_v44  ;;  %v610_v44 = vld [vmem:[#allocation2 + $0xab8] sm:$0xff] }
 0x199   :  { %3915 = vmatprep.subr.bf16.mxu0 %v3914_v47  ;;  %v3862_v47 = vpack.c.bf16 %v613_v45, %v610_v44  ;;  %v479_v44 = vrot.slane %v470_v42, %v4880_v11  ;;  %v839_v42 = vld [vmem:[#allocation2 + $0xcd0] sm:$0xff] }
 0x19b   :  { %3817 = vmatpush1.bf16.msra.mxu1 %v3816_v53  ;;  %v558_v53 = vld [vmem:[#allocation2 + $0x918] sm:$0xff] }
 0x19c   :  { %3819 = vmatprep.subr.bf16.mxu1 %v3818_v56  ;;  %v3828_v57 = vpack.c.bf16 %v558_v53, %v555_v52 }
 0x19f   :  { %3821 = vmatpush1.bf16.msra.mxu1 %v3820_v59  ;;  %v3830_v59 = vpack.c.bf16 %v565_v55, %v562_v54  ;;  %v615_v54 = vld [vmem:[#allocation2 + $0xae0] sm:$0xff]  ;;  %v618_v55 = vld [vmem:[#allocation2 + $0xaf8] sm:$0xff] }
 0x1a0   :  { %3823 = vmatprep.subr.bf16.mxu1 %v3822_v62  ;;  %v568_v62 = vld [vmem:[#allocation2 + $0x968] sm:$0xff] }
 0x1a3   :  { %3825 = vmatpush1.bf16.msra.mxu1 %v3824_v1  ;;  %v3834_v1 = vpack.c.bf16 %v571_v63, %v568_v62  ;;  %v628_v62 = vld [vmem:[#allocation2 + $0xb48] sm:$0xff]  ;;  %v631_v63 = vld [vmem:[#allocation2 + $0xb60] sm:$0xff] }
 0x1a4   :  { %3827 = vmatprep.subr.bf16.mxu1 %v3826_v4  ;;  %v574_v4 = vld [vmem:[#allocation2 + $0x998] sm:$0xff] }
 0x1a5   :  { %v3838_v7 = vpack.c.bf16 %v577_v5, %v574_v4  ;;  %v634_v4 = vld [vmem:[#allocation2 + $0xb78] sm:$0xff]  ;;  %v637_v5 = vld [vmem:[#allocation2 + $0xb90] sm:$0xff] }
 0x259   :  { %v2986_v48 = vpop.f32.mrb[0].mxu1 }
 0x25a   :  { %v2987_v50 = vpop.f32.mrb[1].mxu1 }
 0x25b   :  { %v2988_v51 = vadd.f32 %v2987_v50, %v2986_v48  ;;  %v609_v48 = vld [vmem:[#allocation2 + $0xab0] sm:$0xff]  ;;  %v616_v50 = vld [vmem:[#allocation2 + $0xae8] sm:$0xff] }
 0x25d   :  { %v433_v56 = vadd.f32 %v2988_v51, %v365_v49  ;;  %v612_v49 = vld [vmem:[#allocation2 + $0xac8] sm:$0xff]  ;;  %v619_v51 = vld [vmem:[#allocation2 + $0xb00] sm:$0xff] }
 0x25e   :  { %v3864_v52 = vpack.c.bf16 %v612_v49, %v609_v48  ;;  %v3866_v53 = vpack.c.bf16 %v619_v51, %v616_v50  ;;  %v820_v50 = vld [vmem:[#allocation2 + $0xc38] sm:$0xff]  ;;  %v815_v51 = vld [vmem:[#allocation2 + $0xc10] sm:$0xff] }
 0x25f   :  { %v436_v58 = vmax.f32 %v433_v56, 0.0  ;;  %v622_v56 = vld [vmem:[#allocation2 + $0xb18] sm:$0xff] }
 0x261   :  { %547 = vmatmul.mubr.f32.vlgmr.msra.gmra.mrb[2].mxu1 %v436_v58  ;;  %v3868_v58 = vpack.c.bf16 %v618_v55, %v615_v54  ;;  %v823_v54 = vld [vmem:[#allocation2 + $0xc50] sm:$0xff]  ;;  %v869_v55 = vld [vmem:[#allocation2 + $0xdc0] sm:$0xff] }
 0x262   :  { %3829 = vmatpush1.bf16.msra.mxu1 %v3828_v57  ;;  %v625_v57 = vld [vmem:[#allocation2 + $0xb30] sm:$0xff] }
 0x263   :  { %3831 = vmatprep.subr.bf16.mxu1 %v3830_v59  ;;  %v3870_v59 = vpack.c.bf16 %v625_v57, %v622_v56  ;;  %v872_v56 = vld [vmem:[#allocation2 + $0xdd8] sm:$0xff] }
 0x266   :  { %3833 = vmatpush1.bf16.msra.mxu1 %v3832_v0  ;;  %v3872_v0 = vpack.c.bf16 %v624_v61, %v621_v60  ;;  %v822_v60 = vld [vmem:[#allocation2 + $0xc48] sm:$0xff] }
 0x267   :  { %3835 = vmatprep.subr.bf16.mxu1 %v3834_v1  ;;  %v3874_v1 = vpack.c.bf16 %v631_v63, %v628_v62  ;;  %v3926_v63 = vpack.c.bf16 %v823_v54, %v820_v50  ;;  %v845_v54 = vld [vmem:[#allocation2 + $0xd00] sm:$0xff] }
 0x26a   :  { %3837 = vmatpush1.bf16.msra.mxu1 %v3836_v6  ;;  %v3876_v6 = vpack.c.bf16 %v630_v3, %v627_v2  ;;  %v821_v2 = vld [vmem:[#allocation2 + $0xc40] sm:$0xff]  ;;  %v824_v3 = vld [vmem:[#allocation2 + $0xc58] sm:$0xff] }
 0x26b   :  { %3839 = vmatprep.subr.bf16.mxu1 %v3838_v7  ;;  %v3878_v7 = vpack.c.bf16 %v637_v5, %v634_v4  ;;  %v829_v4 = vld [vmem:[#allocation2 + $0xc80] sm:$0xff]  ;;  %v875_v5 = vld [vmem:[#allocation2 + $0xdf0] sm:$0xff] }
 0x26e   :  { %3841 = vmatpush1.bf16.msra.mxu1 %v3840_v15  ;;  %v3880_v15 = vpack.c.bf16 %v636_v12, %v633_v10  ;;  %v825_v10 = vld [vmem:[#allocation2 + $0xc60] sm:$0xff]  ;;  %v828_v12 = vld [vmem:[#allocation2 + $0xc78] sm:$0xff] }
 0x26f   :  { %3843 = vmatprep.subr.bf16.mxu1 %v3842_v16  ;;  %v3882_v16 = vpack.c.bf16 %v643_v14, %v640_v13  ;;  %v4024_v13 = vpack.c.bf16 %v824_v3, %v821_v2  ;;  %v854_v2 = vld [vmem:[#allocation2 + $0xd48] sm:$0xff]  ;;  %v856_v3 = vld [vmem:[#allocation2 + $0xd58] sm:$0xff] }
 0x272   :  { %3845 = vmatpush1.bf16.msra.mxu1 %v3844_v21  ;;  %v596_v21 = vld [vmem:[#allocation2 + $0xa48] sm:$0xff] }
 0x273   :  { %3847 = vmatprep.subr.bf16.mxu1 %v3846_v22  ;;  %v3916_v22 = vpack.c.bf16 %v596_v21, %v593_v19  ;;  %v835_v19 = vld [vmem:[#allocation2 + $0xcb0] sm:$0xff]  ;;  %v884_v21 = vld [vmem:[#allocation2 + $0xe38] sm:$0xff] }
 0x275   :  { %3917 = vmatpush3.bf16.msra.mxu0 %v3916_v22  ;;  %v3932_v22 = vpack.c.bf16 %v828_v12, %v825_v10  ;;  %v855_v10 = vld [vmem:[#allocation2 + $0xd50] sm:$0xff]  ;;  %v858_v12 = vld [vmem:[#allocation2 + $0xd68] sm:$0xff] }
 0x276   :  { %3849 = vmatpush1.bf16.msra.mxu1 %v3848_v28  ;;  %v650_v28 = vld [vmem:[#allocation2 + $0xbf8] sm:$0xff] }
 0x277   :  { %3851 = vmatprep.subr.bf16.mxu1 %v3850_v29  ;;  %v645_v29 = vld [vmem:[#allocation2 + $0xbd0] sm:$0xff]  ;;  %v3918_v31 = vpack.c.bf16 %v650_v28, %v647_v26  ;;  %v4028_v26 = vpack.c.bf16 %v830_v18, %v827_v17  ;;  %v838_v28 = vld [vmem:[#allocation2 + $0xcc8] sm:$0xff]  ;;  %v861_v17 = vld [vmem:[#allocation2 + $0xd80] sm:$0xff] }
 0x278   :  { %v3888_v32 = vpack.c.bf16 %v648_v30, %v645_v29  ;;  %v833_v30 = vld [vmem:[#allocation2 + $0xca0] sm:$0xff]  ;;  %v864_v18 = vld [vmem:[#allocation2 + $0xd98] sm:$0xff] }
 0x279   :  { %3919 = vmatprep.subr.bf16.mxu0 %v3918_v31  ;;  %v836_v31 = vld [vmem:[#allocation2 + $0xcb8] sm:$0xff] }
 0x27a   :  { %3853 = vmatpush1.bf16.msra.mxu1 %v3852_v34  ;;  %v602_v34 = vld [vmem:[#allocation2 + $0xa78] sm:$0xff] }
 0x27b   :  { %3855 = vmatprep.subr.bf16.mxu1 %v3854_v35  ;;  %v3920_v35 = vpack.c.bf16 %v602_v34, %v599_v33  ;;  %v887_v33 = vld [vmem:[#allocation2 + $0xe50] sm:$0xff]  ;;  %v890_v34 = vld [vmem:[#allocation2 + $0xe68] sm:$0xff] }
 0x27d   :  { %3921 = vmatpush3.bf16.msra.mxu0 %v3920_v35  ;;  %v3936_v35 = vpack.c.bf16 %v834_v25, %v831_v24  ;;  %v867_v24 = vld [vmem:[#allocation2 + $0xdb0] sm:$0xff]  ;;  %v870_v25 = vld [vmem:[#allocation2 + $0xdc8] sm:$0xff] }
 0x27e   :  { %3857 = vmatpush1.bf16.msra.mxu1 %v3856_v40  ;;  %3923 = vmatprep.subr.bf16.mxu0 %v3922_v38  ;;  %v866_v40 = vld [vmem:[#allocation2 + $0xda8] sm:$0xff]  ;;  %v4032_v38 = vpack.c.bf16 %v836_v31, %v833_v30  ;;  %v873_v30 = vld [vmem:[#allocation2 + $0xde0] sm:$0xff]  ;;  %v876_v31 = vld [vmem:[#allocation2 + $0xdf8] sm:$0xff] }
 0x27f   :  { %3859 = vmatprep.subr.bf16.mxu1 %v3858_v41  ;;  %v4018_v41 = vpack.c.bf16 %v866_v40, %v863_v39  ;;  %v844_v40 = vld [vmem:[#allocation2 + $0xcf8] sm:$0xff] }
 0x282   :  { %3861 = vmatpush1.bf16.msra.mxu1 %v3860_v46  ;;  %v813_v46 = vld [vmem:[#allocation2 + $0xc00] sm:$0xff] }
 0x283   :  { %3863 = vmatprep.subr.bf16.mxu1 %v3862_v47  ;;  %v816_v47 = vld [vmem:[#allocation2 + $0xc18] sm:$0xff] }
 0x286   :  { %3865 = vmatpush1.bf16.msra.mxu1 %v3864_v52  ;;  %v818_v52 = vld [vmem:[#allocation2 + $0xc28] sm:$0xff] }
 0x287   :  { %3867 = vmatprep.subr.bf16.mxu1 %v3866_v53  ;;  %v4020_v61 = vpack.c.bf16 %v818_v52, %v815_v51  ;;  %v850_v52 = vld [vmem:[#allocation2 + $0xd28] sm:$0xff] }
 0x28a   :  { %3869 = vmatpush1.bf16.msra.mxu1 %v3868_v58  ;;  %v3924_v58 = vpack.c.bf16 %v816_v47, %v813_v46  ;;  %v896_v46 = vld [vmem:[#allocation2 + $0xe98] sm:$0xff]  ;;  %v3940_v47 = vpack.c.bf16 %v840_v37, %v837_v36  ;;  %v879_v36 = vld [vmem:[#allocation2 + $0xe10] sm:$0xff]  ;;  %v882_v37 = vld [vmem:[#allocation2 + $0xe28] sm:$0xff] }
 0x28b   :  { %3871 = vmatprep.subr.bf16.mxu1 %v3870_v59  ;;  %v819_v59 = vld [vmem:[#allocation2 + $0xc30] sm:$0xff] }
 0x28e   :  { %3873 = vmatpush1.bf16.msra.mxu1 %v3872_v0  ;;  %v826_v0 = vld [vmem:[#allocation2 + $0xc68] sm:$0xff] }
 0x28f   :  { %3875 = vmatprep.subr.bf16.mxu1 %v3874_v1  ;;  %v4022_v1 = vpack.c.bf16 %v872_v56, %v869_v55  ;;  %v3930_v14 = vpack.c.bf16 %v829_v4, %v826_v0  ;;  %v848_v55 = vld [vmem:[#allocation2 + $0xd18] sm:$0xff]  ;;  %v853_v56 = vld [vmem:[#allocation2 + $0xd40] sm:$0xff]  ;;  %v859_v4 = vld [vmem:[#allocation2 + $0xd70] sm:$0xff] }
 0x292   :  { %3877 = vmatpush1.bf16.msra.mxu1 %v3876_v6  ;;  %v878_v6 = vld [vmem:[#allocation2 + $0xe08] sm:$0xff] }
 0x293   :  { %3879 = vmatprep.subr.bf16.mxu1 %v3878_v7  ;;  %v3928_v7 = vpack.c.bf16 %v822_v60, %v819_v59  ;;  %v849_v60 = vld [vmem:[#allocation2 + $0xd20] sm:$0xff] }
 0x296   :  { %3881 = vmatpush1.bf16.msra.mxu1 %v3880_v15  ;;  %v832_v15 = vld [vmem:[#allocation2 + $0xc98] sm:$0xff] }
 0x297   :  { %3883 = vmatprep.subr.bf16.mxu1 %v3882_v16  ;;  %v4026_v16 = vpack.c.bf16 %v878_v6, %v875_v5 }
 0x29a   :  { %3885 = vmatpush1.bf16.msra.mxu1 %v3884_v20  ;;  %v881_v20 = vld [vmem:[#allocation2 + $0xe20] sm:$0xff] }
 0x29b   :  { %3887 = vmatprep.subr.bf16.mxu1 %v3886_v27  ;;  %v3934_v27 = vpack.c.bf16 %v835_v19, %v832_v15  ;;  %v4030_v29 = vpack.c.bf16 %v884_v21, %v881_v20  ;;  %v3952_v15 = vpack.c.bf16 %v858_v12, %v855_v10  ;;  %v868_v19 = vld [vmem:[#allocation2 + $0xdb8] sm:$0xff]  ;;  %v871_v20 = vld [vmem:[#allocation2 + $0xdd0] sm:$0xff]  ;;  %v3956_v21 = vpack.c.bf16 %v864_v18, %v861_v17  ;;  %v909_v17 = vld [vmem:[#allocation2 + $0xf00] sm:$0xff] }
 0x29c   :  { %v4760_v10 = vmov 0.0|0.0   ;;  %v4888_v12 = vld [vmem:[#allocation7 + $0x48] ss:$8 sm:$0x7] }
 0x29e   :  { %3889 = vmatpush1.bf16.msra.mxu1 %v3888_v32  ;;  %v841_v32 = vld [vmem:[#allocation2 + $0xce0] sm:$0xff] }
 0x29f   :  { %4019 = vmatprep.subr.bf16.mxu1 %v4018_v41  ;;  %v3938_v39 = vpack.c.bf16 %v841_v32, %v838_v28  ;;  %v4034_v41 = vpack.c.bf16 %v890_v34, %v887_v33  ;;  %v3960_v28 = vpack.c.bf16 %v870_v25, %v867_v24  ;;  %v880_v32 = vld [vmem:[#allocation2 + $0xe18] sm:$0xff]  ;;  %v883_v33 = vld [vmem:[#allocation2 + $0xe30] sm:$0xff]  ;;  %v3964_v34 = vpack.c.bf16 %v876_v31, %v873_v30  ;;  %v914_v24 = vld [vmem:[#allocation2 + $0xf28] sm:$0xff] }
 0x334   :  { %v548_v45 = vpop.f32.mrb[2].mxu1 }
 0x335   :  { %v549_v48 = vadd.f32 %v548_v45, %v475_v43  ;;  %v550_v49 = vpop.f32.mrb[3].mxu1  ;;  %v842_v43 = vld [vmem:[#allocation2 + $0xce8] sm:$0xff]  ;;  %v893_v45 = vld [vmem:[#allocation2 + $0xe80] sm:$0xff] }
 0x336   :  { %v551_v53 = vadd.f32 %v550_v49, %v479_v44  ;;  %v847_v44 = vld [vmem:[#allocation2 + $0xd10] sm:$0xff]  ;;  %v846_v49 = vld [vmem:[#allocation2 + $0xd08] sm:$0xff]  ;;  %v4036_v50 = vpack.c.bf16 %v842_v43, %v839_v42  ;;  %v885_v42 = vld [vmem:[#allocation2 + $0xe40] sm:$0xff] }
 0x337   :  { %v553_v62 = vmax.f32 %v549_v48, 0.0  ;;  %v843_v48 = vld [vmem:[#allocation2 + $0xcf0] sm:$0xff]  ;;  %v3942_v51 = vpack.c.bf16 %v847_v44, %v844_v40  ;;  %v3968_v40 = vpack.c.bf16 %v882_v37, %v879_v36  ;;  %v888_v43 = vld [vmem:[#allocation2 + $0xe58] sm:$0xff]  ;;  %v917_v36 = vld [vmem:[#allocation2 + $0xf40] sm:$0xff] }
 0x338   :  { %v554_v57 = vmax.f32 %v551_v53, 0.0  ;;  %v4038_v53 = vpack.c.bf16 %v896_v46, %v893_v45  ;;  %v3944_v59 = vpack.c.bf16 %v846_v49, %v843_v48  ;;  %v892_v44 = vld [vmem:[#allocation2 + $0xe78] sm:$0xff]  ;;  %v895_v45 = vld [vmem:[#allocation2 + $0xe90] sm:$0xff]  ;;  %v3972_v46 = vpack.c.bf16 %v888_v43, %v885_v42  ;;  %v894_v49 = vld [vmem:[#allocation2 + $0xe88] sm:$0xff] }
 0x339   :  { %v891_v48 = vld [vmem:[#allocation2 + $0xe70] sm:$0xff]  ;;  %v920_v37 = vld [vmem:[#allocation2 + $0xf58] sm:$0xff]  ;;  %v921_v42 = vld [vmem:[#allocation2 + $0xf60] sm:$0xff] }
 0x33a   :  { %733 = vmatprep.mubr.f32.mxu1 %v554_v57  ;;  %804 = vmatprep.mubr.f32.mxu0 %v554_v57  ;;  %v899_v57 = vld [vmem:[#allocation2 + $0xeb0] sm:$0xff] }
 0x33b   :  { %734 = vmatmul.mubr.f32.vlgmr.msra.gmra.mrb[4].mxu1 %v553_v62  ;;  %805 = vmatmul.mubr.f32.vlgmr.msra.gmra.mrb[2].mxu0 %v553_v62  ;;  %v3946_v62 = vpack.c.bf16 %v853_v56, %v850_v52  ;;  %v3976_v52 = vpack.c.bf16 %v894_v49, %v891_v48  ;;  %v931_v48 = vld [vmem:[#allocation2 + $0xfb0] sm:$0xff] }
 0x33c   :  { %3925 = vmatpush1.bf16.msra.mxu0 %v3924_v58  ;;  %4021 = vmatpush3.bf16.msra.mxu1 %v4020_v61  ;;  %v902_v58 = vld [vmem:[#allocation2 + $0xec8] sm:$0xff]  ;;  %v4040_v61 = vpack.c.bf16 %v848_v55, %v845_v54  ;;  %v897_v54 = vld [vmem:[#allocation2 + $0xea0] sm:$0xff]  ;;  %v900_v55 = vld [vmem:[#allocation2 + $0xeb8] sm:$0xff] }
 0x33d   :  { %3927 = vmatprep.subr.bf16.mxu0 %v3926_v63  ;;  %4023 = vmatprep.subr.bf16.mxu1 %v4022_v1  ;;  %v852_v63 = vld [vmem:[#allocation2 + $0xd38] sm:$0xff]  ;;  %v4042_v0 = vpack.c.bf16 %v902_v58, %v899_v57  ;;  %v851_v1 = vld [vmem:[#allocation2 + $0xd30] sm:$0xff]  ;;  %v3980_v56 = vpack.c.bf16 %v900_v55, %v897_v54  ;;  %v929_v54 = vld [vmem:[#allocation2 + $0xfa0] sm:$0xff] }
 0x33e   :  { %v3948_v5 = vpack.c.bf16 %v852_v63, %v849_v60  ;;  %v4044_v6 = vpack.c.bf16 %v854_v2, %v851_v1  ;;  %v904_v57 = vld [vmem:[#allocation2 + $0xed8] sm:$0xff]  ;;  %v907_v58 = vld [vmem:[#allocation2 + $0xef0] sm:$0xff]  ;;  %v906_v63 = vld [vmem:[#allocation2 + $0xee8] sm:$0xff] }
 0x33f   :  { %v3982_v60 = vpack.c.bf16 %v907_v58, %v904_v57  ;;  %v857_v2 = vld [vmem:[#allocation2 + $0xd60] sm:$0xff]  ;;  %v932_v55 = vld [vmem:[#allocation2 + $0xfb8] sm:$0xff] }
 0x340   :  { %3929 = vmatpush1.bf16.msra.mxu0 %v3928_v7  ;;  %4025 = vmatpush3.bf16.msra.mxu1 %v4024_v13  ;;  %v3950_v7 = vpack.c.bf16 %v859_v4, %v856_v3  ;;  %v862_v13 = vld [vmem:[#allocation2 + $0xd88] sm:$0xff]  ;;  %v860_v3 = vld [vmem:[#allocation2 + $0xd78] sm:$0xff]  ;;  %v937_v57 = vld [vmem:[#allocation2 + $0xfe0] sm:$0xff] }
 0x341   :  { %3931 = vmatprep.subr.bf16.mxu0 %v3930_v14  ;;  %4027 = vmatprep.subr.bf16.mxu1 %v4026_v16  ;;  %v865_v14 = vld [vmem:[#allocation2 + $0xda0] sm:$0xff]  ;;  %v4048_v4 = vpack.c.bf16 %v860_v3, %v857_v2  ;;  %v943_v2 = vld [vmem:[#allocation2 + $0x1010] sm:$0xff] }
 0x342   :  { %v3954_v16 = vpack.c.bf16 %v865_v14, %v862_v13  ;;  %v657_v13 = vrot.slane %v4888_v12, %v4877_v9  ;;  %v661_v14 = vrot.slane %v4888_v12, %v4880_v11 }
 0x344   :  { %3933 = vmatpush1.bf16.msra.mxu0 %v3932_v22  ;;  %4029 = vmatpush3.bf16.msra.mxu1 %v4028_v26  ;;  %v3958_v22 = vpack.c.bf16 %v871_v20, %v868_v19  ;;  %v874_v26 = vld [vmem:[#allocation2 + $0xde8] sm:$0xff] }
 0x345   :  { %3935 = vmatprep.subr.bf16.mxu0 %v3934_v27  ;;  %4031 = vmatprep.subr.bf16.mxu1 %v4030_v29  ;;  %v877_v27 = vld [vmem:[#allocation2 + $0xe00] sm:$0xff] }
 0x346   :  { %v3962_v29 = vpack.c.bf16 %v877_v27, %v874_v26  ;;  %v916_v27 = vld [vmem:[#allocation2 + $0xf38] sm:$0xff] }
 0x348   :  { %3937 = vmatpush1.bf16.msra.mxu0 %v3936_v35  ;;  %4033 = vmatpush3.bf16.msra.mxu1 %v4032_v38  ;;  %v3966_v35 = vpack.c.bf16 %v883_v33, %v880_v32  ;;  %v886_v38 = vld [vmem:[#allocation2 + $0xe48] sm:$0xff]  ;;  %v915_v32 = vld [vmem:[#allocation2 + $0xf30] sm:$0xff] }
 0x349   :  { %3939 = vmatprep.subr.bf16.mxu0 %v3938_v39  ;;  %4035 = vmatprep.subr.bf16.mxu1 %v4034_v41  ;;  %v889_v39 = vld [vmem:[#allocation2 + $0xe60] sm:$0xff] }
 0x34a   :  { %v3970_v41 = vpack.c.bf16 %v889_v39, %v886_v38  ;;  %v922_v38 = vld [vmem:[#allocation2 + $0xf68] sm:$0xff]  ;;  %v925_v39 = vld [vmem:[#allocation2 + $0xf80] sm:$0xff] }
 0x34b   :  { %v3994_v43 = vpack.c.bf16 %v925_v39, %v922_v38  ;;  %v1263_v38 = vld [vmem:[#allocation2 + $0x10a0] sm:$0xff] }
 0x34c   :  { %3941 = vmatpush1.bf16.msra.mxu0 %v3940_v47  ;;  %4037 = vmatpush3.bf16.msra.mxu1 %v4036_v50  ;;  %v3974_v47 = vpack.c.bf16 %v895_v45, %v892_v44  ;;  %v898_v50 = vld [vmem:[#allocation2 + $0xea8] sm:$0xff]  ;;  %v924_v44 = vld [vmem:[#allocation2 + $0xf78] sm:$0xff]  ;;  %v923_v45 = vld [vmem:[#allocation2 + $0xf70] sm:$0xff] }
 0x34d   :  { %3943 = vmatprep.subr.bf16.mxu0 %v3942_v51  ;;  %4039 = vmatprep.subr.bf16.mxu1 %v4038_v53  ;;  %v901_v51 = vld [vmem:[#allocation2 + $0xec0] sm:$0xff]  ;;  %v3996_v49 = vpack.c.bf16 %v924_v44, %v921_v42  ;;  %v1265_v44 = vld [vmem:[#allocation2 + $0x10b8] sm:$0xff] }
 0x34e   :  { %v3978_v53 = vpack.c.bf16 %v901_v51, %v898_v50  ;;  %v927_v51 = vld [vmem:[#allocation2 + $0xf90] sm:$0xff] }
 0x350   :  { %3945 = vmatpush1.bf16.msra.mxu0 %v3944_v59  ;;  %4041 = vmatpush3.bf16.msra.mxu1 %v4040_v61  ;;  %v905_v59 = vld [vmem:[#allocation2 + $0xee0] sm:$0xff]  ;;  %v908_v61 = vld [vmem:[#allocation2 + $0xef8] sm:$0xff] }
 0x351   :  { %3947 = vmatprep.subr.bf16.mxu0 %v3946_v62  ;;  %4043 = vmatprep.subr.bf16.mxu1 %v4042_v0  ;;  %v903_v62 = vld [vmem:[#allocation2 + $0xed0] sm:$0xff]  ;;  %v4046_v0 = vpack.c.bf16 %v908_v61, %v905_v59  ;;  %v4060_v59 = vpack.c.bf16 %v932_v55, %v929_v54  ;;  %v1268_v54 = vld [vmem:[#allocation2 + $0x10e0] sm:$0xff]  ;;  %v1270_v55 = vld [vmem:[#allocation2 + $0x10f8] sm:$0xff] }
 0x352   :  { %v3984_v1 = vpack.c.bf16 %v906_v63, %v903_v62  ;;  %v936_v62 = vld [vmem:[#allocation2 + $0xfd8] sm:$0xff]  ;;  %v935_v63 = vld [vmem:[#allocation2 + $0xfd0] sm:$0xff] }
 0x354   :  { %3949 = vmatpush1.bf16.msra.mxu0 %v3948_v5  ;;  %4045 = vmatpush3.bf16.msra.mxu1 %v4044_v6  ;;  %v910_v5 = vld [vmem:[#allocation2 + $0xf08] sm:$0xff]  ;;  %v913_v6 = vld [vmem:[#allocation2 + $0xf20] sm:$0xff] }
 0x355   :  { %3951 = vmatprep.subr.bf16.mxu0 %v3950_v7  ;;  %4047 = vmatprep.subr.bf16.mxu1 %v4046_v0  ;;  %v3986_v7 = vpack.c.bf16 %v913_v6, %v910_v5  ;;  %v938_v0 = vld [vmem:[#allocation2 + $0xfe8] sm:$0xff]  ;;  %v939_v5 = vld [vmem:[#allocation2 + $0xff0] sm:$0xff] }
 0x358   :  { %3953 = vmatpush1.bf16.msra.mxu0 %v3952_v15  ;;  %4049 = vmatpush3.bf16.msra.mxu1 %v4048_v4  ;;  %v4063_v4 = vpack.c.bf16 %v938_v0, %v935_v63  ;;  %v1279_v63 = vld [vmem:[#allocation2 + $0x1160] sm:$0xff] }
 0x359   :  { %3955 = vmatprep.subr.bf16.mxu0 %v3954_v16  ;;  %4050 = vmatprep.subr.bf16.mxu1 %v4760_v10 }
 0x35c   :  { %3957 = vmatpush1.bf16.msra.mxu0 %v3956_v21  ;;  %v912_v21 = vld [vmem:[#allocation2 + $0xf18] sm:$0xff] }
 0x35d   :  { %3959 = vmatprep.subr.bf16.mxu0 %v3958_v22  ;;  %v911_v22 = vld [vmem:[#allocation2 + $0xf10] sm:$0xff]  ;;  %v3988_v30 = vpack.c.bf16 %v912_v21, %v909_v17 }
 0x35e   :  { %v4051_v31 = vpack.c.bf16 %v914_v24, %v911_v22  ;;  %v948_v22 = vld [vmem:[#allocation2 + $0x1038] sm:$0xff]  ;;  %v947_v24 = vld [vmem:[#allocation2 + $0x1030] sm:$0xff] }
 0x360   :  { %3961 = vmatpush1.bf16.msra.mxu0 %v3960_v28  ;;  %v919_v28 = vld [vmem:[#allocation2 + $0xf50] sm:$0xff] }
 0x361   :  { %3963 = vmatprep.subr.bf16.mxu0 %v3962_v29 }
 0x364   :  { %3965 = vmatpush1.bf16.msra.mxu0 %v3964_v34  ;;  %v3990_v34 = vpack.c.bf16 %v919_v28, %v916_v27  ;;  %v952_v27 = vld [vmem:[#allocation2 + $0x1058] sm:$0xff]  ;;  %v955_v28 = vld [vmem:[#allocation2 + $0x1070] sm:$0xff] }
 0x365   :  { %3967 = vmatprep.subr.bf16.mxu0 %v3966_v35  ;;  %v918_v35 = vld [vmem:[#allocation2 + $0xf48] sm:$0xff] }
 0x368   :  { %3969 = vmatpush1.bf16.msra.mxu0 %v3968_v40  ;;  %v3992_v40 = vpack.c.bf16 %v918_v35, %v915_v32  ;;  %v953_v35 = vld [vmem:[#allocation2 + $0x1060] sm:$0xff] }
 0x369   :  { %3971 = vmatprep.subr.bf16.mxu0 %v3970_v41  ;;  %v4054_v41 = vpack.c.bf16 %v920_v37, %v917_v36  ;;  %v956_v36 = vld [vmem:[#allocation2 + $0x1078] sm:$0xff]  ;;  %v1261_v37 = vld [vmem:[#allocation2 + $0x1088] sm:$0xff] }
 0x36a   :  { %v4074_v42 = vpack.c.bf16 %v1263_v38, %v1261_v37  ;;  %v1299_v37 = vld [vmem:[#allocation2 + $0x1250] sm:$0xff] }
 0x36c   :  { %3973 = vmatpush1.bf16.msra.mxu0 %v3972_v46  ;;  %v926_v46 = vld [vmem:[#allocation2 + $0xf88] sm:$0xff] }
 0x36d   :  { %3975 = vmatprep.subr.bf16.mxu0 %v3974_v47  ;;  %v928_v47 = vld [vmem:[#allocation2 + $0xf98] sm:$0xff]  ;;  %v4057_v50 = vpack.c.bf16 %v926_v46, %v923_v45  ;;  %v1267_v45 = vld [vmem:[#allocation2 + $0x10d0] sm:$0xff] }
 0x370   :  { %3977 = vmatpush1.bf16.msra.mxu0 %v3976_v52  ;;  %v3998_v52 = vpack.c.bf16 %v931_v48, %v928_v47  ;;  %v4078_v48 = vpack.c.bf16 %v1267_v45, %v1265_v44  ;;  %v1300_v45 = vld [vmem:[#allocation2 + $0x1260] sm:$0xff] }
 0x371   :  { %3979 = vmatprep.subr.bf16.mxu0 %v3978_v53  ;;  %v930_v53 = vld [vmem:[#allocation2 + $0xfa8] sm:$0xff] }
 0x372   :  { %v4000_v58 = vpack.c.bf16 %v930_v53, %v927_v51  ;;  %v1269_v51 = vld [vmem:[#allocation2 + $0x10e8] sm:$0xff] }
 0x374   :  { %3981 = vmatpush1.bf16.msra.mxu0 %v3980_v56  ;;  %v934_v56 = vld [vmem:[#allocation2 + $0xfc8] sm:$0xff] }
 0x375   :  { %3983 = vmatprep.subr.bf16.mxu0 %v3982_v60  ;;  %v933_v60 = vld [vmem:[#allocation2 + $0xfc0] sm:$0xff]  ;;  %v4002_v61 = vpack.c.bf16 %v937_v57, %v934_v56  ;;  %v1273_v56 = vld [vmem:[#allocation2 + $0x1118] sm:$0xff]  ;;  %v1275_v57 = vld [vmem:[#allocation2 + $0x1130] sm:$0xff] }
 0x376   :  { %v4004_v3 = vpack.c.bf16 %v936_v62, %v933_v60  ;;  %v1272_v60 = vld [vmem:[#allocation2 + $0x1110] sm:$0xff]  ;;  %v1277_v62 = vld [vmem:[#allocation2 + $0x1148] sm:$0xff] }
 0x378   :  { %3985 = vmatpush1.bf16.msra.mxu0 %v3984_v1  ;;  %v940_v1 = vld [vmem:[#allocation2 + $0xff8] sm:$0xff] }
 0x379   :  { %3987 = vmatprep.subr.bf16.mxu0 %v3986_v7  ;;  %v4006_v6 = vpack.c.bf16 %v943_v2, %v940_v1  ;;  %v942_v7 = vld [vmem:[#allocation2 + $0x1008] sm:$0xff]  ;;  %v4090_v1 = vpack.c.bf16 %v1279_v63, %v1277_v62  ;;  %v1276_v2 = vld [vmem:[#allocation2 + $0x1140] sm:$0xff]  ;;  %v1312_v62 = vld [vmem:[#allocation2 + $0x12f0] sm:$0xff] }
 0x37a   :  { %v4008_v17 = vpack.c.bf16 %v942_v7, %v939_v5  ;;  %v1283_v5 = vld [vmem:[#allocation2 + $0x1190] sm:$0xff]  ;;  %v1314_v63 = vld [vmem:[#allocation2 + $0x1308] sm:$0xff] }
 0x40e   :  { %v735_v15 = vpop.f32.mrb[4].mxu1  ;;  %v3021_v16 = vpop.f32.mrb[2].mxu0 }
 0x40f   :  { %v736_v18 = vadd.f32 %v735_v15, %v657_v13  ;;  %v737_v19 = vpop.f32.mrb[5].mxu1  ;;  %v3022_v20 = vpop.f32.mrb[3].mxu0  ;;  %v941_v13 = vld [vmem:[#allocation2 + $0x1000] sm:$0xff]  ;;  %v946_v15 = vld [vmem:[#allocation2 + $0x1028] sm:$0xff] }
 0x410   :  { %v738_v25 = vadd.f32 %v737_v19, %v661_v14  ;;  %v4894_v26 = vadd.f32 %v3022_v20, %v3021_v16  ;;  %v944_v14 = vld [vmem:[#allocation2 + $0x1018] sm:$0xff]  ;;  %v949_v16 = vld [vmem:[#allocation2 + $0x1040] sm:$0xff]  ;;  %v664_v20 = vsub.s32 2, %v4874_v8 }
 0x411   :  { %v810_v33 = vmax.f32 %v736_v18, 0.0  ;;  %v4066_v18 = vpack.c.bf16 %v944_v14, %v941_v13  ;;  %v945_v19 = vld [vmem:[#allocation2 + $0x1020] sm:$0xff]  ;;  %v4010_v21 = vpack.c.bf16 %v949_v16, %v946_v15  ;;  %v1280_v13 = vld [vmem:[#allocation2 + $0x1170] sm:$0xff]  ;;  %v1282_v14 = vld [vmem:[#allocation2 + $0x1188] sm:$0xff] }
 0x412   :  { %v811_v29 = vmax.f32 %v738_v25, 0.0  ;;  %v950_v25 = vld [vmem:[#allocation2 + $0x1048] sm:$0xff]  ;;  %v665_v32 = vrot.slane %v4888_v12, %v664_v20  ;;  %v1260_v12 = vld [vmem:[#allocation2 + $0x1080] sm:$0xff] }
 0x413   :  { %v1285_v15 = vld [vmem:[#allocation2 + $0x11a8] sm:$0xff]  ;;  %v1287_v16 = vld [vmem:[#allocation2 + $0x11c0] sm:$0xff] }
 0x414   :  { %1039 = vmatprep.mubr.f32.mxu0 %v811_v29  ;;  %1181 = vmatprep.mubr.f32.mxu1 %v811_v29  ;;  %v4012_v29 = vpack.c.bf16 %v948_v22, %v945_v19  ;;  %v1284_v19 = vld [vmem:[#allocation2 + $0x11a0] sm:$0xff] }
 0x415   :  { %1040 = vmatmul.mubr.f32.vlgmr.msra.gmra.mrb[4].mxu0 %v810_v33  ;;  %1182 = vmatmul.mubr.f32.vlgmr.msra.gmra.mrb[6].mxu1 %v810_v33  ;;  %v4014_v33 = vpack.c.bf16 %v955_v28, %v952_v27  ;;  %v1288_v28 = vld [vmem:[#allocation2 + $0x11d0] sm:$0xff] }
 0x416   :  { %3989 = vmatpush1.bf16.msra.mxu0 %v3988_v30  ;;  %4052 = vmatpush3.bf16.msra.mxu1 %v4051_v31  ;;  %v4069_v30 = vpack.c.bf16 %v950_v25, %v947_v24  ;;  %v951_v31 = vld [vmem:[#allocation2 + $0x1050] sm:$0xff]  ;;  %v1289_v24 = vld [vmem:[#allocation2 + $0x11d8] sm:$0xff] }
 0x417   :  { %3991 = vmatprep.subr.bf16.mxu0 %v3990_v34  ;;  %4053 = vmatprep.subr.bf16.mxu1 %v4760_v10  ;;  %v954_v34 = vld [vmem:[#allocation2 + $0x1068] sm:$0xff]  ;;  %v1291_v25 = vld [vmem:[#allocation2 + $0x11f0] sm:$0xff] }
 0x418   :  { %1110 = vmatprep.mubr.f32.mxu0 %v4759_v23  ;;  %3313 = vmatprep.mubr.msk.f32.mxu1 %vm4761_vm0, %v4759_v23  ;;  %v4016_v39 = vpack.c.bf16 %v954_v34, %v951_v31  ;;  %v4102_v27 = vpack.c.bf16 %v1291_v25, %v1289_v24  ;;  %v1293_v31 = vld [vmem:[#allocation2 + $0x1208] sm:$0xff]  ;;  %v1516_v24 = vld [vmem:[#allocation2 + $0x1520] sm:$0xff] }
 0x419   :  { %v1513_v25 = vld [vmem:[#allocation2 + $0x1500] sm:$0xff] }
 0x41a   :  { %3993 = vmatpush1.bf16.msra.mxu0 %v3992_v40  ;;  %4055 = vmatpush3.bf16.msra.mxu1 %v4054_v41  ;;  %v4072_v40 = vpack.c.bf16 %v956_v36, %v953_v35  ;;  %v807_v41 = vadd.f32 %v4894_v26, %v665_v32  ;;  %v1295_v32 = vld [vmem:[#allocation2 + $0x1220] sm:$0xff]  ;;  %v1294_v35 = vld [vmem:[#allocation2 + $0x1218] sm:$0xff] }
 0x41b   :  { %3995 = vmatprep.subr.bf16.mxu0 %v3994_v43  ;;  %4056 = vmatprep.subr.bf16.mxu1 %v4760_v10  ;;  %v1262_v43 = vld [vmem:[#allocation2 + $0x1098] sm:$0xff]  ;;  %v4106_v34 = vpack.c.bf16 %v1295_v32, %v1293_v31 }
 0x41c   :  { %v4076_v46 = vpack.c.bf16 %v1262_v43, %v1260_v12  ;;  %v812_v47 = vmax.f32 %v807_v41, 0.0  ;;  %v1297_v36 = vld [vmem:[#allocation2 + $0x1238] sm:$0xff]  ;;  %v1298_v41 = vld [vmem:[#allocation2 + $0x1248] sm:$0xff]  ;;  %v1303_v12 = vld [vmem:[#allocation2 + $0x1280] sm:$0xff] }
 0x41e   :  { %3997 = vmatpush1.bf16.msra.mxu0 %v3996_v49  ;;  %4058 = vmatpush3.bf16.msra.mxu1 %v4057_v50  ;;  %v1264_v49 = vld [vmem:[#allocation2 + $0x10b0] sm:$0xff]  ;;  %v1266_v50 = vld [vmem:[#allocation2 + $0x10c8] sm:$0xff] }
 0x41f   :  { %3999 = vmatprep.subr.bf16.mxu0 %v3998_v52  ;;  %4059 = vmatprep.subr.bf16.mxu1 %v4760_v10  ;;  %v1271_v52 = vld [vmem:[#allocation2 + $0x1100] sm:$0xff]  ;;  %v4080_v26 = vpack.c.bf16 %v1266_v50, %v1264_v49 }
 0x420   :  { %v4082_v53 = vpack.c.bf16 %v1271_v52, %v1269_v51  ;;  %v1304_v51 = vld [vmem:[#allocation2 + $0x1290] sm:$0xff]  ;;  %v1306_v52 = vld [vmem:[#allocation2 + $0x12a8] sm:$0xff] }
 0x422   :  { %4001 = vmatpush1.bf16.msra.mxu0 %v4000_v58  ;;  %4061 = vmatpush3.bf16.msra.mxu1 %v4060_v59  ;;  %v4084_v58 = vpack.c.bf16 %v1270_v55, %v1268_v54  ;;  %v4086_v59 = vpack.c.bf16 %v1275_v57, %v1273_v56  ;;  %v4120_v54 = vpack.c.bf16 %v1306_v52, %v1304_v51  ;;  %v1308_v56 = vld [vmem:[#allocation2 + $0x12c0] sm:$0xff]  ;;  %v1310_v57 = vld [vmem:[#allocation2 + $0x12d8] sm:$0xff] }
 0x423   :  { %4003 = vmatprep.subr.bf16.mxu0 %v4002_v61  ;;  %4062 = vmatprep.subr.bf16.mxu1 %v4760_v10  ;;  %v1274_v61 = vld [vmem:[#allocation2 + $0x1128] sm:$0xff]  ;;  %v1531_v51 = vld [vmem:[#allocation2 + $0x15d8] sm:$0xff] }
 0x424   :  { %v4088_v0 = vpack.c.bf16 %v1274_v61, %v1272_v60  ;;  %v4124_v60 = vpack.c.bf16 %v1310_v57, %v1308_v56  ;;  %v1534_v52 = vld [vmem:[#allocation2 + $0x15f8] sm:$0xff]  ;;  %v1535_v56 = vld [vmem:[#allocation2 + $0x1608] sm:$0xff] }
 0x425   :  { %v1538_v57 = vld [vmem:[#allocation2 + $0x1628] sm:$0xff] }
 0x426   :  { %4005 = vmatpush1.bf16.msra.mxu0 %v4004_v3  ;;  %4064 = vmatpush3.bf16.msra.mxu1 %v4063_v4  ;;  %v1278_v3 = vld [vmem:[#allocation2 + $0x1158] sm:$0xff] }
 0x427   :  { %4007 = vmatprep.subr.bf16.mxu0 %v4006_v6  ;;  %4065 = vmatprep.subr.bf16.mxu1 %v4760_v10  ;;  %v1281_v4 = vld [vmem:[#allocation2 + $0x1178] sm:$0xff]  ;;  %v4092_v6 = vpack.c.bf16 %v1278_v3, %v1276_v2  ;;  %v4128_v2 = vpack.c.bf16 %v1314_v63, %v1312_v62 }
 0x428   :  { %v4094_v7 = vpack.c.bf16 %v1283_v5, %v1281_v4  ;;  %v1316_v4 = vld [vmem:[#allocation2 + $0x1320] sm:$0xff]  ;;  %v1318_v5 = vld [vmem:[#allocation2 + $0x1338] sm:$0xff] }
 0x429   :  { %v1539_v62 = vld [vmem:[#allocation2 + $0x1638] sm:$0xff] }
 0x42a   :  { %4009 = vmatpush1.bf16.msra.mxu0 %v4008_v17  ;;  %4067 = vmatpush3.bf16.msra.mxu1 %v4066_v18  ;;  %v4096_v17 = vpack.c.bf16 %v1282_v14, %v1280_v13  ;;  %v4098_v18 = vpack.c.bf16 %v1287_v16, %v1285_v15  ;;  %v1323_v13 = vld [vmem:[#allocation2 + $0x1370] sm:$0xff]  ;;  %v1322_v16 = vld [vmem:[#allocation2 + $0x1368] sm:$0xff]  ;;  %v1542_v63 = vld [vmem:[#allocation2 + $0x1658] sm:$0xff] }
 0x42b   :  { %4011 = vmatprep.subr.bf16.mxu0 %v4010_v21  ;;  %4068 = vmatprep.subr.bf16.mxu1 %v4760_v10  ;;  %v1286_v21 = vld [vmem:[#allocation2 + $0x11b8] sm:$0xff]  ;;  %v1320_v15 = vld [vmem:[#allocation2 + $0x1350] sm:$0xff] }
 0x42c   :  { %v4100_v22 = vpack.c.bf16 %v1286_v21, %v1284_v19  ;;  %v1327_v19 = vld [vmem:[#allocation2 + $0x13a0] sm:$0xff] }
 0x42e   :  { %4013 = vmatpush1.bf16.msra.mxu0 %v4012_v29  ;;  %4070 = vmatpush3.bf16.msra.mxu1 %v4069_v30  ;;  %v1290_v29 = vld [vmem:[#allocation2 + $0x11e8] sm:$0xff] }
 0x42f   :  { %4015 = vmatprep.subr.bf16.mxu0 %v4014_v33  ;;  %4071 = vmatprep.subr.bf16.mxu1 %v4760_v10  ;;  %v4104_v30 = vpack.c.bf16 %v1290_v29, %v1288_v28  ;;  %v1292_v33 = vld [vmem:[#allocation2 + $0x1200] sm:$0xff]  ;;  %v1515_v28 = vld [vmem:[#allocation2 + $0x1518] sm:$0xff] }
 0x430   :  { %v4108_v38 = vpack.c.bf16 %v1294_v35, %v1292_v33  ;;  %v1518_v29 = vld [vmem:[#allocation2 + $0x1538] sm:$0xff]  ;;  %v4172_v31 = vpack.c.bf16 %v1515_v28, %v1513_v25  ;;  %v1517_v33 = vld [vmem:[#allocation2 + $0x1530] sm:$0xff]  ;;  %v1522_v35 = vld [vmem:[#allocation2 + $0x1568] sm:$0xff] }
 0x431   :  { %v1556_v25 = vld [vmem:[#allocation2 + $0x1700] sm:$0xff] }
 0x432   :  { %4017 = vmatpush1.bf16.msra.mxu0 %v4016_v39  ;;  %4073 = vmatpush3.bf16.msra.mxu1 %v4072_v40  ;;  %v4110_v39 = vpack.c.bf16 %v1299_v37, %v1297_v36  ;;  %v1296_v40 = vld [vmem:[#allocation2 + $0x1230] sm:$0xff]  ;;  %v1524_v36 = vld [vmem:[#allocation2 + $0x1580] sm:$0xff] }
 0x433   :  { %4075 = vmatprep.subr.bf16.mxu1 %v4074_v42  ;;  %v1301_v42 = vld [vmem:[#allocation2 + $0x1268] sm:$0xff]  ;;  %v4112_v43 = vpack.c.bf16 %v1298_v41, %v1296_v40  ;;  %v1523_v40 = vld [vmem:[#allocation2 + $0x1578] sm:$0xff] }
 0x434   :  { %v4114_v44 = vpack.c.bf16 %v1303_v12, %v1301_v42  ;;  %v1526_v41 = vld [vmem:[#allocation2 + $0x1598] sm:$0xff]  ;;  %v1528_v42 = vld [vmem:[#allocation2 + $0x15b0] sm:$0xff] }
 0x435   :  { %1111 = vmatmul.mubr.f32.vlgmr.msra.gmra.mrb[4].mxu0 %v812_v47  ;;  %3314 = vmatmul.mubr.f32.vlgmr.msra.gmra.mrb[8].mxu1 %v812_v47  ;;  %v1305_v47 = vld [vmem:[#allocation2 + $0x1298] sm:$0xff] }
 0x436   :  { %4077 = vmatpush1.bf16.msra.mxu1 %v4076_v46  ;;  %v1302_v46 = vld [vmem:[#allocation2 + $0x1278] sm:$0xff] }
 0x437   :  { %4079 = vmatprep.subr.bf16.mxu1 %v4078_v48  ;;  %v1307_v48 = vld [vmem:[#allocation2 + $0x12b0] sm:$0xff]  ;;  %v4116_v49 = vpack.c.bf16 %v1302_v46, %v1300_v45  ;;  %v1527_v45 = vld [vmem:[#allocation2 + $0x15a8] sm:$0xff] }
 0x438   :  { %v4118_v50 = vpack.c.bf16 %v1307_v48, %v1305_v47  ;;  %v1530_v46 = vld [vmem:[#allocation2 + $0x15c8] sm:$0xff]  ;;  %v1532_v47 = vld [vmem:[#allocation2 + $0x15e0] sm:$0xff] }
 0x43a   :  { %4081 = vmatpush1.bf16.msra.mxu1 %v4080_v26  ;;  %v1309_v26 = vld [vmem:[#allocation2 + $0x12c8] sm:$0xff] }
 0x43b   :  { %4083 = vmatprep.subr.bf16.mxu1 %v4082_v53  ;;  %v1311_v53 = vld [vmem:[#allocation2 + $0x12e0] sm:$0xff] }
 0x43c   :  { %v4122_v55 = vpack.c.bf16 %v1311_v53, %v1309_v26  ;;  %v1536_v26 = vld [vmem:[#allocation2 + $0x1610] sm:$0xff] }
 0x43e   :  { %4085 = vmatpush1.bf16.msra.mxu1 %v4084_v58  ;;  %v1313_v58 = vld [vmem:[#allocation2 + $0x12f8] sm:$0xff] }
 0x43f   :  { %4087 = vmatprep.subr.bf16.mxu1 %v4086_v59  ;;  %v1315_v59 = vld [vmem:[#allocation2 + $0x1310] sm:$0xff] }
 0x440   :  { %v4126_v61 = vpack.c.bf16 %v1315_v59, %v1313_v58  ;;  %v1540_v58 = vld [vmem:[#allocation2 + $0x1640] sm:$0xff] }
 0x442   :  { %4089 = vmatpush1.bf16.msra.mxu1 %v4088_v0  ;;  %v1317_v0 = vld [vmem:[#allocation2 + $0x1328] sm:$0xff] }
 0x443   :  { %4091 = vmatprep.subr.bf16.mxu1 %v4090_v1  ;;  %v1319_v1 = vld [vmem:[#allocation2 + $0x1340] sm:$0xff] }
 0x444   :  { %v4130_v3 = vpack.c.bf16 %v1319_v1, %v1317_v0  ;;  %v1544_v0 = vld [vmem:[#allocation2 + $0x1670] sm:$0xff] }
 0x446   :  { %4093 = vmatpush1.bf16.msra.mxu1 %v4092_v6  ;;  %v4132_v6 = vpack.c.bf16 %v1318_v5, %v1316_v4  ;;  %v1543_v4 = vld [vmem:[#allocation2 + $0x1668] sm:$0xff] }
 0x447   :  { %4095 = vmatprep.subr.bf16.mxu1 %v4094_v7  ;;  %v1321_v7 = vld [vmem:[#allocation2 + $0x1358] sm:$0xff]  ;;  %v1546_v5 = vld [vmem:[#allocation2 + $0x1688] sm:$0xff] }
 0x448   :  { %v4134_v14 = vpack.c.bf16 %v1323_v13, %v1321_v7 }
 0x44a   :  { %4097 = vmatpush1.bf16.msra.mxu1 %v4096_v17  ;;  %v4136_v17 = vpack.c.bf16 %v1322_v16, %v1320_v15  ;;  %v1547_v15 = vld [vmem:[#allocation2 + $0x1698] sm:$0xff] }
 0x44b   :  { %4099 = vmatprep.subr.bf16.mxu1 %v4098_v18  ;;  %v1325_v18 = vld [vmem:[#allocation2 + $0x1388] sm:$0xff]  ;;  %v1550_v16 = vld [vmem:[#allocation2 + $0x16b8] sm:$0xff] }
 0x44c   :  { %v4138_v21 = vpack.c.bf16 %v1327_v19, %v1325_v18 }
 0x44e   :  { %4101 = vmatpush1.bf16.msra.mxu1 %v4100_v22  ;;  %v1514_v22 = vld [vmem:[#allocation2 + $0x1508] sm:$0xff] }
 0x44f   :  { %4103 = vmatprep.subr.bf16.mxu1 %v4102_v27  ;;  %v4170_v27 = vpack.c.bf16 %v1516_v24, %v1514_v22  ;;  %v1551_v22 = vld [vmem:[#allocation2 + $0x16c8] sm:$0xff] }
 0x450   :  { %v1554_v24 = vld [vmem:[#allocation2 + $0x16e8] sm:$0xff] }
 0x451   :  { %4171 = vmatprep.subr.bf16.mxu0 %v4170_v27  ;;  %v4210_v28 = vpack.c.bf16 %v1556_v25, %v1554_v24  ;;  %v1339_v24 = vld [vmem:[#allocation2 + $0x1430] sm:$0xff] }
 0x452   :  { %4105 = vmatpush1.bf16.msra.mxu1 %v4104_v30  ;;  %v1520_v30 = vld [vmem:[#allocation2 + $0x1550] sm:$0xff]  ;;  %4173 = vmatpush1.bf16.msra.mxu0 %v4172_v31  ;;  %v1558_v31 = vld [vmem:[#allocation2 + $0x1718] sm:$0xff] }
 0x453   :  { %4107 = vmatprep.subr.bf16.mxu1 %v4106_v34  ;;  %v4174_v32 = vpack.c.bf16 %v1520_v30, %v1518_v29  ;;  %v1519_v34 = vld [vmem:[#allocation2 + $0x1548] sm:$0xff]  ;;  %v1553_v29 = vld [vmem:[#allocation2 + $0x16e0] sm:$0xff]  ;;  %v1555_v30 = vld [vmem:[#allocation2 + $0x16f8] sm:$0xff] }
 0x454   :  { %v4176_v37 = vpack.c.bf16 %v1519_v34, %v1517_v33  ;;  %v4212_v33 = vpack.c.bf16 %v1555_v30, %v1553_v29  ;;  %v1338_v29 = vld [vmem:[#allocation2 + $0x1428] sm:$0xff] }
 0x455   :  { %4175 = vmatprep.subr.bf16.mxu0 %v4174_v32  ;;  %v1560_v32 = vld [vmem:[#allocation2 + $0x1730] sm:$0xff]  ;;  %v1341_v30 = vld [vmem:[#allocation2 + $0x1448] sm:$0xff] }
 0x456   :  { %4109 = vmatpush1.bf16.msra.mxu1 %v4108_v38  ;;  %v4178_v38 = vpack.c.bf16 %v1524_v36, %v1522_v35  ;;  %4177 = vmatpush1.bf16.msra.mxu0 %v4176_v37  ;;  %v4214_v34 = vpack.c.bf16 %v1560_v32, %v1558_v31  ;;  %v1557_v35 = vld [vmem:[#allocation2 + $0x1710] sm:$0xff]  ;;  %v1559_v36 = vld [vmem:[#allocation2 + $0x1728] sm:$0xff]  ;;  %v1343_v31 = vld [vmem:[#allocation2 + $0x1460] sm:$0xff] }
 0x457   :  { %4111 = vmatprep.subr.bf16.mxu1 %v4110_v39  ;;  %v1521_v39 = vld [vmem:[#allocation2 + $0x1560] sm:$0xff]  ;;  %v1562_v37 = vld [vmem:[#allocation2 + $0x1748] sm:$0xff] }
 0x458   :  { %v4180_v12 = vpack.c.bf16 %v1523_v40, %v1521_v39  ;;  %4179 = vmatprep.subr.bf16.mxu0 %v4178_v38  ;;  %v1564_v38 = vld [vmem:[#allocation2 + $0x1760] sm:$0xff]  ;;  %v4216_v39 = vpack.c.bf16 %v1559_v36, %v1557_v35  ;;  %v1342_v35 = vld [vmem:[#allocation2 + $0x1458] sm:$0xff] }
 0x459   :  { %v4218_v40 = vpack.c.bf16 %v1564_v38, %v1562_v37  ;;  %v1345_v36 = vld [vmem:[#allocation2 + $0x1478] sm:$0xff]  ;;  %v1347_v37 = vld [vmem:[#allocation2 + $0x1490] sm:$0xff] }
 0x45a   :  { %4113 = vmatpush1.bf16.msra.mxu1 %v4112_v43  ;;  %v4182_v43 = vpack.c.bf16 %v1528_v42, %v1526_v41  ;;  %4181 = vmatpush1.bf16.msra.mxu0 %v4180_v12  ;;  %v1561_v41 = vld [vmem:[#allocation2 + $0x1740] sm:$0xff]  ;;  %v1563_v42 = vld [vmem:[#allocation2 + $0x1758] sm:$0xff] }
 0x45b   :  { %4115 = vmatprep.subr.bf16.mxu1 %v4114_v44  ;;  %v1525_v44 = vld [vmem:[#allocation2 + $0x1590] sm:$0xff]  ;;  %v1566_v12 = vld [vmem:[#allocation2 + $0x1778] sm:$0xff] }
 0x45c   :  { %v4184_v48 = vpack.c.bf16 %v1527_v45, %v1525_v44  ;;  %4183 = vmatprep.subr.bf16.mxu0 %v4182_v43  ;;  %v1568_v43 = vld [vmem:[#allocation2 + $0x1790] sm:$0xff]  ;;  %v4220_v44 = vpack.c.bf16 %v1563_v42, %v1561_v41  ;;  %v1346_v41 = vld [vmem:[#allocation2 + $0x1488] sm:$0xff] }
 0x45d   :  { %v4222_v45 = vpack.c.bf16 %v1568_v43, %v1566_v12  ;;  %v1349_v42 = vld [vmem:[#allocation2 + $0x14a8] sm:$0xff]  ;;  %v1351_v12 = vld [vmem:[#allocation2 + $0x14c0] sm:$0xff] }
 0x45e   :  { %4117 = vmatpush1.bf16.msra.mxu1 %v4116_v49  ;;  %v4186_v49 = vpack.c.bf16 %v1532_v47, %v1530_v46  ;;  %4185 = vmatpush1.bf16.msra.mxu0 %v4184_v48  ;;  %v1565_v46 = vld [vmem:[#allocation2 + $0x1770] sm:$0xff]  ;;  %v1567_v47 = vld [vmem:[#allocation2 + $0x1788] sm:$0xff] }
 0x45f   :  { %4119 = vmatprep.subr.bf16.mxu1 %v4118_v50  ;;  %v1529_v50 = vld [vmem:[#allocation2 + $0x15c0] sm:$0xff]  ;;  %v1570_v48 = vld [vmem:[#allocation2 + $0x17a8] sm:$0xff] }
 0x460   :  { %v4188_v53 = vpack.c.bf16 %v1531_v51, %v1529_v50  ;;  %4187 = vmatprep.subr.bf16.mxu0 %v4186_v49  ;;  %v1572_v49 = vld [vmem:[#allocation2 + $0x17c0] sm:$0xff]  ;;  %v4224_v50 = vpack.c.bf16 %v1567_v47, %v1565_v46  ;;  %v1350_v46 = vld [vmem:[#allocation2 + $0x14b8] sm:$0xff] }
 0x461   :  { %v4226_v51 = vpack.c.bf16 %v1572_v49, %v1570_v48  ;;  %v1353_v47 = vld [vmem:[#allocation2 + $0x14d8] sm:$0xff]  ;;  %v1355_v48 = vld [vmem:[#allocation2 + $0x14f0] sm:$0xff] }
 0x462   :  { %4121 = vmatpush1.bf16.msra.mxu1 %v4120_v54  ;;  %v4190_v54 = vpack.c.bf16 %v1536_v26, %v1534_v52  ;;  %4189 = vmatpush1.bf16.msra.mxu0 %v4188_v53 }
 0x463   :  { %4123 = vmatprep.subr.bf16.mxu1 %v4122_v55  ;;  %v1533_v55 = vld [vmem:[#allocation2 + $0x15f0] sm:$0xff] }
 0x464   :  { %v4192_v59 = vpack.c.bf16 %v1535_v56, %v1533_v55  ;;  %4191 = vmatprep.subr.bf16.mxu0 %v4190_v54  ;;  %v958_v54 = vld [vmem:[#allocation7 + $0x60] ss:$8 sm:$0x7] }
 0x465   :  { %v971_v55 = vrot.slane %v958_v54, %v664_v20  ;;  %v963_v56 = vrot.slane %v958_v54, %v4877_v9 }
 0x466   :  { %4125 = vmatpush1.bf16.msra.mxu1 %v4124_v60  ;;  %v4194_v60 = vpack.c.bf16 %v1540_v58, %v1538_v57  ;;  %4193 = vmatpush1.bf16.msra.mxu0 %v4192_v59  ;;  %v967_v57 = vrot.slane %v958_v54, %v4880_v11  ;;  %v1569_v54 = vld [vmem:[#allocation2 + $0x17a0] sm:$0xff] }
 0x467   :  { %4127 = vmatprep.subr.bf16.mxu1 %v4126_v61  ;;  %v1537_v61 = vld [vmem:[#allocation2 + $0x1620] sm:$0xff] }
 0x468   :  { %v4196_v1 = vpack.c.bf16 %v1539_v62, %v1537_v61  ;;  %4195 = vmatprep.subr.bf16.mxu0 %v4194_v60 }
 0x46a   :  { %4129 = vmatpush1.bf16.msra.mxu1 %v4128_v2  ;;  %v4198_v2 = vpack.c.bf16 %v1544_v0, %v1542_v63  ;;  %4197 = vmatpush1.bf16.msra.mxu0 %v4196_v1  ;;  %v1324_v1 = vld [vmem:[#allocation2 + $0x1380] sm:$0xff] }
 0x46b   :  { %4131 = vmatprep.subr.bf16.mxu1 %v4130_v3  ;;  %v1541_v3 = vld [vmem:[#allocation2 + $0x1650] sm:$0xff] }
 0x46c   :  { %v4200_v7 = vpack.c.bf16 %v1543_v4, %v1541_v3  ;;  %4199 = vmatprep.subr.bf16.mxu0 %v4198_v2  ;;  %v1326_v2 = vld [vmem:[#allocation2 + $0x1398] sm:$0xff] }
 0x46d   :  { %v1329_v4 = vld [vmem:[#allocation2 + $0x13b8] sm:$0xff]  ;;  %v4140_v8 = vpack.c.bf16 %v1326_v2, %v1324_v1  ;;  %v1666_v1 = vld [vmem:[#allocation2 + $0x1820] sm:$0xff] }
 0x46e   :  { %4133 = vmatpush1.bf16.msra.mxu1 %v4132_v6  ;;  %v1548_v6 = vld [vmem:[#allocation2 + $0x16a0] sm:$0xff]  ;;  %4201 = vmatpush1.bf16.msra.mxu0 %v4200_v7 }
 0x46f   :  { %4135 = vmatprep.subr.bf16.mxu1 %v4134_v14  ;;  %v4202_v13 = vpack.c.bf16 %v1548_v6, %v1546_v5  ;;  %v1545_v14 = vld [vmem:[#allocation2 + $0x1680] sm:$0xff]  ;;  %v1331_v5 = vld [vmem:[#allocation2 + $0x13d0] sm:$0xff] }
 0x470   :  { %v4204_v18 = vpack.c.bf16 %v1547_v15, %v1545_v14  ;;  %v4142_v7 = vpack.c.bf16 %v1331_v5, %v1329_v4  ;;  %v1330_v14 = vld [vmem:[#allocation2 + $0x13c8] sm:$0xff] }
 0x471   :  { %4203 = vmatprep.subr.bf16.mxu0 %v4202_v13  ;;  %v1328_v13 = vld [vmem:[#allocation2 + $0x13b0] sm:$0xff]  ;;  %v1333_v15 = vld [vmem:[#allocation2 + $0x13e8] sm:$0xff] }
 0x472   :  { %4137 = vmatpush1.bf16.msra.mxu1 %v4136_v17  ;;  %v1552_v17 = vld [vmem:[#allocation2 + $0x16d0] sm:$0xff]  ;;  %4205 = vmatpush1.bf16.msra.mxu0 %v4204_v18 }
 0x473   :  { %4139 = vmatprep.subr.bf16.mxu1 %v4138_v21  ;;  %v4206_v19 = vpack.c.bf16 %v1552_v17, %v1550_v16  ;;  %v1549_v21 = vld [vmem:[#allocation2 + $0x16b0] sm:$0xff]  ;;  %v1335_v16 = vld [vmem:[#allocation2 + $0x1400] sm:$0xff]  ;;  %v4144_v17 = vpack.c.bf16 %v1330_v14, %v1328_v13  ;;  %v1668_v14 = vld [vmem:[#allocation2 + $0x1838] sm:$0xff] }
 0x474   :  { %v4208_v27 = vpack.c.bf16 %v1551_v22, %v1549_v21  ;;  %v4146_v18 = vpack.c.bf16 %v1335_v16, %v1333_v15  ;;  %v1334_v21 = vld [vmem:[#allocation2 + $0x13f8] sm:$0xff]  ;;  %v1670_v15 = vld [vmem:[#allocation2 + $0x1850] sm:$0xff] }
 0x475   :  { %4207 = vmatprep.subr.bf16.mxu0 %v4206_v19  ;;  %v1332_v19 = vld [vmem:[#allocation2 + $0x13e0] sm:$0xff]  ;;  %v1337_v22 = vld [vmem:[#allocation2 + $0x1418] sm:$0xff] }
 0x476   :  { %4209 = vmatpush1.bf16.msra.mxu0 %v4208_v27  ;;  %v4148_v25 = vpack.c.bf16 %v1334_v21, %v1332_v19  ;;  %v4150_v27 = vpack.c.bf16 %v1339_v24, %v1337_v22  ;;  %v4238_v19 = vpack.c.bf16 %v1670_v15, %v1668_v14  ;;  %v1667_v21 = vld [vmem:[#allocation2 + $0x1830] sm:$0xff]  ;;  %v1669_v22 = vld [vmem:[#allocation2 + $0x1848] sm:$0xff]  ;;  %v1703_v14 = vld [vmem:[#allocation2 + $0x19e0] sm:$0xff] }
 0x477   :  { %4211 = vmatprep.subr.bf16.mxu0 %v4210_v28  ;;  %v1336_v28 = vld [vmem:[#allocation2 + $0x1410] sm:$0xff]  ;;  %v1672_v24 = vld [vmem:[#allocation2 + $0x1868] sm:$0xff]  ;;  %v1705_v15 = vld [vmem:[#allocation2 + $0x19f8] sm:$0xff] }
 0x478   :  { %v4152_v32 = vpack.c.bf16 %v1338_v29, %v1336_v28  ;;  %v1671_v29 = vld [vmem:[#allocation2 + $0x1860] sm:$0xff] }
 0x47a   :  { %4213 = vmatpush1.bf16.msra.mxu0 %v4212_v33  ;;  %v4154_v33 = vpack.c.bf16 %v1343_v31, %v1341_v30  ;;  %v1673_v30 = vld [vmem:[#allocation2 + $0x1878] sm:$0xff] }
 0x47b   :  { %4215 = vmatprep.subr.bf16.mxu0 %v4214_v34  ;;  %v1340_v34 = vld [vmem:[#allocation2 + $0x1440] sm:$0xff]  ;;  %v1676_v31 = vld [vmem:[#allocation2 + $0x1898] sm:$0xff] }
 0x47c   :  { %v4156_v38 = vpack.c.bf16 %v1342_v35, %v1340_v34  ;;  %v1675_v35 = vld [vmem:[#allocation2 + $0x1890] sm:$0xff] }
 0x47e   :  { %4217 = vmatpush1.bf16.msra.mxu0 %v4216_v39  ;;  %v4158_v39 = vpack.c.bf16 %v1347_v37, %v1345_v36  ;;  %v1677_v36 = vld [vmem:[#allocation2 + $0x18a8] sm:$0xff] }
 0x47f   :  { %4219 = vmatprep.subr.bf16.mxu0 %v4218_v40  ;;  %v1344_v40 = vld [vmem:[#allocation2 + $0x1470] sm:$0xff]  ;;  %v1680_v37 = vld [vmem:[#allocation2 + $0x18c8] sm:$0xff] }
 0x480   :  { %v4160_v43 = vpack.c.bf16 %v1346_v41, %v1344_v40  ;;  %v1679_v41 = vld [vmem:[#allocation2 + $0x18c0] sm:$0xff] }
 0x482   :  { %4221 = vmatpush1.bf16.msra.mxu0 %v4220_v44  ;;  %v4162_v44 = vpack.c.bf16 %v1351_v12, %v1349_v42  ;;  %v1681_v42 = vld [vmem:[#allocation2 + $0x18d8] sm:$0xff] }
 0x483   :  { %4223 = vmatprep.subr.bf16.mxu0 %v4222_v45  ;;  %v1348_v45 = vld [vmem:[#allocation2 + $0x14a0] sm:$0xff]  ;;  %v1684_v12 = vld [vmem:[#allocation2 + $0x18f8] sm:$0xff] }
 0x484   :  { %v4164_v49 = vpack.c.bf16 %v1350_v46, %v1348_v45  ;;  %v1683_v46 = vld [vmem:[#allocation2 + $0x18f0] sm:$0xff] }
 0x486   :  { %4225 = vmatpush1.bf16.msra.mxu0 %v4224_v50  ;;  %v4166_v50 = vpack.c.bf16 %v1355_v48, %v1353_v47  ;;  %v1685_v47 = vld [vmem:[#allocation2 + $0x1908] sm:$0xff] }
 0x487   :  { %4227 = vmatprep.subr.bf16.mxu0 %v4226_v51  ;;  %v1352_v51 = vld [vmem:[#allocation2 + $0x14d0] sm:$0xff]  ;;  %v1688_v48 = vld [vmem:[#allocation2 + $0x1928] sm:$0xff] }
 0x4e8   :  { %v3056_v52 = vpop.f32.mrb[6].mxu1 }
 0x4e9   :  { %v3057_v26 = vpop.f32.mrb[7].mxu1 }
 0x4ea   :  { %v3058_v53 = vadd.f32 %v3057_v26, %v3056_v52  ;;  %v1354_v52 = vld [vmem:[#allocation2 + $0x14e8] sm:$0xff] }
 0x4eb   :  { %v4168_v26 = vpack.c.bf16 %v1354_v52, %v1352_v51  ;;  %v1687_v52 = vld [vmem:[#allocation2 + $0x1920] sm:$0xff] }
 0x4ec   :  { %v1184_v58 = vadd.f32 %v3058_v53, %v971_v55  ;;  %v1571_v55 = vld [vmem:[#allocation2 + $0x17b8] sm:$0xff] }
 0x508   :  { %v1112_v59 = vpop.f32.mrb[4].mxu0  ;;  %v1253_v60 = vpop.f32.mrb[8].mxu1 }
 0x509   :  { %v4636_v61 = vadd.f32 %v1112_v59, %v963_v56  ;;  %v4915_v62 = vadd.f32 %v1253_v60, %v1184_v58  ;;  %v1114_v63 = vpop.f32.mrb[5].mxu0  ;;  %v3315_v0 = vpop.f32.mrb[9].mxu1  ;;  %v4228_v56 = vpack.c.bf16 %v1571_v55, %v1569_v54  ;;  %v1576_v58 = vld [vmem:[#allocation2 + $0x17f0] sm:$0xff] }
 0x50a   :  { %v4637_v3 = vadd.f32 %v1114_v63, %v967_v57  ;;  %v1574_v57 = vld [vmem:[#allocation2 + $0x17d8] sm:$0xff]  ;;  %v1573_v60 = vld [vmem:[#allocation2 + $0x17d0] sm:$0xff]  ;;  %v1664_v0 = vld [vmem:[#allocation2 + $0x1808] sm:$0xff] }
 0x50b   :  { %v1257_v20 = vmax.f32 %v4636_v61, 0.0  ;;  %v1259_v53 = vmax.f32 %v4915_v62, 0.0  ;;  %4229 = vmatpush1.bf16.msra.mxu0 %v4228_v56  ;;  %v4230_v59 = vpack.c.bf16 %v1576_v58, %v1574_v57  ;;  %v1575_v61 = vld [vmem:[#allocation2 + $0x17e8] sm:$0xff]  ;;  %v4234_v2 = vpack.c.bf16 %v1666_v1, %v1664_v0  ;;  %v1694_v54 = vld [vmem:[#allocation2 + $0x1970] sm:$0xff]  ;;  %v1695_v0 = vld [vmem:[#allocation2 + $0x1980] sm:$0xff] }
 0x50c   :  { %v1258_v6 = vmax.f32 %v4637_v3, 0.0  ;;  %v4232_v63 = vpack.c.bf16 %v1575_v61, %v1573_v60  ;;  %v1357_v3 = vld [vmem:[#allocation7 + $0x78] ss:$8 sm:$0x3]  ;;  %v1691_v57 = vld [vmem:[#allocation2 + $0x1950] sm:$0xff]  ;;  %v1693_v58 = vld [vmem:[#allocation2 + $0x1968] sm:$0xff] }
 0x50d   :  { %4231 = vmatprep.subr.bf16.mxu0 %v4230_v59  ;;  %v1362_v62 = vrot.slane %v1357_v3, %v4877_v9  ;;  %v1366_v4 = vrot.slane %v1357_v3, %v4880_v11  ;;  %v1696_v59 = vld [vmem:[#allocation2 + $0x1988] sm:$0xff]  ;;  %v1698_v60 = vld [vmem:[#allocation2 + $0x19a0] sm:$0xff]  ;;  %v4264_v61 = vpack.c.bf16 %v1693_v58, %v1691_v57  ;;  %v1697_v1 = vld [vmem:[#allocation2 + $0x1998] sm:$0xff] }
 0x50e   :  { %1433 = vmatprep.mubr.f32.mxu1 %v1258_v6  ;;  %v1702_v3 = vld [vmem:[#allocation2 + $0x19d0] sm:$0xff]  ;;  %v1819_v58 = vld [vmem:[#allocation2 + $0x1b48] sm:$0xff] }
 0x50f   :  { %1434 = vmatmul.mubr.f32.vlgmr.msra.gmra.mrb[10].mxu1 %v1257_v20  ;;  %4233 = vmatpush1.bf16.msra.mxu0 %v4232_v63  ;;  %v1663_v20 = vld [vmem:[#allocation2 + $0x1800] sm:$0xff]  ;;  %v4266_v63 = vpack.c.bf16 %v1698_v60, %v1696_v59  ;;  %v1817_v57 = vld [vmem:[#allocation2 + $0x1b30] sm:$0xff]  ;;  %v1822_v59 = vld [vmem:[#allocation2 + $0x1b68] sm:$0xff] }
 0x510   :  { %4141 = vmatpush1.bf16.msra.mxu1 %v4140_v8  ;;  %1504 = vmatprep.mubr.f32.mxu1 %v4759_v23  ;;  %v1824_v60 = vld [vmem:[#allocation2 + $0x1b80] sm:$0xff] }
 0x511   :  { %4143 = vmatprep.subr.bf16.mxu1 %v4142_v7  ;;  %4235 = vmatprep.subr.bf16.mxu0 %v4234_v2  ;;  %v1665_v7 = vld [vmem:[#allocation2 + $0x1818] sm:$0xff] }
 0x512   :  { %v1700_v2 = vld [vmem:[#allocation2 + $0x19b8] sm:$0xff] }
 0x514   :  { %4145 = vmatpush1.bf16.msra.mxu1 %v4144_v17  ;;  %v4236_v17 = vpack.c.bf16 %v1665_v7, %v1663_v20  ;;  %v1706_v20 = vld [vmem:[#allocation2 + $0x1a00] sm:$0xff] }
 0x515   :  { %4147 = vmatprep.subr.bf16.mxu1 %v4146_v18 }
 0x518   :  { %4149 = vmatpush1.bf16.msra.mxu1 %v4148_v25  ;;  %v1674_v25 = vld [vmem:[#allocation2 + $0x1880] sm:$0xff] }
 0x519   :  { %4151 = vmatprep.subr.bf16.mxu1 %v4150_v27  ;;  %v4240_v27 = vpack.c.bf16 %v1669_v22, %v1667_v21  ;;  %v4242_v28 = vpack.c.bf16 %v1674_v25, %v1672_v24  ;;  %v1707_v21 = vld [vmem:[#allocation2 + $0x1a10] sm:$0xff]  ;;  %v1709_v22 = vld [vmem:[#allocation2 + $0x1a28] sm:$0xff]  ;;  %v1714_v25 = vld [vmem:[#allocation2 + $0x1a60] sm:$0xff] }
 0x51a   :  { %v1712_v24 = vld [vmem:[#allocation2 + $0x1a48] sm:$0xff] }
 0x51c   :  { %4153 = vmatpush1.bf16.msra.mxu1 %v4152_v32  ;;  %v1678_v32 = vld [vmem:[#allocation2 + $0x18b0] sm:$0xff] }
 0x51d   :  { %4155 = vmatprep.subr.bf16.mxu1 %v4154_v33  ;;  %v4244_v33 = vpack.c.bf16 %v1673_v30, %v1671_v29  ;;  %v4246_v34 = vpack.c.bf16 %v1678_v32, %v1676_v31  ;;  %v1711_v29 = vld [vmem:[#allocation2 + $0x1a40] sm:$0xff]  ;;  %v1713_v30 = vld [vmem:[#allocation2 + $0x1a58] sm:$0xff]  ;;  %v1718_v32 = vld [vmem:[#allocation2 + $0x1a90] sm:$0xff] }
 0x51e   :  { %v1716_v31 = vld [vmem:[#allocation2 + $0x1a78] sm:$0xff] }
 0x520   :  { %4157 = vmatpush1.bf16.msra.mxu1 %v4156_v38  ;;  %v1682_v38 = vld [vmem:[#allocation2 + $0x18e0] sm:$0xff] }
 0x521   :  { %4159 = vmatprep.subr.bf16.mxu1 %v4158_v39  ;;  %v4248_v39 = vpack.c.bf16 %v1677_v36, %v1675_v35  ;;  %v4250_v40 = vpack.c.bf16 %v1682_v38, %v1680_v37  ;;  %v1715_v35 = vld [vmem:[#allocation2 + $0x1a70] sm:$0xff]  ;;  %v1717_v36 = vld [vmem:[#allocation2 + $0x1a88] sm:$0xff]  ;;  %v1722_v38 = vld [vmem:[#allocation2 + $0x1ac0] sm:$0xff] }
 0x522   :  { %v1720_v37 = vld [vmem:[#allocation2 + $0x1aa8] sm:$0xff] }
 0x524   :  { %4161 = vmatpush1.bf16.msra.mxu1 %v4160_v43  ;;  %v1686_v43 = vld [vmem:[#allocation2 + $0x1910] sm:$0xff] }
 0x525   :  { %4163 = vmatprep.subr.bf16.mxu1 %v4162_v44  ;;  %v4252_v44 = vpack.c.bf16 %v1681_v42, %v1679_v41  ;;  %v4254_v45 = vpack.c.bf16 %v1686_v43, %v1684_v12  ;;  %v1719_v41 = vld [vmem:[#allocation2 + $0x1aa0] sm:$0xff]  ;;  %v1721_v42 = vld [vmem:[#allocation2 + $0x1ab8] sm:$0xff] }
 0x526   :  { %v4292_v12 = vpack.c.bf16 %v1721_v42, %v1719_v41  ;;  %v1724_v43 = vld [vmem:[#allocation2 + $0x1ad8] sm:$0xff]  ;;  %v1845_v41 = vld [vmem:[#allocation2 + $0x1c80] sm:$0xff] }
 0x527   :  { %v1847_v42 = vld [vmem:[#allocation2 + $0x1c98] sm:$0xff] }
 0x528   :  { %4165 = vmatpush1.bf16.msra.mxu1 %v4164_v49  ;;  %v1690_v49 = vld [vmem:[#allocation2 + $0x1940] sm:$0xff] }
 0x529   :  { %4167 = vmatprep.subr.bf16.mxu1 %v4166_v50  ;;  %v4256_v50 = vpack.c.bf16 %v1685_v47, %v1683_v46  ;;  %v4258_v51 = vpack.c.bf16 %v1690_v49, %v1688_v48  ;;  %v1723_v46 = vld [vmem:[#allocation2 + $0x1ad0] sm:$0xff]  ;;  %v1725_v47 = vld [vmem:[#allocation2 + $0x1ae8] sm:$0xff] }
 0x52a   :  { %v4296_v48 = vpack.c.bf16 %v1725_v47, %v1723_v46  ;;  %v1814_v49 = vld [vmem:[#allocation2 + $0x1b08] sm:$0xff]  ;;  %v1849_v46 = vld [vmem:[#allocation2 + $0x1cb0] sm:$0xff] }
 0x52b   :  { %v1851_v47 = vld [vmem:[#allocation2 + $0x1cc8] sm:$0xff] }
 0x52c   :  { %4169 = vmatpush1.bf16.msra.mxu1 %v4168_v26  ;;  %v1689_v26 = vld [vmem:[#allocation2 + $0x1938] sm:$0xff] }
 0x52d   :  { %v4260_v55 = vpack.c.bf16 %v1689_v26, %v1687_v52  ;;  %v1815_v26 = vld [vmem:[#allocation2 + $0x1b18] sm:$0xff] }
 0x52f   :  { %1505 = vmatmul.mubr.f32.vlgmr.msra.gmra.mrb[10].mxu1 %v1259_v53  ;;  %v1692_v53 = vld [vmem:[#allocation2 + $0x1958] sm:$0xff] }
 0x530   :  { %v4262_v56 = vpack.c.bf16 %v1694_v54, %v1692_v53  ;;  %v1818_v53 = vld [vmem:[#allocation2 + $0x1b38] sm:$0xff]  ;;  %v1820_v54 = vld [vmem:[#allocation2 + $0x1b50] sm:$0xff] }
 0x602   :  { %v1506_v5 = vpop.f32.mrb[10].mxu1 }
 0x603   :  { %v4638_v6 = vadd.f32 %v1506_v5, %v1362_v62  ;;  %v1508_v8 = vpop.f32.mrb[11].mxu1  ;;  %v4268_v62 = vpack.c.bf16 %v1697_v1, %v1695_v0  ;;  %v1699_v5 = vld [vmem:[#allocation2 + $0x19b0] sm:$0xff]  ;;  %v1821_v0 = vld [vmem:[#allocation2 + $0x1b60] sm:$0xff]  ;;  %v1823_v1 = vld [vmem:[#allocation2 + $0x1b78] sm:$0xff] }
 0x604   :  { %v4639_v13 = vadd.f32 %v1508_v8, %v1366_v4  ;;  %v4270_v4 = vpack.c.bf16 %v1702_v3, %v1700_v2  ;;  %v1704_v8 = vld [vmem:[#allocation2 + $0x19e8] sm:$0xff]  ;;  %v1826_v2 = vld [vmem:[#allocation2 + $0x1b98] sm:$0xff]  ;;  %v1828_v3 = vld [vmem:[#allocation2 + $0x1bb0] sm:$0xff] }
 0x605   :  { %v1511_v18 = vmax.f32 %v4638_v6, 0.0  ;;  %v1701_v6 = vld [vmem:[#allocation2 + $0x19c8] sm:$0xff] }
 0x606   :  { %v1512_v16 = vmax.f32 %v4639_v13, 0.0  ;;  %v4272_v7 = vpack.c.bf16 %v1701_v6, %v1699_v5  ;;  %v4274_v13 = vpack.c.bf16 %v1706_v20, %v1704_v8  ;;  %v1825_v5 = vld [vmem:[#allocation2 + $0x1b90] sm:$0xff]  ;;  %v1827_v6 = vld [vmem:[#allocation2 + $0x1ba8] sm:$0xff]  ;;  %v1832_v20 = vld [vmem:[#allocation2 + $0x1be0] sm:$0xff] }
 0x607   :  { %v1830_v8 = vld [vmem:[#allocation2 + $0x1bc8] sm:$0xff] }
 0x608   :  { %1654 = vmatprep.mubr.f32.mxu0 %v1512_v16  ;;  %v1708_v16 = vld [vmem:[#allocation2 + $0x1a18] sm:$0xff] }
 0x609   :  { %1655 = vmatmul.mubr.f32.vlgmr.msra.gmra.mrb[6].mxu0 %v1511_v18  ;;  %v4276_v18 = vpack.c.bf16 %v1705_v15, %v1703_v14  ;;  %v1829_v14 = vld [vmem:[#allocation2 + $0x1bc0] sm:$0xff]  ;;  %v1831_v15 = vld [vmem:[#allocation2 + $0x1bd8] sm:$0xff] }
 0x60a   :  { %4237 = vmatpush1.bf16.msra.mxu0 %v4236_v17  ;;  %v1710_v17 = vld [vmem:[#allocation2 + $0x1a30] sm:$0xff] }
 0x60b   :  { %4239 = vmatprep.subr.bf16.mxu0 %v4238_v19  ;;  %v4278_v19 = vpack.c.bf16 %v1710_v17, %v1708_v16  ;;  %v1834_v16 = vld [vmem:[#allocation2 + $0x1bf8] sm:$0xff]  ;;  %v1836_v17 = vld [vmem:[#allocation2 + $0x1c10] sm:$0xff] }
 0x60e   :  { %4241 = vmatpush1.bf16.msra.mxu0 %v4240_v27  ;;  %v4280_v27 = vpack.c.bf16 %v1709_v22, %v1707_v21  ;;  %v1833_v21 = vld [vmem:[#allocation2 + $0x1bf0] sm:$0xff]  ;;  %v1835_v22 = vld [vmem:[#allocation2 + $0x1c08] sm:$0xff] }
 0x60f   :  { %4243 = vmatprep.subr.bf16.mxu0 %v4242_v28  ;;  %v4282_v28 = vpack.c.bf16 %v1714_v25, %v1712_v24  ;;  %v1838_v24 = vld [vmem:[#allocation2 + $0x1c28] sm:$0xff]  ;;  %v1840_v25 = vld [vmem:[#allocation2 + $0x1c40] sm:$0xff] }
 0x612   :  { %4245 = vmatpush1.bf16.msra.mxu0 %v4244_v33  ;;  %v4284_v33 = vpack.c.bf16 %v1713_v30, %v1711_v29  ;;  %v1837_v29 = vld [vmem:[#allocation2 + $0x1c20] sm:$0xff]  ;;  %v1839_v30 = vld [vmem:[#allocation2 + $0x1c38] sm:$0xff] }
 0x613   :  { %4247 = vmatprep.subr.bf16.mxu0 %v4246_v34  ;;  %v4286_v34 = vpack.c.bf16 %v1718_v32, %v1716_v31  ;;  %v1842_v31 = vld [vmem:[#allocation2 + $0x1c58] sm:$0xff]  ;;  %v1844_v32 = vld [vmem:[#allocation2 + $0x1c70] sm:$0xff] }
 0x616   :  { %4249 = vmatpush1.bf16.msra.mxu0 %v4248_v39  ;;  %v4288_v39 = vpack.c.bf16 %v1717_v36, %v1715_v35  ;;  %v1841_v35 = vld [vmem:[#allocation2 + $0x1c50] sm:$0xff]  ;;  %v1843_v36 = vld [vmem:[#allocation2 + $0x1c68] sm:$0xff] }
 0x617   :  { %4251 = vmatprep.subr.bf16.mxu0 %v4250_v40  ;;  %v4290_v40 = vpack.c.bf16 %v1722_v38, %v1720_v37  ;;  %v1846_v37 = vld [vmem:[#allocation2 + $0x1c88] sm:$0xff]  ;;  %v1848_v38 = vld [vmem:[#allocation2 + $0x1ca0] sm:$0xff] }
 0x61a   :  { %4253 = vmatpush1.bf16.msra.mxu0 %v4252_v44  ;;  %v1726_v44 = vld [vmem:[#allocation2 + $0x1af0] sm:$0xff] }
 0x61b   :  { %4255 = vmatprep.subr.bf16.mxu0 %v4254_v45  ;;  %v4294_v45 = vpack.c.bf16 %v1726_v44, %v1724_v43  ;;  %v1852_v43 = vld [vmem:[#allocation2 + $0x1cd0] sm:$0xff]  ;;  %v4332_v44 = vpack.c.bf16 %v1847_v42, %v1845_v41  ;;  %v1972_v41 = vld [vmem:[#allocation4 + $0x40] sm:$0xff]  ;;  %v1973_v42 = vld [vmem:[#allocation4 + $0x48] sm:$0xff] }
 0x61e   :  { %4257 = vmatpush1.bf16.msra.mxu0 %v4256_v50  ;;  %v1816_v50 = vld [vmem:[#allocation2 + $0x1b20] sm:$0xff] }
 0x61f   :  { %4259 = vmatprep.subr.bf16.mxu0 %v4258_v51  ;;  %v1813_v51 = vld [vmem:[#allocation2 + $0x1b00] sm:$0xff]  ;;  %v4298_v52 = vpack.c.bf16 %v1816_v50, %v1814_v49  ;;  %v4336_v50 = vpack.c.bf16 %v1851_v47, %v1849_v46  ;;  %v1977_v47 = vld [vmem:[#allocation4 + $0x68] sm:$0xff] }
 0x620   :  { %v1856_v49 = vld [vmem:[#allocation2 + $0x1d00] sm:$0xff] }
 0x621   :  { %4299 = vmatprep.subr.bf16.mxu1 %v4298_v52  ;;  %v1853_v52 = vld [vmem:[#allocation2 + $0x1ce0] sm:$0xff] }
 0x622   :  { %4261 = vmatpush1.bf16.msra.mxu0 %v4260_v55  ;;  %v4300_v55 = vpack.c.bf16 %v1815_v26, %v1813_v51  ;;  %v1855_v26 = vld [vmem:[#allocation2 + $0x1cf8] sm:$0xff]  ;;  %v1976_v46 = vld [vmem:[#allocation4 + $0x60] sm:$0xff] }
 0x623   :  { %4263 = vmatprep.subr.bf16.mxu0 %v4262_v56  ;;  %v4302_v56 = vpack.c.bf16 %v1820_v54, %v1818_v53  ;;  %v1858_v53 = vld [vmem:[#allocation2 + $0x1d18] sm:$0xff]  ;;  %v1860_v54 = vld [vmem:[#allocation2 + $0x1d30] sm:$0xff] }
 0x624   :  { %4301 = vmatpush1.bf16.msra.mxu1 %v4300_v55  ;;  %v4340_v55 = vpack.c.bf16 %v1855_v26, %v1853_v52  ;;  %v1963_v52 = vld [vmem:[%s5044_s1] sm:$0xff]  ;;  %v1874_v26 = vld [vmem:[#allocation2 + $0x1dd8] sm:$0xff] }
 0x625   :  { %4303 = vmatprep.subr.bf16.mxu1 %v4302_v56  ;;  %v4342_v56 = vpack.c.bf16 %v1860_v54, %v1858_v53  ;;  %v1876_v53 = vld [vmem:[#allocation2 + $0x1df0] sm:$0xff] }
 0x626   :  { %4265 = vmatpush1.bf16.msra.mxu0 %v4264_v61  ;;  %v4304_v61 = vpack.c.bf16 %v1819_v58, %v1817_v57  ;;  %v1857_v57 = vld [vmem:[#allocation2 + $0x1d10] sm:$0xff]  ;;  %v1859_v58 = vld [vmem:[#allocation2 + $0x1d28] sm:$0xff]  ;;  %v4358_v54 = vpack.c.bf16 %v1876_v53, %v1874_v26  ;;  %v2151_v26 = vld [vmem:[#allocation4 + $0x158] sm:$0xff] }
 0x627   :  { %4267 = vmatprep.subr.bf16.mxu0 %v4266_v63  ;;  %v4306_v63 = vpack.c.bf16 %v1824_v60, %v1822_v59  ;;  %v1862_v59 = vld [vmem:[#allocation2 + $0x1d48] sm:$0xff]  ;;  %v1864_v60 = vld [vmem:[#allocation2 + $0x1d60] sm:$0xff] }
 0x628   :  { %4305 = vmatpush1.bf16.msra.mxu1 %v4304_v61  ;;  %v4344_v61 = vpack.c.bf16 %v1859_v58, %v1857_v57  ;;  %v1728_v58 = vld [vmem:[#allocation7 + $0xa8] ss:$8 sm:$0x3] }
 0x629   :  { %4307 = vmatprep.subr.bf16.mxu1 %v4306_v63  ;;  %v4346_v63 = vpack.c.bf16 %v1864_v60, %v1862_v59  ;;  %v1733_v59 = vrot.slane %v1728_v58, %v4877_v9  ;;  %v1737_v60 = vrot.slane %v1728_v58, %v4880_v11  ;;  %v2155_v58 = vld [vmem:[#allocation4 + $0x178] sm:$0xff] }
 0x62a   :  { %4269 = vmatpush1.bf16.msra.mxu0 %v4268_v62  ;;  %v4308_v62 = vpack.c.bf16 %v1823_v1, %v1821_v0  ;;  %v1861_v0 = vld [vmem:[#allocation2 + $0x1d40] sm:$0xff]  ;;  %v1863_v1 = vld [vmem:[#allocation2 + $0x1d58] sm:$0xff] }
 0x62b   :  { %4271 = vmatprep.subr.bf16.mxu0 %v4270_v4  ;;  %v4310_v4 = vpack.c.bf16 %v1828_v3, %v1826_v2  ;;  %v1866_v2 = vld [vmem:[#allocation2 + $0x1d78] sm:$0xff]  ;;  %v1868_v3 = vld [vmem:[#allocation2 + $0x1d90] sm:$0xff] }
 0x62c   :  { %4309 = vmatpush1.bf16.msra.mxu1 %v4308_v62  ;;  %v4348_v62 = vpack.c.bf16 %v1863_v1, %v1861_v0  ;;  %v2052_v1 = vld [vmem:[#allocation4 + $0x80] sm:$0xff] }
 0x62d   :  { %4311 = vmatprep.subr.bf16.mxu1 %v4310_v4  ;;  %v4350_v4 = vpack.c.bf16 %v1868_v3, %v1866_v2  ;;  %v2053_v2 = vld [vmem:[#allocation4 + $0x88] sm:$0xff] }
 0x62e   :  { %4273 = vmatpush1.bf16.msra.mxu0 %v4272_v7  ;;  %v4312_v7 = vpack.c.bf16 %v1827_v6, %v1825_v5  ;;  %v1865_v5 = vld [vmem:[#allocation2 + $0x1d70] sm:$0xff]  ;;  %v1867_v6 = vld [vmem:[#allocation2 + $0x1d88] sm:$0xff] }
 0x62f   :  { %4275 = vmatprep.subr.bf16.mxu0 %v4274_v13  ;;  %v4314_v13 = vpack.c.bf16 %v1832_v20, %v1830_v8  ;;  %v1870_v8 = vld [vmem:[#allocation2 + $0x1da8] sm:$0xff]  ;;  %v1872_v20 = vld [vmem:[#allocation2 + $0x1dc0] sm:$0xff] }
 0x630   :  { %4313 = vmatpush1.bf16.msra.mxu1 %v4312_v7  ;;  %v4352_v7 = vpack.c.bf16 %v1867_v6, %v1865_v5  ;;  %v2054_v6 = vld [vmem:[#allocation4 + $0x90] sm:$0xff] }
 0x631   :  { %4315 = vmatprep.subr.bf16.mxu1 %v4314_v13  ;;  %v4354_v13 = vpack.c.bf16 %v1872_v20, %v1870_v8  ;;  %v2055_v8 = vld [vmem:[#allocation4 + $0x98] sm:$0xff] }
 0x632   :  { %4277 = vmatpush1.bf16.msra.mxu0 %v4276_v18  ;;  %v4316_v18 = vpack.c.bf16 %v1831_v15, %v1829_v14  ;;  %v1869_v14 = vld [vmem:[#allocation2 + $0x1da0] sm:$0xff]  ;;  %v1871_v15 = vld [vmem:[#allocation2 + $0x1db8] sm:$0xff]  ;;  %v4390_v20 = vpack.c.bf16 %v2055_v8, %v2054_v6 }
 0x633   :  { %4279 = vmatprep.subr.bf16.mxu0 %v4278_v19  ;;  %v4318_v19 = vpack.c.bf16 %v1836_v17, %v1834_v16  ;;  %v4356_v16 = vpack.c.bf16 %v1871_v15, %v1869_v14  ;;  %v1578_v17 = vld [vmem:[#allocation7 + $0x90] ss:$8 sm:$0x3] }
 0x634   :  { %4317 = vmatpush1.bf16.msra.mxu1 %v4316_v18  ;;  %v1583_v18 = vrot.slane %v1578_v17, %v4877_v9  ;;  %v2058_v15 = vld [vmem:[#allocation4 + $0xb0] sm:$0xff]  ;;  %v2235_v6 = vld [vmem:[#allocation4 + $0x1b8] sm:$0xff] }
 0x635   :  { %4319 = vmatprep.subr.bf16.mxu1 %v4318_v19  ;;  %v1587_v19 = vrot.slane %v1578_v17, %v4880_v11 }
 0x636   :  { %4281 = vmatpush1.bf16.msra.mxu0 %v4280_v27  ;;  %v4320_v27 = vpack.c.bf16 %v1835_v22, %v1833_v21 }
 0x637   :  { %4283 = vmatprep.subr.bf16.mxu0 %v4282_v28  ;;  %v4322_v28 = vpack.c.bf16 %v1840_v25, %v1838_v24  ;;  %v1964_v25 = vld [vmem:[#allocation4] sm:$0xff] }
 0x638   :  { %4321 = vmatpush1.bf16.msra.mxu1 %v4320_v27  ;;  %v1965_v27 = vld [vmem:[#allocation4 + $0x8] sm:$0xff] }
 0x639   :  { %4323 = vmatprep.subr.bf16.mxu1 %v4322_v28 }
 0x63a   :  { %4285 = vmatpush1.bf16.msra.mxu0 %v4284_v33  ;;  %v4324_v33 = vpack.c.bf16 %v1839_v30, %v1837_v29  ;;  %v4363_v30 = vpack.c.bf16 %v1965_v27, %v1964_v25  ;;  %v2064_v27 = vld [vmem:[#allocation4 + $0xe0] sm:$0xff] }
 0x63b   :  { %4287 = vmatprep.subr.bf16.mxu0 %v4286_v34  ;;  %v4326_v34 = vpack.c.bf16 %v1844_v32, %v1842_v31  ;;  %v1966_v32 = vld [vmem:[#allocation4 + $0x10] sm:$0xff] }
 0x63c   :  { %4325 = vmatpush1.bf16.msra.mxu1 %v4324_v33  ;;  %v1967_v33 = vld [vmem:[#allocation4 + $0x18] sm:$0xff] }
 0x63d   :  { %4327 = vmatprep.subr.bf16.mxu1 %v4326_v34  ;;  %v4366_v34 = vpack.c.bf16 %v1967_v33, %v1966_v32  ;;  %v1980_v32 = vld [vmem:[#allocation7 + $0xd8] ss:$0 sm:$0xff] }
 0x63e   :  { %4289 = vmatpush1.bf16.msra.mxu0 %v4288_v39  ;;  %v4328_v39 = vpack.c.bf16 %v1843_v36, %v1841_v35  ;;  %v1968_v35 = vld [vmem:[#allocation4 + $0x20] sm:$0xff]  ;;  %v1969_v36 = vld [vmem:[#allocation4 + $0x28] sm:$0xff] }
 0x63f   :  { %4291 = vmatprep.subr.bf16.mxu0 %v4290_v40  ;;  %v4330_v40 = vpack.c.bf16 %v1848_v38, %v1846_v37  ;;  %v4369_v37 = vpack.c.bf16 %v1969_v36, %v1968_v35  ;;  %v1970_v38 = vld [vmem:[#allocation4 + $0x30] sm:$0xff] }
 0x640   :  { %4329 = vmatpush1.bf16.msra.mxu1 %v4328_v39  ;;  %v1971_v39 = vld [vmem:[#allocation4 + $0x38] sm:$0xff] }
 0x641   :  { %4331 = vmatprep.subr.bf16.mxu1 %v4330_v40  ;;  %v4372_v40 = vpack.c.bf16 %v1971_v39, %v1970_v38  ;;  %v2140_v38 = vld [vmem:[#allocation4 + $0x100] sm:$0xff]  ;;  %v2141_v39 = vld [vmem:[#allocation4 + $0x108] sm:$0xff] }
 0x642   :  { %4293 = vmatpush1.bf16.msra.mxu0 %v4292_v12  ;;  %v1850_v12 = vld [vmem:[#allocation2 + $0x1cb8] sm:$0xff] }
 0x643   :  { %4295 = vmatprep.subr.bf16.mxu0 %v4294_v45  ;;  %v4334_v45 = vpack.c.bf16 %v1852_v43, %v1850_v12  ;;  %v4375_v12 = vpack.c.bf16 %v1973_v42, %v1972_v41  ;;  %v1974_v43 = vld [vmem:[#allocation4 + $0x50] sm:$0xff]  ;;  %v2143_v42 = vld [vmem:[#allocation4 + $0x118] sm:$0xff] }
 0x644   :  { %4333 = vmatpush1.bf16.msra.mxu1 %v4332_v44  ;;  %v1975_v44 = vld [vmem:[#allocation4 + $0x58] sm:$0xff]  ;;  %v2142_v41 = vld [vmem:[#allocation4 + $0x110] sm:$0xff] }
 0x645   :  { %4335 = vmatprep.subr.bf16.mxu1 %v4334_v45  ;;  %v4378_v45 = vpack.c.bf16 %v1975_v44, %v1974_v43  ;;  %v2144_v43 = vld [vmem:[#allocation4 + $0x120] sm:$0xff]  ;;  %v2145_v44 = vld [vmem:[#allocation4 + $0x128] sm:$0xff] }
 0x646   :  { %4297 = vmatpush1.bf16.msra.mxu0 %v4296_v48  ;;  %v1854_v48 = vld [vmem:[#allocation2 + $0x1ce8] sm:$0xff] }
 0x647   :  { %4362 = vmatprep.subr.bf16.mxu0 %v4760_v10  ;;  %v4338_v51 = vpack.c.bf16 %v1856_v49, %v1854_v48  ;;  %v4381_v48 = vpack.c.bf16 %v1977_v47, %v1976_v46  ;;  %v1978_v49 = vld [vmem:[#allocation4 + $0x70] sm:$0xff]  ;;  %v2147_v47 = vld [vmem:[#allocation4 + $0x138] sm:$0xff] }
 0x648   :  { %4337 = vmatpush1.bf16.msra.mxu1 %v4336_v50  ;;  %v1979_v50 = vld [vmem:[#allocation4 + $0x78] sm:$0xff]  ;;  %v2146_v46 = vld [vmem:[#allocation4 + $0x130] sm:$0xff] }
 0x649   :  { %4339 = vmatprep.subr.bf16.mxu1 %v4338_v51  ;;  %v4384_v51 = vpack.c.bf16 %v1979_v50, %v1978_v49  ;;  %v2148_v49 = vld [vmem:[#allocation4 + $0x140] sm:$0xff]  ;;  %v2149_v50 = vld [vmem:[#allocation4 + $0x148] sm:$0xff] }
 0x64c   :  { %4341 = vmatpush1.bf16.msra.mxu1 %v4340_v55  ;;  %v1873_v55 = vld [vmem:[#allocation2 + $0x1dd0] sm:$0xff] }
 0x64d   :  { %4343 = vmatprep.subr.bf16.mxu1 %v4342_v56  ;;  %v1875_v56 = vld [vmem:[#allocation2 + $0x1de8] sm:$0xff] }
 0x64e   :  { %v4360_v57 = vpack.c.bf16 %v1875_v56, %v1873_v55  ;;  %v2153_v55 = vld [vmem:[#allocation4 + $0x168] sm:$0xff] }
 0x650   :  { %4345 = vmatpush1.bf16.msra.mxu1 %v4344_v61 }
 0x651   :  { %4347 = vmatprep.subr.bf16.mxu1 %v4346_v63 }
 0x654   :  { %4349 = vmatpush1.bf16.msra.mxu1 %v4348_v62 }
 0x655   :  { %4351 = vmatprep.subr.bf16.mxu1 %v4350_v4  ;;  %v4387_v4 = vpack.c.bf16 %v2053_v2, %v2052_v1  ;;  %v2231_v1 = vld [vmem:[#allocation4 + $0x198] sm:$0xff] }
 0x658   :  { %4353 = vmatpush1.bf16.msra.mxu1 %v4352_v7  ;;  %v2056_v7 = vld [vmem:[#allocation4 + $0xa0] sm:$0xff] }
 0x659   :  { %4355 = vmatprep.subr.bf16.mxu1 %v4354_v13  ;;  %v2057_v13 = vld [vmem:[#allocation4 + $0xa8] sm:$0xff] }
 0x65a   :  { %v4393_v14 = vpack.c.bf16 %v2057_v13, %v2056_v7  ;;  %v2237_v7 = vld [vmem:[#allocation4 + $0x1c8] sm:$0xff] }
 0x65c   :  { %4357 = vmatpush1.bf16.msra.mxu1 %v4356_v16  ;;  %v2059_v16 = vld [vmem:[#allocation4 + $0xb8] sm:$0xff] }
 0x65d   :  { %4359 = vmatprep.subr.bf16.mxu1 %v4358_v54  ;;  %v4396_v17 = vpack.c.bf16 %v2059_v16, %v2058_v15  ;;  %v2152_v54 = vld [vmem:[#allocation4 + $0x160] sm:$0xff]  ;;  %v2239_v15 = vld [vmem:[#allocation4 + $0x1d8] sm:$0xff] }
 0x65e   :  { %v4429_v56 = vpack.c.bf16 %v2153_v55, %v2152_v54 }
 0x660   :  { %4361 = vmatpush1.bf16.msra.mxu1 %v4360_v57  ;;  %v2154_v57 = vld [vmem:[#allocation4 + $0x170] sm:$0xff] }
 0x661   :  { %4386 = vmatprep.subr.bf16.mxu1 %v4760_v10 }
 0x6dc   :  { %v1656_v21 = vpop.f32.mrb[6].mxu0 }
 0x6dd   :  { %v1657_v22 = vadd.f32 %v1656_v21, %v1583_v18  ;;  %v1658_v24 = vpop.f32.mrb[7].mxu0  ;;  %v2060_v18 = vld [vmem:[#allocation4 + $0xc0] sm:$0xff] }
 0x6de   :  { %v1659_v28 = vadd.f32 %v1658_v24, %v1587_v19  ;;  %v2061_v19 = vld [vmem:[#allocation4 + $0xc8] sm:$0xff]  ;;  %v2063_v24 = vld [vmem:[#allocation4 + $0xd8] sm:$0xff] }
 0x6df   :  { %v1661_v31 = vmax.f32 %v1657_v22, 0.0  ;;  %v4399_v21 = vpack.c.bf16 %v2061_v19, %v2060_v18  ;;  %v2062_v22 = vld [vmem:[#allocation4 + $0xd0] sm:$0xff]  ;;  %v2241_v18 = vld [vmem:[#allocation4 + $0x1e8] sm:$0xff] }
 0x6e0   :  { %v1662_v29 = vmax.f32 %v1659_v28, 0.0  ;;  %v4402_v25 = vpack.c.bf16 %v2063_v24, %v2062_v22  ;;  %v2065_v28 = vld [vmem:[#allocation4 + $0xe8] sm:$0xff]  ;;  %v2068_v24 = vld [vmem:[#allocation7 + $0xf0] ss:$0 sm:$0xff] }
 0x6e2   :  { %1804 = vmatprep.mubr.f32.mxu0 %v1662_v29  ;;  %v4405_v29 = vpack.c.bf16 %v2065_v28, %v2064_v27 }
 0x6e3   :  { %1805 = vmatmul.mubr.f32.vlgmr.msra.gmra.mrb[8].mxu0 %v1661_v31  ;;  %v2067_v31 = vld [vmem:[#allocation4 + $0xf8] sm:$0xff] }
 0x6e4   :  { %4364 = vmatpush3.bf16.msra.mxu0 %v4363_v30  ;;  %3348 = vmatprep.mubr.msk.f32.mxu0 %vm4761_vm0, %v4759_v23  ;;  %v2066_v30 = vld [vmem:[#allocation4 + $0xf0] sm:$0xff] }
 0x6e5   :  { %4365 = vmatprep.subr.bf16.mxu0 %v4760_v10 }
 0x6e8   :  { %4367 = vmatpush3.bf16.msra.mxu0 %v4366_v34  ;;  %v4408_v34 = vpack.c.bf16 %v2067_v31, %v2066_v30  ;;  %v2242_v30 = vld [vmem:[#allocation4 + $0x1f0] sm:$0xff]  ;;  %v2243_v31 = vld [vmem:[#allocation4 + $0x1f8] sm:$0xff] }
 0x6e9   :  { %4368 = vmatprep.subr.bf16.mxu0 %v4760_v10 }
 0x6ec   :  { %4370 = vmatpush3.bf16.msra.mxu0 %v4369_v37 }
 0x6ed   :  { %4371 = vmatprep.subr.bf16.mxu0 %v4760_v10 }
 0x6f0   :  { %4373 = vmatpush3.bf16.msra.mxu0 %v4372_v40  ;;  %v4411_v40 = vpack.c.bf16 %v2141_v39, %v2140_v38  ;;  %v2320_v39 = vld [vmem:[#allocation4 + $0x220] sm:$0xff] }
 0x6f1   :  { %4374 = vmatprep.subr.bf16.mxu0 %v4760_v10 }
 0x6f4   :  { %4376 = vmatpush3.bf16.msra.mxu0 %v4375_v12  ;;  %v4414_v12 = vpack.c.bf16 %v2143_v42, %v2142_v41  ;;  %v2322_v42 = vld [vmem:[#allocation4 + $0x230] sm:$0xff] }
 0x6f5   :  { %4377 = vmatprep.subr.bf16.mxu0 %v4760_v10 }
 0x6f8   :  { %4379 = vmatpush3.bf16.msra.mxu0 %v4378_v45  ;;  %v4417_v45 = vpack.c.bf16 %v2145_v44, %v2144_v43  ;;  %v2324_v44 = vld [vmem:[#allocation4 + $0x240] sm:$0xff] }
 0x6f9   :  { %4380 = vmatprep.subr.bf16.mxu0 %v4760_v10 }
 0x6fc   :  { %4382 = vmatpush3.bf16.msra.mxu0 %v4381_v48  ;;  %v4420_v48 = vpack.c.bf16 %v2147_v47, %v2146_v46  ;;  %v2326_v47 = vld [vmem:[#allocation4 + $0x250] sm:$0xff] }
 0x6fd   :  { %4383 = vmatprep.subr.bf16.mxu0 %v4760_v10 }
 0x700   :  { %4385 = vmatpush3.bf16.msra.mxu0 %v4384_v51  ;;  %v4423_v51 = vpack.c.bf16 %v2149_v50, %v2148_v49  ;;  %v2328_v50 = vld [vmem:[#allocation4 + $0x260] sm:$0xff] }
 0x701   :  { %4410 = vmatprep.subr.bf16.mxu0 %v4760_v10 }
 0x703   :  { %3349 = vmatmul.mubr.f32.vlgmr.msra.gmra.mrb[10].mxu0 %v1963_v52  ;;  %v2150_v52 = vld [vmem:[#allocation4 + $0x150] sm:$0xff] }
 0x704   :  { %3418 = vmatprep.mubr.msk.f32.mxu0 %vm4761_vm0, %v4759_v23  ;;  %4412 = vmatpush3.bf16.msra.mxu0 %v4411_v40  ;;  %v4426_v53 = vpack.c.bf16 %v2151_v26, %v2150_v52  ;;  %v2321_v40 = vld [vmem:[#allocation4 + $0x228] sm:$0xff] }
 0x705   :  { %4413 = vmatprep.subr.bf16.mxu0 %v4760_v10  ;;  %v4465_v41 = vpack.c.bf16 %v2321_v40, %v2320_v39  ;;  %v2156_v26 = vld [vmem:[#allocation7 + $0x108] ss:$0 sm:$0xff]  ;;  %v2496_v39 = vld [vmem:[#allocation4 + $0x320] sm:$0xff] }
 0x706   :  { %v2497_v40 = vld [vmem:[#allocation4 + $0x328] sm:$0xff] }
 0x708   :  { %4415 = vmatpush3.bf16.msra.mxu0 %v4414_v12  ;;  %v2323_v12 = vld [vmem:[#allocation4 + $0x238] sm:$0xff] }
 0x709   :  { %4416 = vmatprep.subr.bf16.mxu0 %v4760_v10  ;;  %v4468_v43 = vpack.c.bf16 %v2323_v12, %v2322_v42  ;;  %v2498_v42 = vld [vmem:[#allocation4 + $0x330] sm:$0xff]  ;;  %v2499_v12 = vld [vmem:[#allocation4 + $0x338] sm:$0xff] }
 0x70c   :  { %4418 = vmatpush3.bf16.msra.mxu0 %v4417_v45  ;;  %v2325_v45 = vld [vmem:[#allocation4 + $0x248] sm:$0xff] }
 0x70d   :  { %4419 = vmatprep.subr.bf16.mxu0 %v4760_v10  ;;  %v4471_v46 = vpack.c.bf16 %v2325_v45, %v2324_v44  ;;  %v2500_v44 = vld [vmem:[#allocation4 + $0x340] sm:$0xff]  ;;  %v2501_v45 = vld [vmem:[#allocation4 + $0x348] sm:$0xff] }
 0x710   :  { %4421 = vmatpush3.bf16.msra.mxu0 %v4420_v48  ;;  %v2327_v48 = vld [vmem:[#allocation4 + $0x258] sm:$0xff] }
 0x711   :  { %4422 = vmatprep.subr.bf16.mxu0 %v4760_v10  ;;  %v4474_v49 = vpack.c.bf16 %v2327_v48, %v2326_v47  ;;  %v2502_v47 = vld [vmem:[#allocation4 + $0x350] sm:$0xff]  ;;  %v2503_v48 = vld [vmem:[#allocation4 + $0x358] sm:$0xff] }
 0x714   :  { %4424 = vmatpush3.bf16.msra.mxu0 %v4423_v51  ;;  %v2329_v51 = vld [vmem:[#allocation4 + $0x268] sm:$0xff] }
 0x715   :  { %4425 = vmatprep.subr.bf16.mxu0 %v4760_v10  ;;  %v4477_v52 = vpack.c.bf16 %v2329_v51, %v2328_v50  ;;  %v2504_v50 = vld [vmem:[#allocation4 + $0x360] sm:$0xff]  ;;  %v2505_v51 = vld [vmem:[#allocation4 + $0x368] sm:$0xff] }
 0x718   :  { %4427 = vmatpush3.bf16.msra.mxu0 %v4426_v53 }
 0x719   :  { %4428 = vmatprep.subr.bf16.mxu0 %v4760_v10 }
 0x71c   :  { %4430 = vmatpush3.bf16.msra.mxu0 %v4429_v56 }
 0x71d   :  { %4431 = vmatprep.subr.bf16.mxu0 %v4760_v10 }
 0x7b6   :  { %v1806_v61 = vpop.f32.mrb[8].mxu0 }
 0x7b7   :  { %v1807_v63 = vadd.f32 %v1806_v61, %v1733_v59  ;;  %v1808_v0 = vpop.f32.mrb[9].mxu0  ;;  %v4432_v59 = vpack.c.bf16 %v2155_v58, %v2154_v57  ;;  %v2229_v61 = vld [vmem:[#allocation4 + $0x188] sm:$0xff]  ;;  %v2330_v57 = vld [vmem:[#allocation4 + $0x270] sm:$0xff]  ;;  %v2331_v58 = vld [vmem:[#allocation4 + $0x278] sm:$0xff] }
 0x7b8   :  { %v1809_v3 = vadd.f32 %v1808_v0, %v1737_v60  ;;  %v2228_v60 = vld [vmem:[#allocation4 + $0x180] sm:$0xff] }
 0x7b9   :  { %v1811_v5 = vmax.f32 %v1807_v63, 0.0  ;;  %4433 = vmatpush3.bf16.msra.mxu0 %v4432_v59  ;;  %v2230_v63 = vld [vmem:[#allocation4 + $0x190] sm:$0xff]  ;;  %v4435_v0 = vpack.c.bf16 %v2229_v61, %v2228_v60  ;;  %v4480_v59 = vpack.c.bf16 %v2331_v58, %v2330_v57  ;;  %v2404_v60 = vld [vmem:[#allocation4 + $0x280] sm:$0xff]  ;;  %v2405_v61 = vld [vmem:[#allocation4 + $0x288] sm:$0xff] }
 0x7ba   :  { %v1812_v62 = vmax.f32 %v1809_v3, 0.0  ;;  %4458 = vmatprep.subr.bf16.mxu0 %v4760_v10  ;;  %v4438_v2 = vpack.c.bf16 %v2231_v1, %v2230_v63  ;;  %v2232_v3 = vld [vmem:[#allocation4 + $0x1a0] sm:$0xff]  ;;  %v2406_v63 = vld [vmem:[#allocation4 + $0x290] sm:$0xff]  ;;  %v2407_v1 = vld [vmem:[#allocation4 + $0x298] sm:$0xff] }
 0x7bb   :  { %v2506_v57 = vld [vmem:[#allocation4 + $0x370] sm:$0xff]  ;;  %v2507_v58 = vld [vmem:[#allocation4 + $0x378] sm:$0xff] }
 0x7bc   :  { %1954 = vmatprep.mubr.f32.mxu1 %v1812_v62  ;;  %v2233_v62 = vld [vmem:[#allocation4 + $0x1a8] sm:$0xff] }
 0x7bd   :  { %1955 = vmatmul.mubr.f32.vlgmr.msra.gmra.mrb[12].mxu1 %v1811_v5  ;;  %v2234_v5 = vld [vmem:[#allocation4 + $0x1b0] sm:$0xff] }
 0x7be   :  { %4388 = vmatpush3.bf16.msra.mxu1 %v4387_v4  ;;  %3383 = vmatprep.mubr.msk.f32.mxu1 %vm4761_vm0, %v4759_v23  ;;  %v4441_v4 = vpack.c.bf16 %v2233_v62, %v2232_v3  ;;  %v4444_v8 = vpack.c.bf16 %v2235_v6, %v2234_v5  ;;  %v2408_v3 = vld [vmem:[#allocation4 + $0x2a0] sm:$0xff]  ;;  %v2409_v62 = vld [vmem:[#allocation4 + $0x2a8] sm:$0xff]  ;;  %v2410_v5 = vld [vmem:[#allocation4 + $0x2b0] sm:$0xff] }
 0x7bf   :  { %4389 = vmatprep.subr.bf16.mxu1 %v4760_v10  ;;  %v2411_v6 = vld [vmem:[#allocation4 + $0x2b8] sm:$0xff] }
 0x7c2   :  { %4391 = vmatpush3.bf16.msra.mxu1 %v4390_v20  ;;  %v2236_v20 = vld [vmem:[#allocation4 + $0x1c0] sm:$0xff] }
 0x7c3   :  { %4392 = vmatprep.subr.bf16.mxu1 %v4760_v10  ;;  %v4447_v13 = vpack.c.bf16 %v2237_v7, %v2236_v20  ;;  %v2412_v20 = vld [vmem:[#allocation4 + $0x2c0] sm:$0xff]  ;;  %v2413_v7 = vld [vmem:[#allocation4 + $0x2c8] sm:$0xff] }
 0x7c6   :  { %4394 = vmatpush3.bf16.msra.mxu1 %v4393_v14  ;;  %v2238_v14 = vld [vmem:[#allocation4 + $0x1d0] sm:$0xff] }
 0x7c7   :  { %4395 = vmatprep.subr.bf16.mxu1 %v4760_v10  ;;  %v4450_v16 = vpack.c.bf16 %v2239_v15, %v2238_v14  ;;  %v2414_v14 = vld [vmem:[#allocation4 + $0x2d0] sm:$0xff]  ;;  %v2415_v15 = vld [vmem:[#allocation4 + $0x2d8] sm:$0xff] }
 0x7ca   :  { %4397 = vmatpush3.bf16.msra.mxu1 %v4396_v17  ;;  %v2240_v17 = vld [vmem:[#allocation4 + $0x1e0] sm:$0xff] }
 0x7cb   :  { %4398 = vmatprep.subr.bf16.mxu1 %v4760_v10  ;;  %v4453_v19 = vpack.c.bf16 %v2241_v18, %v2240_v17  ;;  %v2416_v17 = vld [vmem:[#allocation4 + $0x2e0] sm:$0xff]  ;;  %v2417_v18 = vld [vmem:[#allocation4 + $0x2e8] sm:$0xff] }
 0x7ce   :  { %4400 = vmatpush3.bf16.msra.mxu1 %v4399_v21 }
 0x7cf   :  { %4401 = vmatprep.subr.bf16.mxu1 %v4760_v10 }
 0x7d2   :  { %4403 = vmatpush3.bf16.msra.mxu1 %v4402_v25 }
 0x7d3   :  { %4404 = vmatprep.subr.bf16.mxu1 %v4760_v10 }
 0x7d6   :  { %4406 = vmatpush3.bf16.msra.mxu1 %v4405_v29  ;;  %v2047_v33 = vpop.f32.mrb[10].mxu0 }
 0x7d7   :  { %v2048_v35 = vadd.f32 %v2047_v33, %v1980_v32  ;;  %v3350_v36 = vpop.f32.mrb[11].mxu0  ;;  %4407 = vmatprep.subr.bf16.mxu1 %v4760_v10  ;;  %v4456_v32 = vpack.c.bf16 %v2243_v31, %v2242_v30  ;;  %v2316_v33 = vld [vmem:[#allocation4 + $0x200] sm:$0xff]  ;;  %v2418_v30 = vld [vmem:[#allocation4 + $0x2f0] sm:$0xff]  ;;  %v2419_v31 = vld [vmem:[#allocation4 + $0x2f8] sm:$0xff] }
 0x7d9   :  { %v2051_v37 = vmax.f32 %v2048_v35, 0.0  ;;  %v2318_v35 = vld [vmem:[#allocation4 + $0x210] sm:$0xff] }
 0x7da   :  { %4409 = vmatpush3.bf16.msra.mxu1 %v4408_v34  ;;  %v2317_v34 = vld [vmem:[#allocation4 + $0x208] sm:$0xff] }
 0x7db   :  { %4434 = vmatprep.subr.bf16.mxu1 %v4760_v10  ;;  %v4459_v36 = vpack.c.bf16 %v2317_v34, %v2316_v33  ;;  %v2492_v33 = vld [vmem:[#allocation4 + $0x300] sm:$0xff]  ;;  %v2493_v34 = vld [vmem:[#allocation4 + $0x308] sm:$0xff] }
 0x7dd   :  { %3384 = vmatmul.mubr.f32.vlgmr.msra.gmra.mrb[14].mxu1 %v2051_v37  ;;  %v2319_v37 = vld [vmem:[#allocation4 + $0x218] sm:$0xff] }
 0x7de   :  { %3453 = vmatprep.mubr.msk.f32.mxu1 %vm4761_vm0, %v4759_v23  ;;  %4436 = vmatpush3.bf16.msra.mxu1 %v4435_v0  ;;  %v4462_v38 = vpack.c.bf16 %v2319_v37, %v2318_v35  ;;  %v4483_v0 = vpack.c.bf16 %v2405_v61, %v2404_v60  ;;  %v2494_v35 = vld [vmem:[#allocation4 + $0x310] sm:$0xff]  ;;  %v2495_v37 = vld [vmem:[#allocation4 + $0x318] sm:$0xff]  ;;  %v2580_v60 = vld [vmem:[#allocation4 + $0x380] sm:$0xff] }
 0x7df   :  { %4437 = vmatprep.subr.bf16.mxu1 %v4760_v10  ;;  %v2581_v61 = vld [vmem:[#allocation4 + $0x388] sm:$0xff] }
 0x7e2   :  { %4439 = vmatpush3.bf16.msra.mxu1 %v4438_v2  ;;  %v4486_v2 = vpack.c.bf16 %v2407_v1, %v2406_v63  ;;  %v2582_v63 = vld [vmem:[#allocation4 + $0x390] sm:$0xff]  ;;  %v2583_v1 = vld [vmem:[#allocation4 + $0x398] sm:$0xff] }
 0x7e3   :  { %4440 = vmatprep.subr.bf16.mxu1 %v4760_v10 }
 0x7e6   :  { %4442 = vmatpush3.bf16.msra.mxu1 %v4441_v4  ;;  %v4489_v4 = vpack.c.bf16 %v2409_v62, %v2408_v3  ;;  %v2584_v3 = vld [vmem:[#allocation4 + $0x3a0] sm:$0xff]  ;;  %v2585_v62 = vld [vmem:[#allocation4 + $0x3a8] sm:$0xff] }
 0x7e7   :  { %4443 = vmatprep.subr.bf16.mxu1 %v4760_v10 }
 0x7ea   :  { %4445 = vmatpush3.bf16.msra.mxu1 %v4444_v8  ;;  %v4492_v8 = vpack.c.bf16 %v2411_v6, %v2410_v5  ;;  %v2586_v5 = vld [vmem:[#allocation4 + $0x3b0] sm:$0xff]  ;;  %v2587_v6 = vld [vmem:[#allocation4 + $0x3b8] sm:$0xff] }
 0x7eb   :  { %4446 = vmatprep.subr.bf16.mxu1 %v4760_v10 }
 0x7ee   :  { %4448 = vmatpush3.bf16.msra.mxu1 %v4447_v13  ;;  %v4495_v13 = vpack.c.bf16 %v2413_v7, %v2412_v20  ;;  %v2588_v20 = vld [vmem:[#allocation4 + $0x3c0] sm:$0xff]  ;;  %v2589_v7 = vld [vmem:[#allocation4 + $0x3c8] sm:$0xff] }
 0x7ef   :  { %4449 = vmatprep.subr.bf16.mxu1 %v4760_v10 }
 0x7f2   :  { %4451 = vmatpush3.bf16.msra.mxu1 %v4450_v16  ;;  %v4498_v16 = vpack.c.bf16 %v2415_v15, %v2414_v14  ;;  %v2590_v14 = vld [vmem:[#allocation4 + $0x3d0] sm:$0xff]  ;;  %v2591_v15 = vld [vmem:[#allocation4 + $0x3d8] sm:$0xff] }
 0x7f3   :  { %4452 = vmatprep.subr.bf16.mxu1 %v4760_v10 }
 0x7f6   :  { %4454 = vmatpush3.bf16.msra.mxu1 %v4453_v19  ;;  %v4501_v19 = vpack.c.bf16 %v2417_v18, %v2416_v17  ;;  %v2592_v17 = vld [vmem:[#allocation4 + $0x3e0] sm:$0xff]  ;;  %v2593_v18 = vld [vmem:[#allocation4 + $0x3e8] sm:$0xff] }
 0x7f7   :  { %4455 = vmatprep.subr.bf16.mxu1 %v4760_v10 }
 0x7fa   :  { %4457 = vmatpush3.bf16.msra.mxu1 %v4456_v32  ;;  %v4504_v32 = vpack.c.bf16 %v2419_v31, %v2418_v30  ;;  %v2594_v30 = vld [vmem:[#allocation4 + $0x3f0] sm:$0xff]  ;;  %v2595_v31 = vld [vmem:[#allocation4 + $0x3f8] sm:$0xff] }
 0x7fb   :  { %4482 = vmatprep.subr.bf16.mxu1 %v4760_v10 }
 0x890   :  { %v4969_v21 = vpop.f32.mrb[12].mxu1 }
 0x891   :  { %v4971_v22 = vpop.f32.mrb[13].mxu1 }
 0x8b0   :  { %v2135_v25 = vpop.f32.mrb[14].mxu1 }
 0x8b1   :  { %v2136_v27 = vadd.f32 %v2135_v25, %v2068_v24  ;;  %v3385_v28 = vpop.f32.mrb[15].mxu1  ;;  %v2244_v24 = vld [vmem:[#allocation7 + $0x120] ss:$0 sm:$0xff] }
 0x8b3   :  { %v2139_v29 = vmax.f32 %v2136_v27, 0.0 }
 0x8b5   :  { %3419 = vmatmul.mubr.f32.vlgmr.msra.gmra.mrb[12].mxu0 %v2139_v29 }
 0x8b6   :  { %3488 = vmatprep.mubr.msk.f32.mxu0 %vm4761_vm0, %v4759_v23  ;;  %4460 = vmatpush3.bf16.msra.mxu0 %v4459_v36  ;;  %v4507_v36 = vpack.c.bf16 %v2493_v34, %v2492_v33  ;;  %v2668_v33 = vld [vmem:[#allocation4 + $0x400] sm:$0xff]  ;;  %v2669_v34 = vld [vmem:[#allocation4 + $0x408] sm:$0xff] }
 0x8b7   :  { %4461 = vmatprep.subr.bf16.mxu0 %v4760_v10 }
 0x8ba   :  { %4463 = vmatpush3.bf16.msra.mxu0 %v4462_v38  ;;  %v4510_v38 = vpack.c.bf16 %v2495_v37, %v2494_v35  ;;  %v2670_v35 = vld [vmem:[#allocation4 + $0x410] sm:$0xff]  ;;  %v2671_v37 = vld [vmem:[#allocation4 + $0x418] sm:$0xff] }
 0x8bb   :  { %4464 = vmatprep.subr.bf16.mxu0 %v4760_v10 }
 0x8be   :  { %4466 = vmatpush3.bf16.msra.mxu0 %v4465_v41  ;;  %v4513_v41 = vpack.c.bf16 %v2497_v40, %v2496_v39  ;;  %v2672_v39 = vld [vmem:[#allocation4 + $0x420] sm:$0xff]  ;;  %v2673_v40 = vld [vmem:[#allocation4 + $0x428] sm:$0xff] }
 0x8bf   :  { %4467 = vmatprep.subr.bf16.mxu0 %v4760_v10 }
 0x8c2   :  { %4469 = vmatpush3.bf16.msra.mxu0 %v4468_v43  ;;  %v4516_v43 = vpack.c.bf16 %v2499_v12, %v2498_v42  ;;  %v2674_v42 = vld [vmem:[#allocation4 + $0x430] sm:$0xff]  ;;  %v2675_v12 = vld [vmem:[#allocation4 + $0x438] sm:$0xff] }
 0x8c3   :  { %4470 = vmatprep.subr.bf16.mxu0 %v4760_v10 }
 0x8c6   :  { %4472 = vmatpush3.bf16.msra.mxu0 %v4471_v46  ;;  %v4519_v46 = vpack.c.bf16 %v2501_v45, %v2500_v44  ;;  %v2676_v44 = vld [vmem:[#allocation4 + $0x440] sm:$0xff]  ;;  %v2677_v45 = vld [vmem:[#allocation4 + $0x448] sm:$0xff] }
 0x8c7   :  { %4473 = vmatprep.subr.bf16.mxu0 %v4760_v10 }
 0x8ca   :  { %4475 = vmatpush3.bf16.msra.mxu0 %v4474_v49  ;;  %v4522_v49 = vpack.c.bf16 %v2503_v48, %v2502_v47  ;;  %v2678_v47 = vld [vmem:[#allocation4 + $0x450] sm:$0xff]  ;;  %v2679_v48 = vld [vmem:[#allocation4 + $0x458] sm:$0xff] }
 0x8cb   :  { %4476 = vmatprep.subr.bf16.mxu0 %v4760_v10 }
 0x8ce   :  { %4478 = vmatpush3.bf16.msra.mxu0 %v4477_v52  ;;  %v4525_v52 = vpack.c.bf16 %v2505_v51, %v2504_v50  ;;  %v2680_v50 = vld [vmem:[#allocation4 + $0x460] sm:$0xff]  ;;  %v2681_v51 = vld [vmem:[#allocation4 + $0x468] sm:$0xff] }
 0x8cf   :  { %4479 = vmatprep.subr.bf16.mxu0 %v4760_v10 }
 0x8d2   :  { %4481 = vmatpush3.bf16.msra.mxu0 %v4480_v59  ;;  %v4528_v59 = vpack.c.bf16 %v2507_v58, %v2506_v57  ;;  %v2682_v57 = vld [vmem:[#allocation4 + $0x470] sm:$0xff]  ;;  %v2683_v58 = vld [vmem:[#allocation4 + $0x478] sm:$0xff] }
 0x8d3   :  { %4506 = vmatprep.subr.bf16.mxu0 %v4760_v10 }
 0x988   :  { %v2223_v53 = vpop.f32.mrb[12].mxu0 }
 0x989   :  { %v2224_v54 = vadd.f32 %v2223_v53, %v2156_v26  ;;  %v3420_v55 = vpop.f32.mrb[13].mxu0  ;;  %v2332_v26 = vld [vmem:[#allocation7 + $0x138] ss:$0 sm:$0xff] }
 0x98b   :  { %v2227_v56 = vmax.f32 %v2224_v54, 0.0 }
 0x98d   :  { %3454 = vmatmul.mubr.f32.vlgmr.msra.gmra.mrb[16].mxu1 %v2227_v56 }
 0x98e   :  { %3523 = vmatprep.mubr.msk.f32.mxu1 %vm4761_vm0, %v4759_v23  ;;  %4484 = vmatpush3.bf16.msra.mxu1 %v4483_v0  ;;  %v4531_v0 = vpack.c.bf16 %v2581_v61, %v2580_v60  ;;  %v2772_v60 = vld [vmem:[#allocation6 + $0x80] sm:$0xff]  ;;  %v2773_v61 = vld [vmem:[#allocation6 + $0x88] sm:$0xff] }
 0x98f   :  { %4485 = vmatprep.subr.bf16.mxu1 %v4760_v10 }
 0x992   :  { %4487 = vmatpush3.bf16.msra.mxu1 %v4486_v2  ;;  %v4534_v2 = vpack.c.bf16 %v2583_v1, %v2582_v63  ;;  %v4602_v63 = vpack.c.bf16 %v2773_v61, %v2772_v60  ;;  %v2789_v1 = vld [vmem:[#allocation6 + $0x108] sm:$0xff]  ;;  %v2766_v61 = vld [vmem:[#allocation6 + $0x50] sm:$0xff] }
 0x993   :  { %4488 = vmatprep.subr.bf16.mxu1 %v4760_v10 }
 0x996   :  { %4490 = vmatpush3.bf16.msra.mxu1 %v4489_v4  ;;  %v4537_v4 = vpack.c.bf16 %v2585_v62, %v2584_v3  ;;  %v2791_v62 = vld [vmem:[#allocation6 + $0x118] sm:$0xff] }
 0x997   :  { %4491 = vmatprep.subr.bf16.mxu1 %v4760_v10 }
 0x99a   :  { %4493 = vmatpush3.bf16.msra.mxu1 %v4492_v8  ;;  %v4540_v8 = vpack.c.bf16 %v2587_v6, %v2586_v5  ;;  %v2792_v5 = vld [vmem:[#allocation6 + $0x120] sm:$0xff]  ;;  %v2793_v6 = vld [vmem:[#allocation6 + $0x128] sm:$0xff] }
 0x99b   :  { %4494 = vmatprep.subr.bf16.mxu1 %v4760_v10 }
 0x99e   :  { %4496 = vmatpush3.bf16.msra.mxu1 %v4495_v13  ;;  %v4543_v13 = vpack.c.bf16 %v2589_v7, %v2588_v20  ;;  %v2795_v20 = vld [vmem:[#allocation6 + $0x138] sm:$0xff] }
 0x99f   :  { %4497 = vmatprep.subr.bf16.mxu1 %v4760_v10 }
 0x9a2   :  { %4499 = vmatpush3.bf16.msra.mxu1 %v4498_v16  ;;  %v4546_v16 = vpack.c.bf16 %v2591_v15, %v2590_v14  ;;  %v2797_v14 = vld [vmem:[#allocation6 + $0x148] sm:$0xff] }
 0x9a3   :  { %4500 = vmatprep.subr.bf16.mxu1 %v4760_v10 }
 0x9a6   :  { %4502 = vmatpush3.bf16.msra.mxu1 %v4501_v19  ;;  %v4549_v19 = vpack.c.bf16 %v2593_v18, %v2592_v17  ;;  %v2799_v17 = vld [vmem:[#allocation6 + $0x158] sm:$0xff] }
 0x9a7   :  { %4503 = vmatprep.subr.bf16.mxu1 %v4760_v10 }
 0x9aa   :  { %4505 = vmatpush3.bf16.msra.mxu1 %v4504_v32  ;;  %v4552_v32 = vpack.c.bf16 %v2595_v31, %v2594_v30  ;;  %v2756_v30 = vld [vmem:[#allocation6] sm:$0xff]  ;;  %v2757_v31 = vld [vmem:[#allocation6 + $0x8] sm:$0xff] }
 0x9ab   :  { %4530 = vmatprep.subr.bf16.mxu1 %v4760_v10 }
 0xa60   :  { %v2311_v25 = vpop.f32.mrb[16].mxu1 }
 0xa61   :  { %v2312_v27 = vadd.f32 %v2311_v25, %v2244_v24  ;;  %v3455_v28 = vpop.f32.mrb[17].mxu1  ;;  %v2420_v24 = vld [vmem:[#allocation7 + $0x150] ss:$0 sm:$0xff] }
 0xa63   :  { %v2315_v29 = vmax.f32 %v2312_v27, 0.0 }
 0xa65   :  { %3489 = vmatmul.mubr.f32.vlgmr.msra.gmra.mrb[14].mxu0 %v2315_v29 }
 0xa66   :  { %3558 = vmatprep.mubr.msk.f32.mxu0 %vm4761_vm0, %v4759_v23  ;;  %4508 = vmatpush3.bf16.msra.mxu0 %v4507_v36  ;;  %v4555_v36 = vpack.c.bf16 %v2669_v34, %v2668_v33  ;;  %v2774_v34 = vld [vmem:[#allocation6 + $0x90] sm:$0xff] }
 0xa67   :  { %4509 = vmatprep.subr.bf16.mxu0 %v4760_v10 }
 0xa6a   :  { %4511 = vmatpush3.bf16.msra.mxu0 %v4510_v38  ;;  %v4558_v38 = vpack.c.bf16 %v2671_v37, %v2670_v35  ;;  %v2775_v35 = vld [vmem:[#allocation6 + $0x98] sm:$0xff] }
 0xa6b   :  { %4512 = vmatprep.subr.bf16.mxu0 %v4760_v10 }
 0xa6e   :  { %4514 = vmatpush3.bf16.msra.mxu0 %v4513_v41  ;;  %v4561_v41 = vpack.c.bf16 %v2673_v40, %v2672_v39  ;;  %v4606_v40 = vpack.c.bf16 %v2775_v35, %v2774_v34 }
 0xa6f   :  { %4515 = vmatprep.subr.bf16.mxu0 %v4760_v10 }
 0xa72   :  { %4517 = vmatpush3.bf16.msra.mxu0 %v4516_v43  ;;  %v4564_v43 = vpack.c.bf16 %v2675_v12, %v2674_v42  ;;  %v2776_v12 = vld [vmem:[#allocation6 + $0xa0] sm:$0xff] }
 0xa73   :  { %4518 = vmatprep.subr.bf16.mxu0 %v4760_v10 }
 0xa76   :  { %4520 = vmatpush3.bf16.msra.mxu0 %v4519_v46  ;;  %v4567_v46 = vpack.c.bf16 %v2677_v45, %v2676_v44  ;;  %v2761_v45 = vld [vmem:[#allocation6 + $0x28] sm:$0xff] }
 0xa77   :  { %4521 = vmatprep.subr.bf16.mxu0 %v4760_v10 }
 0xa7a   :  { %4523 = vmatpush3.bf16.msra.mxu0 %v4522_v49  ;;  %v4570_v49 = vpack.c.bf16 %v2679_v48, %v2678_v47  ;;  %v2779_v47 = vld [vmem:[#allocation6 + $0xb8] sm:$0xff] }
 0xa7b   :  { %4524 = vmatprep.subr.bf16.mxu0 %v4760_v10 }
 0xa7e   :  { %4526 = vmatpush3.bf16.msra.mxu0 %v4525_v52  ;;  %v4573_v52 = vpack.c.bf16 %v2681_v51, %v2680_v50  ;;  %v2762_v50 = vld [vmem:[#allocation6 + $0x30] sm:$0xff]  ;;  %v2763_v51 = vld [vmem:[#allocation6 + $0x38] sm:$0xff] }
 0xa7f   :  { %4527 = vmatprep.subr.bf16.mxu0 %v4760_v10 }
 0xa82   :  { %4529 = vmatpush3.bf16.msra.mxu0 %v4528_v59  ;;  %v4576_v59 = vpack.c.bf16 %v2683_v58, %v2682_v57  ;;  %v2782_v57 = vld [vmem:[#allocation6 + $0xd0] sm:$0xff]  ;;  %v2783_v58 = vld [vmem:[#allocation6 + $0xd8] sm:$0xff] }
 0xa83   :  { %4554 = vmatprep.subr.bf16.mxu0 %v4760_v10  ;;  %v4622_v60 = vpack.c.bf16 %v2783_v58, %v2782_v57 }
 0xb38   :  { %v2399_v53 = vpop.f32.mrb[14].mxu0 }
 0xb39   :  { %v2400_v54 = vadd.f32 %v2399_v53, %v2332_v26  ;;  %v3490_v55 = vpop.f32.mrb[15].mxu0  ;;  %v2508_v26 = vld [vmem:[#allocation7 + $0x168] ss:$0 sm:$0xff] }
 0xb3b   :  { %v2403_v56 = vmax.f32 %v2400_v54, 0.0 }
 0xb3d   :  { %3524 = vmatmul.mubr.f32.vlgmr.msra.gmra.mrb[18].mxu1 %v2403_v56 }
 0xb3e   :  { %3593 = vmatprep.mubr.msk.f32.mxu1 %vm4761_vm0, %v4759_v23  ;;  %4532 = vmatpush3.bf16.msra.mxu1 %v4531_v0  ;;  %v2788_v0 = vld [vmem:[#allocation6 + $0x100] sm:$0xff] }
 0xb3f   :  { %4533 = vmatprep.subr.bf16.mxu1 %v4760_v10  ;;  %v4579_v3 = vpack.c.bf16 %v2789_v1, %v2788_v0  ;;  %v2784_v0 = vld [vmem:[#allocation6 + $0xe0] sm:$0xff]  ;;  %v2785_v1 = vld [vmem:[#allocation6 + $0xe8] sm:$0xff] }
 0xb42   :  { %4535 = vmatpush3.bf16.msra.mxu1 %v4534_v2  ;;  %v2790_v2 = vld [vmem:[#allocation6 + $0x110] sm:$0xff] }
 0xb43   :  { %4536 = vmatprep.subr.bf16.mxu1 %v4760_v10 }
 0xb46   :  { %4538 = vmatpush3.bf16.msra.mxu1 %v4537_v4  ;;  %v4582_v4 = vpack.c.bf16 %v2791_v62, %v2790_v2  ;;  %v2768_v62 = vld [vmem:[#allocation6 + $0x60] sm:$0xff] }
 0xb47   :  { %4539 = vmatprep.subr.bf16.mxu1 %v4760_v10 }
 0xb4a   :  { %4541 = vmatpush3.bf16.msra.mxu1 %v4540_v8  ;;  %v2794_v8 = vld [vmem:[#allocation6 + $0x130] sm:$0xff] }
 0xb4b   :  { %4542 = vmatprep.subr.bf16.mxu1 %v4760_v10  ;;  %v4588_v7 = vpack.c.bf16 %v2795_v20, %v2794_v8 }
 0xb4e   :  { %4544 = vmatpush3.bf16.msra.mxu1 %v4543_v13  ;;  %v2796_v13 = vld [vmem:[#allocation6 + $0x140] sm:$0xff] }
 0xb4f   :  { %4545 = vmatprep.subr.bf16.mxu1 %v4760_v10  ;;  %v4591_v15 = vpack.c.bf16 %v2797_v14, %v2796_v13  ;;  %v2771_v13 = vld [vmem:[#allocation6 + $0x78] sm:$0xff] }
 0xb52   :  { %4547 = vmatpush3.bf16.msra.mxu1 %v4546_v16  ;;  %v2798_v16 = vld [vmem:[#allocation6 + $0x150] sm:$0xff] }
 0xb53   :  { %4548 = vmatprep.subr.bf16.mxu1 %v4760_v10  ;;  %v4594_v18 = vpack.c.bf16 %v2799_v17, %v2798_v16  ;;  %v2802_v17 = vld [vmem:[#allocation6 + $0x170] sm:$0xff] }
 0xb56   :  { %4550 = vmatpush3.bf16.msra.mxu1 %v4549_v19  ;;  %v2800_v19 = vld [vmem:[#allocation6 + $0x160] sm:$0xff] }
 0xb57   :  { %4551 = vmatprep.subr.bf16.mxu1 %v4760_v10 }
 0xb5a   :  { %4553 = vmatpush3.bf16.msra.mxu1 %v4552_v32 }
 0xb5b   :  { %4578 = vmatprep.subr.bf16.mxu1 %v4760_v10 }
 0xc10   :  { %v2487_v25 = vpop.f32.mrb[18].mxu1 }
 0xc11   :  { %v2488_v27 = vadd.f32 %v2487_v25, %v2420_v24  ;;  %v3525_v28 = vpop.f32.mrb[19].mxu1  ;;  %v2801_v24 = vld [vmem:[#allocation6 + $0x168] sm:$0xff] }
 0xc12   :  { %v4597_v25 = vpack.c.bf16 %v2801_v24, %v2800_v19  ;;  %v2684_v24 = vld [vmem:[#allocation7 + $0x198] ss:$0 sm:$0xff] }
 0xc13   :  { %v2491_v29 = vmax.f32 %v2488_v27, 0.0  ;;  %v5032_v27 = vld [vmem:[#allocation7 + $0xc0] ss:$8 sm:$0x3] }
 0xc14   :  { %v1887_v28 = vrot.slane %v5032_v27, %v4880_v11  ;;  %v1883_v8 = vrot.slane %v5032_v27, %v4877_v9 }
 0xc15   :  { %3559 = vmatmul.mubr.f32.vlgmr.msra.gmra.mrb[16].mxu0 %v2491_v29  ;;  %v2596_v29 = vld [vmem:[#allocation7 + $0x180] ss:$0 sm:$0xff] }
 0xc16   :  { %3628 = vmatprep.mubr.msk.f32.mxu0 %vm4761_vm0, %v4759_v23  ;;  %4556 = vmatpush3.bf16.msra.mxu0 %v4555_v36  ;;  %v1959_v32 = vadd.f32 %v4971_v22, %v1887_v28  ;;  %v2760_v22 = vld [vmem:[#allocation6 + $0x20] sm:$0xff] }
 0xc17   :  { %4557 = vmatprep.subr.bf16.mxu0 %v4760_v10  ;;  %v4612_v48 = vpack.c.bf16 %v2761_v45, %v2760_v22 }
 0xc18   :  { %v1962_v42 = vmax.f32 %v1959_v32, 0.0  ;;  %v2804_v32 = vld [vmem:[#allocation7 + $0x1b0] ss:$0 sm:$0xff] }
 0xc1a   :  { %4559 = vmatpush3.bf16.msra.mxu0 %v4558_v38  ;;  %v4604_v38 = vpack.c.bf16 %v2757_v31, %v2756_v30 }
 0xc1b   :  { %4560 = vmatprep.subr.bf16.mxu0 %v4760_v10 }
 0xc1e   :  { %4562 = vmatpush3.bf16.msra.mxu0 %v4561_v41  ;;  %v2758_v41 = vld [vmem:[#allocation6 + $0x10] sm:$0xff] }
 0xc1f   :  { %4563 = vmatprep.subr.bf16.mxu0 %v4760_v10 }
 0xc22   :  { %4565 = vmatpush3.bf16.msra.mxu0 %v4564_v43  ;;  %v2777_v43 = vld [vmem:[#allocation6 + $0xa8] sm:$0xff] }
 0xc23   :  { %4566 = vmatprep.subr.bf16.mxu0 %v4760_v10  ;;  %v4610_v44 = vpack.c.bf16 %v2777_v43, %v2776_v12 }
 0xc26   :  { %4568 = vmatpush3.bf16.msra.mxu0 %v4567_v46  ;;  %v2778_v46 = vld [vmem:[#allocation6 + $0xb0] sm:$0xff] }
 0xc27   :  { %4569 = vmatprep.subr.bf16.mxu0 %v4760_v10 }
 0xc2a   :  { %4571 = vmatpush3.bf16.msra.mxu0 %v4570_v49  ;;  %v4614_v49 = vpack.c.bf16 %v2779_v47, %v2778_v46 }
 0xc2b   :  { %4572 = vmatprep.subr.bf16.mxu0 %v4760_v10 }
 0xc2e   :  { %4574 = vmatpush3.bf16.msra.mxu0 %v4573_v52  ;;  %v2780_v52 = vld [vmem:[#allocation6 + $0xc0] sm:$0xff] }
 0xc2f   :  { %4575 = vmatprep.subr.bf16.mxu0 %v4760_v10 }
 0xc32   :  { %4577 = vmatpush3.bf16.msra.mxu0 %v4576_v59 }
 0xc33   :  { %4603 = vmatprep.subr.bf16.mxu0 %v4602_v63  ;;  %v2767_v63 = vld [vmem:[#allocation6 + $0x58] sm:$0xff] }
 0xc34   :  { %v4624_v2 = vpack.c.bf16 %v2767_v63, %v2766_v61 }
 0xce8   :  { %v2575_v53 = vpop.f32.mrb[16].mxu0 }
 0xce9   :  { %v2576_v54 = vadd.f32 %v2575_v53, %v2508_v26  ;;  %v3560_v55 = vpop.f32.mrb[17].mxu0  ;;  %v2781_v26 = vld [vmem:[#allocation6 + $0xc8] sm:$0xff]  ;;  %v4616_v53 = vpack.c.bf16 %v2763_v51, %v2762_v50 }
 0xcea   :  { %v2764_v55 = vld [vmem:[#allocation6 + $0x40] sm:$0xff] }
 0xceb   :  { %v2579_v56 = vmax.f32 %v2576_v54, 0.0  ;;  %v4618_v54 = vpack.c.bf16 %v2781_v26, %v2780_v52 }
 0xced   :  { %3594 = vmatmul.mubr.f32.vlgmr.msra.gmra.mrb[20].mxu1 %v2579_v56  ;;  %v2765_v56 = vld [vmem:[#allocation6 + $0x48] sm:$0xff] }
 0xcee   :  { %3663 = vmatprep.mubr.msk.f32.mxu1 %vm4761_vm0, %v4759_v23  ;;  %4580 = vmatpush3.bf16.msra.mxu1 %v4579_v3  ;;  %v4585_v23 = vpack.c.bf16 %v2793_v6, %v2792_v5  ;;  %v4620_v59 = vpack.c.bf16 %v2765_v56, %v2764_v55  ;;  %v4626_v3 = vpack.c.bf16 %v2785_v1, %v2784_v0  ;;  %v2786_v5 = vld [vmem:[#allocation6 + $0xf0] sm:$0xff]  ;;  %v2787_v6 = vld [vmem:[#allocation6 + $0xf8] sm:$0xff] }
 0xcef   :  { %4581 = vmatprep.subr.bf16.mxu1 %v4760_v10  ;;  %v4630_v20 = vpack.c.bf16 %v2787_v6, %v2786_v5 }
 0xcf2   :  { %4583 = vmatpush3.bf16.msra.mxu1 %v4582_v4  ;;  %v2769_v4 = vld [vmem:[#allocation6 + $0x68] sm:$0xff] }
 0xcf3   :  { %4584 = vmatprep.subr.bf16.mxu1 %v4760_v10 }
 0xcf6   :  { %4586 = vmatpush3.bf16.msra.mxu1 %v4585_v23  ;;  %v4628_v23 = vpack.c.bf16 %v2769_v4, %v2768_v62 }
 0xcf7   :  { %4587 = vmatprep.subr.bf16.mxu1 %v4760_v10 }
 0xcfa   :  { %4589 = vmatpush3.bf16.msra.mxu1 %v4588_v7  ;;  %v2770_v7 = vld [vmem:[#allocation6 + $0x70] sm:$0xff] }
 0xcfb   :  { %4590 = vmatprep.subr.bf16.mxu1 %v4760_v10  ;;  %v4632_v14 = vpack.c.bf16 %v2771_v13, %v2770_v7 }
 0xcfe   :  { %4592 = vmatpush3.bf16.msra.mxu1 %v4591_v15  ;;  %v1957_v15 = vadd.f32 %v4969_v21, %v1883_v8 }
 0xcff   :  { %4593 = vmatprep.subr.bf16.mxu1 %v4760_v10 }
 0xd00   :  { %v1961_v16 = vmax.f32 %v1957_v15, 0.0 }
 0xd02   :  { %4595 = vmatpush3.bf16.msra.mxu1 %v4594_v18  ;;  %v2803_v18 = vld [vmem:[#allocation6 + $0x178] sm:$0xff] }
 0xd03   :  { %4596 = vmatprep.subr.bf16.mxu1 %v4760_v10  ;;  %v4600_v19 = vpack.c.bf16 %v2803_v18, %v2802_v17 }
 0xd06   :  { %4598 = vmatpush3.bf16.msra.mxu1 %v4597_v25 }
 0xd07   :  { %4599 = vmatprep.subr.bf16.mxu1 %v4760_v10  ;;  %v2759_v10 = vld [vmem:[#allocation6 + $0x18] sm:$0xff] }
 0xd08   :  { %v4608_v11 = vpack.c.bf16 %v2759_v10, %v2758_v41 }
 0xd0a   :  { %4601 = vmatpush3.bf16.msra.mxu1 %v4600_v19 }
 0xdc0   :  { %v2663_v33 = vpop.f32.mrb[20].mxu1 }
 0xdc1   :  { %v2664_v36 = vadd.f32 %v2663_v33, %v2596_v29  ;;  %v3595_v37 = vpop.f32.mrb[21].mxu1 }
 0xdc3   :  { %v2667_v39 = vmax.f32 %v2664_v36, 0.0 }
 0xdc5   :  { %3629 = vmatmul.mubr.f32.vlgmr.msra.gmra.mrb[18].mxu0 %v2667_v39 }
 0xdc6   :  { %4605 = vmatpush3.bf16.msra.mxu0 %v4604_v38  ;;  %2939 = vmatprep.mubr.f32.mxu0 %v1962_v42 }
 0xdc7   :  { %4607 = vmatprep.subr.bf16.mxu0 %v4606_v40 }
 0xdca   :  { %4609 = vmatpush3.bf16.msra.mxu0 %v4608_v11 }
 0xdcb   :  { %4611 = vmatprep.subr.bf16.mxu0 %v4610_v44 }
 0xdce   :  { %4613 = vmatpush3.bf16.msra.mxu0 %v4612_v48 }
 0xdcf   :  { %4615 = vmatprep.subr.bf16.mxu0 %v4614_v49 }
 0xdd2   :  { %4617 = vmatpush3.bf16.msra.mxu0 %v4616_v53 }
 0xdd3   :  { %4619 = vmatprep.subr.bf16.mxu0 %v4618_v54 }
 0xdd6   :  { %4621 = vmatpush3.bf16.msra.mxu0 %v4620_v59 }
 0xdd7   :  { %4623 = vmatprep.subr.bf16.mxu0 %v4622_v60 }
 0xdda   :  { %4625 = vmatpush3.bf16.msra.mxu0 %v4624_v2 }
 0xddb   :  { %4627 = vmatprep.subr.bf16.mxu0 %v4626_v3 }
 0xdde   :  { %4629 = vmatpush3.bf16.msra.mxu0 %v4628_v23 }
 0xddf   :  { %4631 = vmatprep.subr.bf16.mxu0 %v4630_v20 }
 0xde2   :  { %4633 = vmatpush3.bf16.msra.mxu0 %v4632_v14 }
 0xde5   :  { %2940 = vmatmul.mubr.f32.vlgmr.msra.gmra.mrb[20].mxu0 %v1961_v16 }
 0xe98   :  { %v2751_v25 = vpop.f32.mrb[18].mxu0 }
 0xe99   :  { %v2752_v28 = vadd.f32 %v2751_v25, %v2684_v24  ;;  %v3630_v9 = vpop.f32.mrb[19].mxu0 }
 0xe9b   :  { %v2755_v27 = vmax.f32 %v2752_v28, 0.0 }
 0xe9d   :  { %3664 = vmatmul.mubr.f32.vlgmr.msra.gmra.mrb[22].mxu1 %v2755_v27 }
 0xeb8   :  { %v3278_v29 = vpop.f32.mrb[20].mxu0 }
 0xeb9   :  { %v3279_v30 = vpop.f32.mrb[21].mxu0 }
 0xeba   :  { %v3280_v31 = vadd.f32 %v3279_v30, %v3278_v29 }
 0xf70   :  { %v2871_v33 = vpop.f32.mrb[22].mxu1 }
 0xf71   :  { %v2942_v21 = vadd.f32 %v3280_v31, %v2871_v33  ;;  %v3665_v34 = vpop.f32.mrb[23].mxu1 }
 0xf73   :  { %v2945_v35 = vadd.f32 %v2942_v21, %v2804_v32 }
 0xf75   :  { %2946 = vst [vmem:[%s5049_s6] sm:$0xff] %v2945_v35 }
 0xf76   :  { %2951 = vsyncpa [#allocation3], 1 }
 0xf77   :  { %2952 = vsyncpa [#allocation5], 1 }
 0xf78   :  { %2953 = vsyncpa [#allocation8], 1 }

</bundles_post_ra>
